<compile_context>
chip_gen: v5e
topology: v5e:2x2
jax: 0.10.0
libtpu: 0.0.40
codegen_flags: <defaults>
</compile_context>

<pallas_src>
import functools

import jax
import jax.numpy as jnp
from jax.experimental import pallas as pl
from jax.experimental.pallas import tpu as pltpu

# Safe on every generation (v7x scoped default); our working sets are << 1 MiB.
# At real sizes bump to 64-96 MiB on v5e/v6e, keep 32-48 MiB on v7x.
_VMEM_LIMIT = 32 * 1024 * 1024


# ----------------------------------------------------------------------------
# Wrapper-side layout prep (XLA): pad + space-to-depth + row-flatten
# ----------------------------------------------------------------------------
def _s2d_flatten(x):
    """Conv pad=1, 2x2 space-to-depth (the four stride-2 polyphase planes
    concatenated on channels), one extra zero row/col for the flat-shift
    window reads, then row-flatten: (B,H,W,C) -> (B,(H/2+2)*(W/2+2),4C)."""
    B, H, W, C = x.shape
    assert H % 2 == 0 and W % 2 == 0, "even spatial dims required"
    xp = jnp.pad(x, ((0, 0), (1, 1), (1, 1), (0, 0)))
    planes = [xp[:, p::2, q::2, :] for p in range(2) for q in range(2)]
    s2d = jnp.concatenate(planes, axis=-1)              # (B, H/2+1, W/2+1, 4C)
    s2d = jnp.pad(s2d, ((0, 0), (0, 1), (0, 1), (0, 0)))
    Hp, Wp = s2d.shape[1], s2d.shape[2]
    return s2d.reshape(B, Hp * Wp, 4 * C), Hp - 2, Wp - 2   # flat, Ho, Wo


# ----------------------------------------------------------------------------
# Kernels
# ----------------------------------------------------------------------------
def _s2d_conv_kernel(x_ref, w_ref, b_ref, o_ref, *, M, Wp, relu):
    """Stride-2 3x3 conv as 4 K-packed taps over a space-to-depth'd,
    row-flattened input.  Output rows m = i*Wp + j (j < Wp-2 valid)."""
    cout = w_ref.shape[-1]
    acc = jnp.zeros((M, cout), jnp.float32)
    for t, (a, b) in enumerate(((0, 0), (0, 1), (1, 0), (1, 1))):
        off = a * Wp + b
        acc = acc + jnp.dot(x_ref[0, off:off + M, :], w_ref[t],
                            preferred_element_type=jnp.float32)
    y = acc + b_ref[...]
    if relu:
        y = jnp.maximum(y, 0.0)
    o_ref[0] = y.astype(o_ref.dtype)


def _pan_tail_kernel(x_ref, mask_ref, w2_ref, b2_ref, wf_ref, bf_ref,
                     wh_ref, bh_ref, ofeat_ref, ohead_ref, fp_sc, *, Ho, Wo):
    """Fused: stem2 (stride-2) + FPEM 3x3 conv + ReLU + FFM residual +
    1x1 result_num head.  All activations stay in VMEM, bf16 -> MXU."""
    Wp = Wo + 2
    M = Ho * Wp
    C = wf_ref.shape[-1]
    mask = mask_ref[...]                                  # (M,1) 1.0 on real cols

    # stem2: stride-2 conv, 4 space-to-depth-packed taps (K = 4*C1)
    acc = jnp.zeros((M, C), jnp.float32)
    for t, (a, b) in enumerate(((0, 0), (0, 1), (1, 0), (1, 1))):
        off = a * Wp + b
        acc = acc + jnp.dot(x_ref[0, off:off + M, :], w2_ref[t],
                            preferred_element_type=jnp.float32)
    f2 = jnp.maximum(acc + b2_ref[...], 0.0) * mask       # waste cols -> 0

    # FPEM 3x3 pad=1 conv on f2 through a zero-padded flat VMEM scratch.
    fp_sc[...] = jnp.zeros_like(fp_sc)
    fp_sc[Wp + 1:Wp + 1 + M, :] = f2.astype(fp_sc.dtype)
    acc3 = jnp.zeros((M, C), jnp.float32)
    t = 0
    for di in range(3):
        for dj in range(3):
            off = di * Wp + dj
            acc3 = acc3 + jnp.dot(fp_sc[off:off + M, :], wf_ref[t],
                                  preferred_element_type=jnp.float32)
            t += 1
    f3 = jnp.maximum(acc3 + bf_ref[...], 0.0)

    feat = (f2 + f3) * mask                               # FFM-style residual
    feat_bf = feat.astype(jnp.bfloat16)
    head = jnp.dot(feat_bf, wh_ref[...],
                   preferred_element_type=jnp.float32) + bh_ref[...]

    # Features leave in "width-padded flat" layout [0 | row | 0] per spatial
    # row so the recognizer can crop + zero-pad with a single contiguous copy.
    ofeat_ref[...] = jnp.zeros_like(ofeat_ref)
    ofeat_ref[0, 1:1 + M, :] = feat_bf
    ohead_ref[0] = head


def _recognizer_kernel(boxes_ref, feat_ref, wdn_ref, bdn_ref,
                       wt1_ref, bt1_ref, wt2_ref, bt2_ref,
                       wcls_ref, bcls_ref, out_ref, dn_sc, sq_sc,
                       *, crop_h, Hf, Wo, T):
    """Fused per text line: Connect crop -> dn_conv 3x3 -> height mean-pool ->
    two dilated causal TCN residual blocks -> classifier."""
    Wp = Wo + 2
    M = Hf * Wp
    C = wdn_ref.shape[-1]
    n = pl.program_id(0)
    top = jnp.clip(boxes_ref[n, 1], 0, Hf - crop_h)

    # --- Connect: keep only the crop's rows; everything else is zeroed so the
    #     3x3 conv sees the crop's own zero padding (no dynamic-start DMA).
    fmap = feat_ref[0]                                    # (NFR, C) bf16
    ridx = jax.lax.broadcasted_iota(jnp.int32, (fmap.shape[0], 1), 0)
    row_ok = (ridx >= top * Wp) & (ridx < (top + crop_h) * Wp)
    fmap = jnp.where(row_ok, fmap, jnp.zeros_like(fmap))
    dn_sc[...] = jnp.zeros_like(dn_sc)
    dn_sc[Wp:Wp + fmap.shape[0], :] = fmap

    # --- DenseNet stand-in conv 3x3 + folded BN + ReLU ---
    acc = jnp.zeros((M, C), jnp.float32)
    t = 0
    for di in range(3):
        for dj in range(3):
            off = di * Wp + dj
            acc = acc + jnp.dot(dn_sc[off:off + M, :], wdn_ref[t],
                                preferred_element_type=jnp.float32)
            t += 1
    h = jnp.maximum(acc + bdn_ref[...], 0.0)

    # --- mean-pool over the line height -> (T, C) time sequence ---
    pooled = jnp.zeros((T, C), jnp.float32)
    for i in range(Hf):
        gate = ((i >= top) & (i < top + crop_h)).astype(jnp.float32)
        pooled = pooled + gate * h[i * Wp:i * Wp + T, :]
    seq = pooled * (1.0 / crop_h)

    # --- two dilated causal TCN residual blocks (k=3, dilation 1 and 2) ---
    sq_sc[...] = jnp.zeros_like(sq_sc)
    for wt_ref, bt_ref, dil in ((wt1_ref, bt1_ref, 1), (wt2_ref, bt2_ref, 2)):
        sq_sc[4:4 + T, :] = seq.astype(sq_sc.dtype)
        acc2 = jnp.zeros((T, C), jnp.float32)
        for t in range(3):
            start = 4 - 2 * dil + t * dil
            acc2 = acc2 + jnp.dot(sq_sc[start:start + T, :], wt_ref[t],
                                  preferred_element_type=jnp.float32)
        seq = jnp.maximum(acc2 + bt_ref[...], 0.0) + seq

    # --- classifier (lane-dense (T, num_classes) store) ---
    logits = jnp.dot(seq.astype(jnp.bfloat16), wcls_ref[...],
                     preferred_element_type=jnp.float32) + bcls_ref[...]
    out_ref[0] = logits


# ----------------------------------------------------------------------------
# pallas_call wrappers
# ----------------------------------------------------------------------------
def stem_conv(x, params):
    """Stride-2 3x3 conv + folded BN + ReLU on (B,H,W,Cin) bf16 -> (B,H/2,W/2,Cout)."""
    w_pk, bias = params
    xf, Ho, Wo = _s2d_flatten(x)
    B, NR, K = xf.shape
    Wp = Wo + 2
    M = Ho * Wp
    Cout = w_pk.shape[-1]
    out = pl.pallas_call(
        functools.partial(_s2d_conv_kernel, M=M, Wp=Wp, relu=True),
        out_shape=jax.ShapeDtypeStruct((B, M, Cout), jnp.bfloat16),
        grid_spec=pltpu.PrefetchScalarGridSpec(
            num_scalar_prefetch=0,
            grid=(B,),
            in_specs=[pl.BlockSpec((1, NR, K), lambda b: (b, 0, 0)),
                      pl.BlockSpec((4, K, Cout), lambda b: (0, 0, 0)),
                      pl.BlockSpec((1, Cout), lambda b: (0, 0))],
            out_specs=pl.BlockSpec((1, M, Cout), lambda b: (b, 0, 0))),
        compiler_params=pltpu.CompilerParams(
            dimension_semantics=("parallel",),
            vmem_limit_bytes=_VMEM_LIMIT),
    )(xf, w_pk, bias)
    return out.reshape(B, Ho, Wp, Cout)[:, :, :Wo, :]     # drop flat-waste cols


def pan_tail(f1, stem2_p, fpem_p, head_p):
    """Fused stem2 + FPEM/FFM + result_num head."""
    w2, b2 = stem2_p
    wf, bfp = fpem_p
    wh, bh = head_p
    xf, Ho, Wo = _s2d_flatten(f1)
    B, NR, K = xf.shape
    Wp = Wo + 2
    M = Ho * Wp
    C = wf.shape[-1]
    R = wh.shape[-1]
    NFR = (Ho + 1) * Wp
    colmask = (jnp.arange(M, dtype=jnp.int32) % Wp < Wo)
    colmask = colmask.astype(jnp.float32).reshape(M, 1)
    feat, head = pl.pallas_call(
        functools.partial(_pan_tail_kernel, Ho=Ho, Wo=Wo),
        out_shape=(jax.ShapeDtypeStruct((B, NFR, C), jnp.bfloat16),
                   jax.ShapeDtypeStruct((B, M, R), jnp.float32)),
        grid_spec=pltpu.PrefetchScalarGridSpec(
            num_scalar_prefetch=0,
            grid=(B,),
            in_specs=[
                pl.BlockSpec((1, NR, K), lambda b: (b, 0, 0)),
                pl.BlockSpec((M, 1), lambda b: (0, 0)),
                pl.BlockSpec((4, K, C), lambda b: (0, 0, 0)),
                pl.BlockSpec((1, C), lambda b: (0, 0)),
                pl.BlockSpec((9, C, C), lambda b: (0, 0, 0)),
                pl.BlockSpec((1, C), lambda b: (0, 0)),
                pl.BlockSpec((C, R), lambda b: (0, 0)),
                pl.BlockSpec((1, R), lambda b: (0, 0)),
            ],
            out_specs=(pl.BlockSpec((1, NFR, C), lambda b: (b, 0, 0)),
                       pl.BlockSpec((1, M, R), lambda b: (b, 0, 0))),
            scratch_shapes=[pltpu.VMEM(((Ho + 3) * Wp, C), jnp.bfloat16)]),
        compiler_params=pltpu.CompilerParams(
            dimension_semantics=("parallel",),
            vmem_limit_bytes=_VMEM_LIMIT),
    )(xf, colmask, w2, b2, wf, bfp, wh, bh)
    kernels = head.reshape(B, Ho, Wp, R)[:, :, :Wo, :]    # (B, Hf, Wf, R)
    return feat, kernels, Ho, Wo


def recognizer(features, gt_boxes, params, crop_h, Hf, Wf):
    """Connect crop + DenseNet_with_TCN recognizer fused over grid=(Nbox,)."""
    B, NFR, C = features.shape
    assert crop_h <= Hf
    wdn, bdn = params["dn_conv"]
    (wt1, bt1), (wt2, bt2) = params["tcn"]
    wcls, bcls = params["cls"]
    NC = wcls.shape[-1]
    Nbox = gt_boxes.shape[0]
    T = Wf
    Wp = Wf + 2
    full3 = lambda n, boxes: (0, 0, 0)
    full2 = lambda n, boxes: (0, 0)
    out = pl.pallas_call(
        functools.partial(_recognizer_kernel, crop_h=crop_h, Hf=Hf, Wo=Wf, T=T),
        out_shape=jax.ShapeDtypeStruct((Nbox, T, NC), jnp.float32),
        grid_spec=pltpu.PrefetchScalarGridSpec(
            num_scalar_prefetch=1,                 # gt_boxes -> SMEM
            grid=(Nbox,),
            in_specs=[
                pl.BlockSpec(
                    (1, NFR, C),
                    lambda n, boxes: (jnp.clip(boxes[n, 0], 0, B - 1), 0, 0)),
                pl.BlockSpec((9, C, C), full3),
                pl.BlockSpec((1, C), full2),
                pl.BlockSpec((3, C, C), full3),
                pl.BlockSpec((1, C), full2),
                pl.BlockSpec((3, C, C), full3),
                pl.BlockSpec((1, C), full2),
                pl.BlockSpec((C, NC), full2),
                pl.BlockSpec((1, NC), full2),
            ],
            out_specs=pl.BlockSpec((1, T, NC), lambda n, boxes: (n, 0, 0)),
            scratch_shapes=[
                pltpu.VMEM(((Hf + 4) * Wp, C), jnp.bfloat16),   # padded conv scratch
                pltpu.VMEM((T + 4, C), jnp.bfloat16),           # causal TCN scratch
            ]),
        compiler_params=pltpu.CompilerParams(
            dimension_semantics=("arbitrary",),
            vmem_limit_bytes=_VMEM_LIMIT),
    )(gt_boxes, features, wdn, bdn, wt1, bt1, wt2, bt2, wcls, bcls)
    return out


# ----------------------------------------------------------------------------
# Deterministic parameter init (synthetic weights, eval-mode BN folded, bf16,
# taps stacked / K-packed once at init)
# ----------------------------------------------------------------------------
def _fold_bn(cout):
    return jnp.ones((cout,), jnp.float32)      # gamma / sqrt(var + eps) == 1


def _init_conv2d_s2(key, cin, cout, k=3):
    """Stride-2 3x3 conv packed for the space-to-depth form: (4, 4*cin, cout)."""
    kw_, kb = jax.random.split(key)
    w = jax.random.normal(kw_, (cout, cin, k, k), jnp.float32) / ((cin * k * k) ** 0.5)
    bias = (jax.random.normal(kb, (cout,), jnp.float32) * 0.01).reshape(1, cout)
    wt = jnp.transpose(w, (2, 3, 1, 0)) * _fold_bn(cout)[None, None, None, :]
    packed = jnp.zeros((4, 4 * cin, cout), jnp.float32)
    for a in range(2):
        for b in range(2):
            for p in range(2):
                for q in range(2):
                    di, dj = 2 * a + p, 2 * b + q
                    if di < k and dj < k:
                        packed = packed.at[
                            2 * a + b, (2 * p + q) * cin:(2 * p + q + 1) * cin, :
                        ].set(wt[di, dj])
    return packed.astype(jnp.bfloat16), bias


def _init_conv2d_s1(key, cin, cout, k=3):
    kw_, kb = jax.random.split(key)
    w = jax.random.normal(kw_, (cout, cin, k, k), jnp.float32) / ((cin * k * k) ** 0.5)
    bias = (jax.random.normal(kb, (cout,), jnp.float32) * 0.01).reshape(1, cout)
    wt = jnp.transpose(w, (2, 3, 1, 0)) * _fold_bn(cout)[None, None, None, :]
    return wt.reshape(k * k, cin, cout).astype(jnp.bfloat16), bias


def _init_conv1x1(key, cin, cout):
    kw_, kb = jax.random.split(key)
    w = jax.random.normal(kw_, (cout, cin), jnp.float32) / (cin ** 0.5)
    bias = (jax.random.normal(kb, (cout,), jnp.float32) * 0.01).reshape(1, cout)
    return jnp.transpose(w).astype(jnp.bfloat16), bias


def _init_conv1d(key, cin, cout, k=3):
    kw_, kb = jax.random.split(key)
    w = jax.random.normal(kw_, (cout, cin, k), jnp.float32) / ((cin * k) ** 0.5)
    bias = (jax.random.normal(kb, (cout,), jnp.float32) * 0.01).reshape(1, cout)
    wt = jnp.transpose(w, (2, 1, 0)) * _fold_bn(cout)[None, None, :]
    return wt.astype(jnp.bfloat16), bias


def init_params(key, num_classes=256, feat_ch=32, stem_ch=16, result_num=7):
    ks = jax.random.split(key, 8)
    return {
        # TODO(synk): full resnet34 backbone + 4x FPEM repeats are not
        # reproducible from the reference snippet; a stride-4 conv stem + one
        # fused FPEM/FFM-style residual stage stands in for PANnet.
        "stem1": _init_conv2d_s2(ks[0], 3, stem_ch),          # /2
        "stem2": _init_conv2d_s2(ks[1], stem_ch, feat_ch),    # /4
        "fpem": _init_conv2d_s1(ks[2], feat_ch, feat_ch),
        "head": _init_conv1x1(ks[3], feat_ch, result_num),    # 7 seg. kernels
        # DenseNet_with_TCN_big recognizer stand-in
        "dn_conv": _init_conv2d_s1(ks[4], feat_ch, feat_ch),
        "tcn": [_init_conv1d(ks[5], feat_ch, feat_ch),        # dilation 1
                _init_conv1d(ks[6], feat_ch, feat_ch)],       # dilation 2
        "cls": ((jax.random.normal(ks[7], (feat_ch, num_classes), jnp.float32)
                 / (feat_ch ** 0.5)).astype(jnp.bfloat16),
                jnp.zeros((1, num_classes), jnp.float32)),
    }


# ----------------------------------------------------------------------------
# Full model forward (mirrors Model.forward training path)
# ----------------------------------------------------------------------------
def model_forward(params, img_nchw, gt_boxes, is_train=True, line_height=32):
    # TODO(synk): the eval path of Connect (contour extraction, line_top_lefts,
    # line_contours) is not reproducible; only the training path is implemented.
    assert (is_train and gt_boxes is not None) or (not is_train)
    x = jnp.transpose(img_nchw, (0, 2, 3, 1)).astype(jnp.bfloat16)   # NCHW->NHWC

    # --- PAN_layer ---
    f1 = stem_conv(x, params["stem1"])                               # /2
    features, kernels_head, Hf, Wf = pan_tail(
        f1, params["stem2"], params["fpem"], params["head"])         # /4

    # --- Connect_layer + DenseNet_layer (fused into one pallas_call) ---
    # TODO(synk): the real Connect layer does contour extraction + perspective
    # rectification of arbitrary quads; only axis-aligned fixed-size crops of
    # the feature map (given (batch, top, left) boxes) are reproducible here.
    crop_h = line_height // 4                                        # 1/4 scale
    out_chars = recognizer(features, gt_boxes, params, crop_h, Hf, Wf)

    B = x.shape[0]
    sub_img_nums = jnp.bincount(jnp.clip(gt_boxes[:, 0], 0, B - 1), length=B)
    kernels_nchw = jnp.transpose(kernels_head, (0, 3, 1, 2))         # NCHW (f32)
    return kernels_nchw, out_chars, sub_img_nums


# ----------------------------------------------------------------------------
if __name__ == "__main__":
    key = jax.random.PRNGKey(0)
    pkey, ikey = jax.random.split(key)

    num_classes = 256                                  # small stand-in for 3000
    params = init_params(pkey, num_classes=num_classes)

    img = jax.random.normal(ikey, (2, 3, 32, 32), jnp.float32)       # (B,C,H,W)
    # (batch_idx, top, left) of each text line in feature-map coordinates
    gt_boxes = jnp.array([[0, 0, 0], [0, 0, 0], [1, 0, 0]], jnp.int32)

    fwd = jax.jit(functools.partial(model_forward, params))
    kernels, out_chars, sub_img_nums = fwd(img, gt_boxes)
    jax.block_until_ready((kernels, out_chars, sub_img_nums))

    assert kernels.shape == (2, 7, 8, 8), kernels.shape
    assert out_chars.shape == (3, 8, num_classes), out_chars.shape
    assert sub_img_nums.shape == (2,), sub_img_nums.shape
    print("KERNEL_OK")
</pallas_src>

<mosaic_0001>
module attributes {stable_mosaic.version = 11 : i64} {
  func.func @_s2d_conv_kernel(%arg0: i32, %arg1: memref<1x324x12xbf16, #tpu.memory_space<vmem>>, %arg2: memref<4x12x16xbf16, #tpu.memory_space<vmem>>, %arg3: memref<1x16xf32, #tpu.memory_space<vmem>>, %arg4: memref<1x288x16xbf16, #tpu.memory_space<vmem>>) attributes {dimension_semantics = [#tpu.dimension_semantics<parallel>], iteration_bounds = array<i64: 2>, scalar_prefetch = 0 : i64, scratch_operands = 0 : i64, tpu.core_type = #tpu.core_type<tc>, window_params = [{transform_indices = @transform_0, window_bounds = array<i64: 1, 324, 12>}, {pipeline_mode = #tpu.pipeline_mode<synchronous>, transform_indices = @transform_1, window_bounds = array<i64: 4, 12, 16>}, {pipeline_mode = #tpu.pipeline_mode<synchronous>, transform_indices = @transform_2, window_bounds = array<i64: 1, 16>}, {transform_indices = @transform_3, window_bounds = array<i64: 1, 288, 16>}]} {
    %cst = arith.constant 0.000000e+00 : f32
    %0 = vector.broadcast %cst : f32 to vector<288x16xf32>
    %c0 = arith.constant 0 : index
    %c0_0 = arith.constant 0 : index
    %c0_1 = arith.constant 0 : index
    %1 = vector.load %arg1[%c0, %c0_0, %c0_1] : memref<1x324x12xbf16, #tpu.memory_space<vmem>>, vector<1x288x12xbf16>
    %2 = vector.shape_cast %1 : vector<1x288x12xbf16> to vector<288x12xbf16>
    %c0_2 = arith.constant 0 : index
    %c0_3 = arith.constant 0 : index
    %c0_4 = arith.constant 0 : index
    %3 = vector.load %arg2[%c0_2, %c0_3, %c0_4] : memref<4x12x16xbf16, #tpu.memory_space<vmem>>, vector<1x12x16xbf16>
    %4 = vector.shape_cast %3 : vector<1x12x16xbf16> to vector<12x16xbf16>
    %cst_5 = arith.constant dense<0.000000e+00> : vector<288x16xf32>
    %5 = tpu.matmul %2, %4, %cst_5 {dimension_numbers = #tpu.dot_dimension_numbers<[1], [0], [0], [1], [0, 0, 1, 1], [], []>} : vector<288x12xbf16>, vector<12x16xbf16>, vector<288x16xf32> -> vector<288x16xf32>
    %6 = arith.addf %0, %5 : vector<288x16xf32>
    %c0_6 = arith.constant 0 : index
    %c1 = arith.constant 1 : index
    %c0_7 = arith.constant 0 : index
    %7 = vector.load %arg1[%c0_6, %c1, %c0_7] : memref<1x324x12xbf16, #tpu.memory_space<vmem>>, vector<1x288x12xbf16>
    %8 = vector.shape_cast %7 : vector<1x288x12xbf16> to vector<288x12xbf16>
    %c1_8 = arith.constant 1 : index
    %c0_9 = arith.constant 0 : index
    %c0_10 = arith.constant 0 : index
    %9 = vector.load %arg2[%c1_8, %c0_9, %c0_10] : memref<4x12x16xbf16, #tpu.memory_space<vmem>>, vector<1x12x16xbf16>
    %10 = vector.shape_cast %9 : vector<1x12x16xbf16> to vector<12x16xbf16>
    %cst_11 = arith.constant dense<0.000000e+00> : vector<288x16xf32>
    %11 = tpu.matmul %8, %10, %cst_11 {dimension_numbers = #tpu.dot_dimension_numbers<[1], [0], [0], [1], [0, 0, 1, 1], [], []>} : vector<288x12xbf16>, vector<12x16xbf16>, vector<288x16xf32> -> vector<288x16xf32>
    %12 = arith.addf %6, %11 : vector<288x16xf32>
    %c0_12 = arith.constant 0 : index
    %c18 = arith.constant 18 : index
    %c0_13 = arith.constant 0 : index
    %13 = vector.load %arg1[%c0_12, %c18, %c0_13] : memref<1x324x12xbf16, #tpu.memory_space<vmem>>, vector<1x288x12xbf16>
    %14 = vector.shape_cast %13 : vector<1x288x12xbf16> to vector<288x12xbf16>
    %c2 = arith.constant 2 : index
    %c0_14 = arith.constant 0 : index
    %c0_15 = arith.constant 0 : index
    %15 = vector.load %arg2[%c2, %c0_14, %c0_15] : memref<4x12x16xbf16, #tpu.memory_space<vmem>>, vector<1x12x16xbf16>
    %16 = vector.shape_cast %15 : vector<1x12x16xbf16> to vector<12x16xbf16>
    %cst_16 = arith.constant dense<0.000000e+00> : vector<288x16xf32>
    %17 = tpu.matmul %14, %16, %cst_16 {dimension_numbers = #tpu.dot_dimension_numbers<[1], [0], [0], [1], [0, 0, 1, 1], [], []>} : vector<288x12xbf16>, vector<12x16xbf16>, vector<288x16xf32> -> vector<288x16xf32>
    %18 = arith.addf %12, %17 : vector<288x16xf32>
    %c0_17 = arith.constant 0 : index
    %c19 = arith.constant 19 : index
    %c0_18 = arith.constant 0 : index
    %19 = vector.load %arg1[%c0_17, %c19, %c0_18] : memref<1x324x12xbf16, #tpu.memory_space<vmem>>, vector<1x288x12xbf16>
    %20 = vector.shape_cast %19 : vector<1x288x12xbf16> to vector<288x12xbf16>
    %c3 = arith.constant 3 : index
    %c0_19 = arith.constant 0 : index
    %c0_20 = arith.constant 0 : index
    %21 = vector.load %arg2[%c3, %c0_19, %c0_20] : memref<4x12x16xbf16, #tpu.memory_space<vmem>>, vector<1x12x16xbf16>
    %22 = vector.shape_cast %21 : vector<1x12x16xbf16> to vector<12x16xbf16>
    %cst_21 = arith.constant dense<0.000000e+00> : vector<288x16xf32>
    %23 = tpu.matmul %20, %22, %cst_21 {dimension_numbers = #tpu.dot_dimension_numbers<[1], [0], [0], [1], [0, 0, 1, 1], [], []>} : vector<288x12xbf16>, vector<12x16xbf16>, vector<288x16xf32> -> vector<288x16xf32>
    %24 = arith.addf %18, %23 : vector<288x16xf32>
    %c0_22 = arith.constant 0 : index
    %c0_23 = arith.constant 0 : index
    %25 = vector.load %arg3[%c0_22, %c0_23] : memref<1x16xf32, #tpu.memory_space<vmem>>, vector<1x16xf32>
    %26 = vector.broadcast %25 : vector<1x16xf32> to vector<288x16xf32>
    %27 = arith.addf %24, %26 : vector<288x16xf32>
    %cst_24 = arith.constant 0.000000e+00 : f32
    %28 = vector.broadcast %cst_24 : f32 to vector<288x16xf32>
    %29 = arith.maximumf %27, %28 : vector<288x16xf32>
    %30 = arith.truncf %29 : vector<288x16xf32> to vector<288x16xbf16>
    %c0_25 = arith.constant 0 : index
    %c0_26 = arith.constant 0 : index
    %c0_27 = arith.constant 0 : index
    %31 = vector.load %arg4[%c0_25, %c0_26, %c0_27] : memref<1x288x16xbf16, #tpu.memory_space<vmem>>, vector<1x288x16xbf16>
    %32 = vector.shape_cast %31 : vector<1x288x16xbf16> to vector<288x16xbf16>
    %33 = vector.shape_cast %30 : vector<288x16xbf16> to vector<1x288x16xbf16>
    tpu.vector_store %arg4[%c0_25, %c0_26, %c0_27], %33 {strides = array<i32>} : memref<1x288x16xbf16, #tpu.memory_space<vmem>>, vector<1x288x16xbf16>,
    return
  }
  func.func @transform_0(%arg0: i32) -> (i32, i32, i32) {
    %c0_i32 = arith.constant 0 : i32
    %c0_i32_0 = arith.constant 0 : i32
    %c0_i32_1 = arith.constant 0 : i32
    return %arg0, %c0_i32, %c0_i32_0 : i32, i32, i32
  }
  func.func @transform_1(%arg0: i32) -> (i32, i32, i32) {
    %c0_i32 = arith.constant 0 : i32
    %c0_i32_0 = arith.constant 0 : i32
    %c0_i32_1 = arith.constant 0 : i32
    %c0_i32_2 = arith.constant 0 : i32
    return %c0_i32, %c0_i32_0, %c0_i32_1 : i32, i32, i32
  }
  func.func @transform_2(%arg0: i32) -> (i32, i32) {
    %c0_i32 = arith.constant 0 : i32
    %c0_i32_0 = arith.constant 0 : i32
    %c0_i32_1 = arith.constant 0 : i32
    return %c0_i32, %c0_i32_0 : i32, i32
  }
  func.func @transform_3(%arg0: i32) -> (i32, i32, i32) {
    %c0_i32 = arith.constant 0 : i32
    %c0_i32_0 = arith.constant 0 : i32
    %c0_i32_1 = arith.constant 0 : i32
    return %arg0, %c0_i32, %c0_i32_0 : i32, i32, i32
  }
}

module attributes {stable_mosaic.version = 11 : i64} {
  func.func @_pan_tail_kernel(%arg0: i32, %arg1: memref<1x100x64xbf16, #tpu.memory_space<vmem>>, %arg2: memref<80x1xf32, #tpu.memory_space<vmem>>, %arg3: memref<4x64x32xbf16, #tpu.memory_space<vmem>>, %arg4: memref<1x32xf32, #tpu.memory_space<vmem>>, %arg5: memref<9x32x32xbf16, #tpu.memory_space<vmem>>, %arg6: memref<1x32xf32, #tpu.memory_space<vmem>>, %arg7: memref<32x7xbf16, #tpu.memory_space<vmem>>, %arg8: memref<1x7xf32, #tpu.memory_space<vmem>>, %arg9: memref<1x90x32xbf16, #tpu.memory_space<vmem>>, %arg10: memref<1x80x7xf32, #tpu.memory_space<vmem>>, %arg11: memref<110x32xbf16, #tpu.memory_space<vmem>>) attributes {dimension_semantics = [#tpu.dimension_semantics<parallel>], iteration_bounds = array<i64: 2>, scalar_prefetch = 0 : i64, scratch_operands = 1 : i64, tpu.core_type = #tpu.core_type<tc>, window_params = [{transform_indices = @transform_0, window_bounds = array<i64: 1, 100, 64>}, {pipeline_mode = #tpu.pipeline_mode<synchronous>, transform_indices = @transform_1, window_bounds = array<i64: 80, 1>}, {pipeline_mode = #tpu.pipeline_mode<synchronous>, transform_indices = @transform_2, window_bounds = array<i64: 4, 64, 32>}, {pipeline_mode = #tpu.pipeline_mode<synchronous>, transform_indices = @transform_3, window_bounds = array<i64: 1, 32>}, {pipeline_mode = #tpu.pipeline_mode<synchronous>, transform_indices = @transform_4, window_bounds = array<i64: 9, 32, 32>}, {pipeline_mode = #tpu.pipeline_mode<synchronous>, transform_indices = @transform_5, window_bounds = array<i64: 1, 32>}, {pipeline_mode = #tpu.pipeline_mode<synchronous>, transform_indices = @transform_6, window_bounds = array<i64: 32, 7>}, {pipeline_mode = #tpu.pipeline_mode<synchronous>, transform_indices = @transform_7, window_bounds = array<i64: 1, 7>}, {transform_indices = @transform_8, window_bounds = array<i64: 1, 90, 32>}, {transform_indices = @transform_9, window_bounds = array<i64: 1, 80, 7>}]} {
    %c0 = arith.constant 0 : index
    %c0_0 = arith.constant 0 : index
    %0 = vector.load %arg2[%c0, %c0_0] : memref<80x1xf32, #tpu.memory_space<vmem>>, vector<80x1xf32>
    %cst = arith.constant 0.000000e+00 : f32
    %1 = vector.broadcast %cst : f32 to vector<80x32xf32>
    %c0_1 = arith.constant 0 : index
    %c0_2 = arith.constant 0 : index
    %c0_3 = arith.constant 0 : index
    %2 = vector.load %arg1[%c0_1, %c0_2, %c0_3] : memref<1x100x64xbf16, #tpu.memory_space<vmem>>, vector<1x80x64xbf16>
    %3 = vector.shape_cast %2 : vector<1x80x64xbf16> to vector<80x64xbf16>
    %c0_4 = arith.constant 0 : index
    %c0_5 = arith.constant 0 : index
    %c0_6 = arith.constant 0 : index
    %4 = vector.load %arg3[%c0_4, %c0_5, %c0_6] : memref<4x64x32xbf16, #tpu.memory_space<vmem>>, vector<1x64x32xbf16>
    %5 = vector.shape_cast %4 : vector<1x64x32xbf16> to vector<64x32xbf16>
    %cst_7 = arith.constant dense<0.000000e+00> : vector<80x32xf32>
    %6 = tpu.matmul %3, %5, %cst_7 {dimension_numbers = #tpu.dot_dimension_numbers<[1], [0], [0], [1], [0, 0, 1, 1], [], []>} : vector<80x64xbf16>, vector<64x32xbf16>, vector<80x32xf32> -> vector<80x32xf32>
    %7 = arith.addf %1, %6 : vector<80x32xf32>
    %c0_8 = arith.constant 0 : index
    %c1 = arith.constant 1 : index
    %c0_9 = arith.constant 0 : index
    %8 = vector.load %arg1[%c0_8, %c1, %c0_9] : memref<1x100x64xbf16, #tpu.memory_space<vmem>>, vector<1x80x64xbf16>
    %9 = vector.shape_cast %8 : vector<1x80x64xbf16> to vector<80x64xbf16>
    %c1_10 = arith.constant 1 : index
    %c0_11 = arith.constant 0 : index
    %c0_12 = arith.constant 0 : index
    %10 = vector.load %arg3[%c1_10, %c0_11, %c0_12] : memref<4x64x32xbf16, #tpu.memory_space<vmem>>, vector<1x64x32xbf16>
    %11 = vector.shape_cast %10 : vector<1x64x32xbf16> to vector<64x32xbf16>
    %cst_13 = arith.constant dense<0.000000e+00> : vector<80x32xf32>
    %12 = tpu.matmul %9, %11, %cst_13 {dimension_numbers = #tpu.dot_dimension_numbers<[1], [0], [0], [1], [0, 0, 1, 1], [], []>} : vector<80x64xbf16>, vector<64x32xbf16>, vector<80x32xf32> -> vector<80x32xf32>
    %13 = arith.addf %7, %12 : vector<80x32xf32>
    %c0_14 = arith.constant 0 : index
    %c10 = arith.constant 10 : index
    %c0_15 = arith.constant 0 : index
    %14 = vector.load %arg1[%c0_14, %c10, %c0_15] : memref<1x100x64xbf16, #tpu.memory_space<vmem>>, vector<1x80x64xbf16>
    %15 = vector.shape_cast %14 : vector<1x80x64xbf16> to vector<80x64xbf16>
    %c2 = arith.constant 2 : index
    %c0_16 = arith.constant 0 : index
    %c0_17 = arith.constant 0 : index
    %16 = vector.load %arg3[%c2, %c0_16, %c0_17] : memref<4x64x32xbf16, #tpu.memory_space<vmem>>, vector<1x64x32xbf16>
    %17 = vector.shape_cast %16 : vector<1x64x32xbf16> to vector<64x32xbf16>
    %cst_18 = arith.constant dense<0.000000e+00> : vector<80x32xf32>
    %18 = tpu.matmul %15, %17, %cst_18 {dimension_numbers = #tpu.dot_dimension_numbers<[1], [0], [0], [1], [0, 0, 1, 1], [], []>} : vector<80x64xbf16>, vector<64x32xbf16>, vector<80x32xf32> -> vector<80x32xf32>
    %19 = arith.addf %13, %18 : vector<80x32xf32>
    %c0_19 = arith.constant 0 : index
    %c11 = arith.constant 11 : index
    %c0_20 = arith.constant 0 : index
    %20 = vector.load %arg1[%c0_19, %c11, %c0_20] : memref<1x100x64xbf16, #tpu.memory_space<vmem>>, vector<1x80x64xbf16>
    %21 = vector.shape_cast %20 : vector<1x80x64xbf16> to vector<80x64xbf16>
    %c3 = arith.constant 3 : index
    %c0_21 = arith.constant 0 : index
    %c0_22 = arith.constant 0 : index
    %22 = vector.load %arg3[%c3, %c0_21, %c0_22] : memref<4x64x32xbf16, #tpu.memory_space<vmem>>, vector<1x64x32xbf16>
    %23 = vector.shape_cast %22 : vector<1x64x32xbf16> to vector<64x32xbf16>
    %cst_23 = arith.constant dense<0.000000e+00> : vector<80x32xf32>
    %24 = tpu.matmul %21, %23, %cst_23 {dimension_numbers = #tpu.dot_dimension_numbers<[1], [0], [0], [1], [0, 0, 1, 1], [], []>} : vector<80x64xbf16>, vector<64x32xbf16>, vector<80x32xf32> -> vector<80x32xf32>
    %25 = arith.addf %19, %24 : vector<80x32xf32>
    %c0_24 = arith.constant 0 : index
    %c0_25 = arith.constant 0 : index
    %26 = vector.load %arg4[%c0_24, %c0_25] : memref<1x32xf32, #tpu.memory_space<vmem>>, vector<1x32xf32>
    %27 = vector.broadcast %26 : vector<1x32xf32> to vector<80x32xf32>
    %28 = arith.addf %25, %27 : vector<80x32xf32>
    %cst_26 = arith.constant 0.000000e+00 : f32
    %29 = vector.broadcast %cst_26 : f32 to vector<80x32xf32>
    %30 = arith.maximumf %28, %29 : vector<80x32xf32>
    %31 = vector.broadcast %0 : vector<80x1xf32> to vector<80x32xf32>
    %32 = arith.mulf %30, %31 : vector<80x32xf32>
    %cst_27 = arith.constant 0.000000e+00 : bf16
    %33 = vector.broadcast %cst_27 : bf16 to vector<110x32xbf16>
    %c0_28 = arith.constant 0 : index
    %c0_29 = arith.constant 0 : index
    %34 = vector.load %arg11[%c0_28, %c0_29] : memref<110x32xbf16, #tpu.memory_space<vmem>>, vector<110x32xbf16>
    tpu.vector_store %arg11[%c0_28, %c0_29], %33 {strides = array<i32>} : memref<110x32xbf16, #tpu.memory_space<vmem>>, vector<110x32xbf16>,
    %35 = arith.truncf %32 : vector<80x32xf32> to vector<80x32xbf16>
    %c11_30 = arith.constant 11 : index
    %c0_31 = arith.constant 0 : index
    %36 = vector.load %arg11[%c11_30, %c0_31] : memref<110x32xbf16, #tpu.memory_space<vmem>>, vector<80x32xbf16>
    tpu.vector_store %arg11[%c11_30, %c0_31], %35 {strides = array<i32>} : memref<110x32xbf16, #tpu.memory_space<vmem>>, vector<80x32xbf16>,
    %cst_32 = arith.constant 0.000000e+00 : f32
    %37 = vector.broadcast %cst_32 : f32 to vector<80x32xf32>
    %c0_33 = arith.constant 0 : index
    %c0_34 = arith.constant 0 : index
    %38 = vector.load %arg11[%c0_33, %c0_34] : memref<110x32xbf16, #tpu.memory_space<vmem>>, vector<80x32xbf16>
    %c0_35 = arith.constant 0 : index
    %c0_36 = arith.constant 0 : index
    %c0_37 = arith.constant 0 : index
    %39 = vector.load %arg5[%c0_35, %c0_36, %c0_37] : memref<9x32x32xbf16, #tpu.memory_space<vmem>>, vector<1x32x32xbf16>
    %40 = vector.shape_cast %39 : vector<1x32x32xbf16> to vector<32x32xbf16>
    %cst_38 = arith.constant dense<0.000000e+00> : vector<80x32xf32>
    %41 = tpu.matmul %38, %40, %cst_38 {dimension_numbers = #tpu.dot_dimension_numbers<[1], [0], [0], [1], [0, 0, 1, 1], [], []>} : vector<80x32xbf16>, vector<32x32xbf16>, vector<80x32xf32> -> vector<80x32xf32>
    %42 = arith.addf %37, %41 : vector<80x32xf32>
    %c1_39 = arith.constant 1 : index
    %c0_40 = arith.constant 0 : index
    %43 = vector.load %arg11[%c1_39, %c0_40] : memref<110x32xbf16, #tpu.memory_space<vmem>>, vector<80x32xbf16>
    %c1_41 = arith.constant 1 : index
    %c0_42 = arith.constant 0 : index
    %c0_43 = arith.constant 0 : index
    %44 = vector.load %arg5[%c1_41, %c0_42, %c0_43] : memref<9x32x32xbf16, #tpu.memory_space<vmem>>, vector<1x32x32xbf16>
    %45 = vector.shape_cast %44 : vector<1x32x32xbf16> to vector<32x32xbf16>
    %cst_44 = arith.constant dense<0.000000e+00> : vector<80x32xf32>
    %46 = tpu.matmul %43, %45, %cst_44 {dimension_numbers = #tpu.dot_dimension_numbers<[1], [0], [0], [1], [0, 0, 1, 1], [], []>} : vector<80x32xbf16>, vector<32x32xbf16>, vector<80x32xf32> -> vector<80x32xf32>
    %47 = arith.addf %42, %46 : vector<80x32xf32>
    %c2_45 = arith.constant 2 : index
    %c0_46 = arith.constant 0 : index
    %48 = vector.load %arg11[%c2_45, %c0_46] : memref<110x32xbf16, #tpu.memory_space<vmem>>, vector<80x32xbf16>
    %c2_47 = arith.constant 2 : index
    %c0_48 = arith.constant 0 : index
    %c0_49 = arith.constant 0 : index
    %49 = vector.load %arg5[%c2_47, %c0_48, %c0_49] : memref<9x32x32xbf16, #tpu.memory_space<vmem>>, vector<1x32x32xbf16>
    %50 = vector.shape_cast %49 : vector<1x32x32xbf16> to vector<32x32xbf16>
    %cst_50 = arith.constant dense<0.000000e+00> : vector<80x32xf32>
    %51 = tpu.matmul %48, %50, %cst_50 {dimension_numbers = #tpu.dot_dimension_numbers<[1], [0], [0], [1], [0, 0, 1, 1], [], []>} : vector<80x32xbf16>, vector<32x32xbf16>, vector<80x32xf32> -> vector<80x32xf32>
    %52 = arith.addf %47, %51 : vector<80x32xf32>
    %c10_51 = arith.constant 10 : index
    %c0_52 = arith.constant 0 : index
    %53 = vector.load %arg11[%c10_51, %c0_52] : memref<110x32xbf16, #tpu.memory_space<vmem>>, vector<80x32xbf16>
    %c3_53 = arith.constant 3 : index
    %c0_54 = arith.constant 0 : index
    %c0_55 = arith.constant 0 : index
    %54 = vector.load %arg5[%c3_53, %c0_54, %c0_55] : memref<9x32x32xbf16, #tpu.memory_space<vmem>>, vector<1x32x32xbf16>
    %55 = vector.shape_cast %54 : vector<1x32x32xbf16> to vector<32x32xbf16>
    %cst_56 = arith.constant dense<0.000000e+00> : vector<80x32xf32>
    %56 = tpu.matmul %53, %55, %cst_56 {dimension_numbers = #tpu.dot_dimension_numbers<[1], [0], [0], [1], [0, 0, 1, 1], [], []>} : vector<80x32xbf16>, vector<32x32xbf16>, vector<80x32xf32> -> vector<80x32xf32>
    %57 = arith.addf %52, %56 : vector<80x32xf32>
    %c11_57 = arith.constant 11 : index
    %c0_58 = arith.constant 0 : index
    %58 = vector.load %arg11[%c11_57, %c0_58] : memref<110x32xbf16, #tpu.memory_space<vmem>>, vector<80x32xbf16>
    %c4 = arith.constant 4 : index
    %c0_59 = arith.constant 0 : index
    %c0_60 = arith.constant 0 : index
    %59 = vector.load %arg5[%c4, %c0_59, %c0_60] : memref<9x32x32xbf16, #tpu.memory_space<vmem>>, vector<1x32x32xbf16>
    %60 = vector.shape_cast %59 : vector<1x32x32xbf16> to vector<32x32xbf16>
    %cst_61 = arith.constant dense<0.000000e+00> : vector<80x32xf32>
    %61 = tpu.matmul %58, %60, %cst_61 {dimension_numbers = #tpu.dot_dimension_numbers<[1], [0], [0], [1], [0, 0, 1, 1], [], []>} : vector<80x32xbf16>, vector<32x32xbf16>, vector<80x32xf32> -> vector<80x32xf32>
    %62 = arith.addf %57, %61 : vector<80x32xf32>
    %c12 = arith.constant 12 : index
    %c0_62 = arith.constant 0 : index
    %63 = vector.load %arg11[%c12, %c0_62] : memref<110x32xbf16, #tpu.memory_space<vmem>>, vector<80x32xbf16>
    %c5 = arith.constant 5 : index
    %c0_63 = arith.constant 0 : index
    %c0_64 = arith.constant 0 : index
    %64 = vector.load %arg5[%c5, %c0_63, %c0_64] : memref<9x32x32xbf16, #tpu.memory_space<vmem>>, vector<1x32x32xbf16>
    %65 = vector.shape_cast %64 : vector<1x32x32xbf16> to vector<32x32xbf16>
    %cst_65 = arith.constant dense<0.000000e+00> : vector<80x32xf32>
    %66 = tpu.matmul %63, %65, %cst_65 {dimension_numbers = #tpu.dot_dimension_numbers<[1], [0], [0], [1], [0, 0, 1, 1], [], []>} : vector<80x32xbf16>, vector<32x32xbf16>, vector<80x32xf32> -> vector<80x32xf32>
    %67 = arith.addf %62, %66 : vector<80x32xf32>
    %c20 = arith.constant 20 : index
    %c0_66 = arith.constant 0 : index
    %68 = vector.load %arg11[%c20, %c0_66] : memref<110x32xbf16, #tpu.memory_space<vmem>>, vector<80x32xbf16>
    %c6 = arith.constant 6 : index
    %c0_67 = arith.constant 0 : index
    %c0_68 = arith.constant 0 : index
    %69 = vector.load %arg5[%c6, %c0_67, %c0_68] : memref<9x32x32xbf16, #tpu.memory_space<vmem>>, vector<1x32x32xbf16>
    %70 = vector.shape_cast %69 : vector<1x32x32xbf16> to vector<32x32xbf16>
    %cst_69 = arith.constant dense<0.000000e+00> : vector<80x32xf32>
    %71 = tpu.matmul %68, %70, %cst_69 {dimension_numbers = #tpu.dot_dimension_numbers<[1], [0], [0], [1], [0, 0, 1, 1], [], []>} : vector<80x32xbf16>, vector<32x32xbf16>, vector<80x32xf32> -> vector<80x32xf32>
    %72 = arith.addf %67, %71 : vector<80x32xf32>
    %c21 = arith.constant 21 : index
    %c0_70 = arith.constant 0 : index
    %73 = vector.load %arg11[%c21, %c0_70] : memref<110x32xbf16, #tpu.memory_space<vmem>>, vector<80x32xbf16>
    %c7 = arith.constant 7 : index
    %c0_71 = arith.constant 0 : index
    %c0_72 = arith.constant 0 : index
    %74 = vector.load %arg5[%c7, %c0_71, %c0_72] : memref<9x32x32xbf16, #tpu.memory_space<vmem>>, vector<1x32x32xbf16>
    %75 = vector.shape_cast %74 : vector<1x32x32xbf16> to vector<32x32xbf16>
    %cst_73 = arith.constant dense<0.000000e+00> : vector<80x32xf32>
    %76 = tpu.matmul %73, %75, %cst_73 {dimension_numbers = #tpu.dot_dimension_numbers<[1], [0], [0], [1], [0, 0, 1, 1], [], []>} : vector<80x32xbf16>, vector<32x32xbf16>, vector<80x32xf32> -> vector<80x32xf32>
    %77 = arith.addf %72, %76 : vector<80x32xf32>
    %c22 = arith.constant 22 : index
    %c0_74 = arith.constant 0 : index
    %78 = vector.load %arg11[%c22, %c0_74] : memref<110x32xbf16, #tpu.memory_space<vmem>>, vector<80x32xbf16>
    %c8 = arith.constant 8 : index
    %c0_75 = arith.constant 0 : index
    %c0_76 = arith.constant 0 : index
    %79 = vector.load %arg5[%c8, %c0_75, %c0_76] : memref<9x32x32xbf16, #tpu.memory_space<vmem>>, vector<1x32x32xbf16>
    %80 = vector.shape_cast %79 : vector<1x32x32xbf16> to vector<32x32xbf16>
    %cst_77 = arith.constant dense<0.000000e+00> : vector<80x32xf32>
    %81 = tpu.matmul %78, %80, %cst_77 {dimension_numbers = #tpu.dot_dimension_numbers<[1], [0], [0], [1], [0, 0, 1, 1], [], []>} : vector<80x32xbf16>, vector<32x32xbf16>, vector<80x32xf32> -> vector<80x32xf32>
    %82 = arith.addf %77, %81 : vector<80x32xf32>
    %c0_78 = arith.constant 0 : index
    %c0_79 = arith.constant 0 : index
    %83 = vector.load %arg6[%c0_78, %c0_79] : memref<1x32xf32, #tpu.memory_space<vmem>>, vector<1x32xf32>
    %84 = vector.broadcast %83 : vector<1x32xf32> to vector<80x32xf32>
    %85 = arith.addf %82, %84 : vector<80x32xf32>
    %cst_80 = arith.constant 0.000000e+00 : f32
    %86 = vector.broadcast %cst_80 : f32 to vector<80x32xf32>
    %87 = arith.maximumf %85, %86 : vector<80x32xf32>
    %88 = arith.addf %32, %87 : vector<80x32xf32>
    %89 = vector.broadcast %0 : vector<80x1xf32> to vector<80x32xf32>
    %90 = arith.mulf %88, %89 : vector<80x32xf32>
    %91 = arith.truncf %90 : vector<80x32xf32> to vector<80x32xbf16>
    %c0_81 = arith.constant 0 : index
    %c0_82 = arith.constant 0 : index
    %92 = vector.load %arg7[%c0_81, %c0_82] : memref<32x7xbf16, #tpu.memory_space<vmem>>, vector<32x7xbf16>
    %cst_83 = arith.constant dense<0.000000e+00> : vector<80x7xf32>
    %93 = tpu.matmul %91, %92, %cst_83 {dimension_numbers = #tpu.dot_dimension_numbers<[1], [0], [0], [1], [0, 0, 1, 1], [], []>} : vector<80x32xbf16>, vector<32x7xbf16>, vector<80x7xf32> -> vector<80x7xf32>
    %c0_84 = arith.constant 0 : index
    %c0_85 = arith.constant 0 : index
    %94 = vector.load %arg8[%c0_84, %c0_85] : memref<1x7xf32, #tpu.memory_space<vmem>>, vector<1x7xf32>
    %95 = vector.broadcast %94 : vector<1x7xf32> to vector<80x7xf32>
    %96 = arith.addf %93, %95 : vector<80x7xf32>
    %cst_86 = arith.constant 0.000000e+00 : bf16
    %97 = vector.broadcast %cst_86 : bf16 to vector<1x90x32xbf16>
    %c0_87 = arith.constant 0 : index
    %c0_88 = arith.constant 0 : index
    %c0_89 = arith.constant 0 : index
    %98 = vector.load %arg9[%c0_87, %c0_88, %c0_89] : memref<1x90x32xbf16, #tpu.memory_space<vmem>>, vector<1x90x32xbf16>
    tpu.vector_store %arg9[%c0_87, %c0_88, %c0_89], %97 {strides = array<i32>} : memref<1x90x32xbf16, #tpu.memory_space<vmem>>, vector<1x90x32xbf16>,
    %c0_90 = arith.constant 0 : index
    %c1_91 = arith.constant 1 : index
    %c0_92 = arith.constant 0 : index
    %99 = vector.load %arg9[%c0_90, %c1_91, %c0_92] : memref<1x90x32xbf16, #tpu.memory_space<vmem>>, vector<1x80x32xbf16>
    %100 = vector.shape_cast %99 : vector<1x80x32xbf16> to vector<80x32xbf16>
    %101 = vector.shape_cast %91 : vector<80x32xbf16> to vector<1x80x32xbf16>
    tpu.vector_store %arg9[%c0_90, %c1_91, %c0_92], %101 {strides = array<i32>} : memref<1x90x32xbf16, #tpu.memory_space<vmem>>, vector<1x80x32xbf16>,
    %c0_93 = arith.constant 0 : index
    %c0_94 = arith.constant 0 : index
    %c0_95 = arith.constant 0 : index
    %102 = vector.load %arg10[%c0_93, %c0_94, %c0_95] : memref<1x80x7xf32, #tpu.memory_space<vmem>>, vector<1x80x7xf32>
    %103 = vector.shape_cast %102 : vector<1x80x7xf32> to vector<80x7xf32>
    %104 = vector.shape_cast %96 : vector<80x7xf32> to vector<1x80x7xf32>
    tpu.vector_store %arg10[%c0_93, %c0_94, %c0_95], %104 {strides = array<i32>} : memref<1x80x7xf32, #tpu.memory_space<vmem>>, vector<1x80x7xf32>,
    return
  }
  func.func @transform_0(%arg0: i32) -> (i32, i32, i32) {
    %c0_i32 = arith.constant 0 : i32
    %c0_i32_0 = arith.constant 0 : i32
    %c0_i32_1 = arith.constant 0 : i32
    return %arg0, %c0_i32, %c0_i32_0 : i32, i32, i32
  }
  func.func @transform_1(%arg0: i32) -> (i32, i32) {
    %c0_i32 = arith.constant 0 : i32
    %c0_i32_0 = arith.constant 0 : i32
    %c0_i32_1 = arith.constant 0 : i32
    return %c0_i32, %c0_i32_0 : i32, i32
  }
  func.func @transform_2(%arg0: i32) -> (i32, i32, i32) {
    %c0_i32 = arith.constant 0 : i32
    %c0_i32_0 = arith.constant 0 : i32
    %c0_i32_1 = arith.constant 0 : i32
    %c0_i32_2 = arith.constant 0 : i32
    return %c0_i32, %c0_i32_0, %c0_i32_1 : i32, i32, i32
  }
  func.func @transform_3(%arg0: i32) -> (i32, i32) {
    %c0_i32 = arith.constant 0 : i32
    %c0_i32_0 = arith.constant 0 : i32
    %c0_i32_1 = arith.constant 0 : i32
    return %c0_i32, %c0_i32_0 : i32, i32
  }
  func.func @transform_4(%arg0: i32) -> (i32, i32, i32) {
    %c0_i32 = arith.constant 0 : i32
    %c0_i32_0 = arith.constant 0 : i32
    %c0_i32_1 = arith.constant 0 : i32
    %c0_i32_2 = arith.constant 0 : i32
    return %c0_i32, %c0_i32_0, %c0_i32_1 : i32, i32, i32
  }
  func.func @transform_5(%arg0: i32) -> (i32, i32) {
    %c0_i32 = arith.constant 0 : i32
    %c0_i32_0 = arith.constant 0 : i32
    %c0_i32_1 = arith.constant 0 : i32
    return %c0_i32, %c0_i32_0 : i32, i32
  }
  func.func @transform_6(%arg0: i32) -> (i32, i32) {
    %c0_i32 = arith.constant 0 : i32
    %c0_i32_0 = arith.constant 0 : i32
    %c0_i32_1 = arith.constant 0 : i32
    return %c0_i32, %c0_i32_0 : i32, i32
  }
  func.func @transform_7(%arg0: i32) -> (i32, i32) {
    %c0_i32 = arith.constant 0 : i32
    %c0_i32_0 = arith.constant 0 : i32
    %c0_i32_1 = arith.constant 0 : i32
    return %c0_i32, %c0_i32_0 : i32, i32
  }
  func.func @transform_8(%arg0: i32) -> (i32, i32, i32) {
    %c0_i32 = arith.constant 0 : i32
    %c0_i32_0 = arith.constant 0 : i32
    %c0_i32_1 = arith.constant 0 : i32
    return %arg0, %c0_i32, %c0_i32_0 : i32, i32, i32
  }
  func.func @transform_9(%arg0: i32) -> (i32, i32, i32) {
    %c0_i32 = arith.constant 0 : i32
    %c0_i32_0 = arith.constant 0 : i32
    %c0_i32_1 = arith.constant 0 : i32
    return %arg0, %c0_i32, %c0_i32_0 : i32, i32, i32
  }
}

module attributes {stable_mosaic.version = 11 : i64} {
  func.func @_recognizer_kernel(%arg0: i32, %arg1: memref<3x3xi32, #tpu.memory_space<smem>>, %arg2: memref<1x90x32xbf16, #tpu.memory_space<vmem>>, %arg3: memref<9x32x32xbf16, #tpu.memory_space<vmem>>, %arg4: memref<1x32xf32, #tpu.memory_space<vmem>>, %arg5: memref<3x32x32xbf16, #tpu.memory_space<vmem>>, %arg6: memref<1x32xf32, #tpu.memory_space<vmem>>, %arg7: memref<3x32x32xbf16, #tpu.memory_space<vmem>>, %arg8: memref<1x32xf32, #tpu.memory_space<vmem>>, %arg9: memref<32x256xbf16, #tpu.memory_space<vmem>>, %arg10: memref<1x256xf32, #tpu.memory_space<vmem>>, %arg11: memref<1x8x256xf32, #tpu.memory_space<vmem>>, %arg12: memref<120x32xbf16, #tpu.memory_space<vmem>>, %arg13: memref<12x32xbf16, #tpu.memory_space<vmem>>) attributes {dimension_semantics = [#tpu.dimension_semantics<arbitrary>], iteration_bounds = array<i64: 3>, scalar_prefetch = 1 : i64, scratch_operands = 2 : i64, tpu.core_type = #tpu.core_type<tc>, window_params = [{transform_indices = @transform_0, window_bounds = array<i64: 1, 90, 32>}, {pipeline_mode = #tpu.pipeline_mode<synchronous>, transform_indices = @transform_1, window_bounds = array<i64: 9, 32, 32>}, {pipeline_mode = #tpu.pipeline_mode<synchronous>, transform_indices = @transform_2, window_bounds = array<i64: 1, 32>}, {pipeline_mode = #tpu.pipeline_mode<synchronous>, transform_indices = @transform_3, window_bounds = array<i64: 3, 32, 32>}, {pipeline_mode = #tpu.pipeline_mode<synchronous>, transform_indices = @transform_4, window_bounds = array<i64: 1, 32>}, {pipeline_mode = #tpu.pipeline_mode<synchronous>, transform_indices = @transform_5, window_bounds = array<i64: 3, 32, 32>}, {pipeline_mode = #tpu.pipeline_mode<synchronous>, transform_indices = @transform_6, window_bounds = array<i64: 1, 32>}, {pipeline_mode = #tpu.pipeline_mode<synchronous>, transform_indices = @transform_7, window_bounds = array<i64: 32, 256>}, {pipeline_mode = #tpu.pipeline_mode<synchronous>, transform_indices = @transform_8, window_bounds = array<i64: 1, 256>}, {transform_indices = @transform_9, window_bounds = array<i64: 1, 8, 256>}]} {
    %0 = arith.index_cast %arg0 : i32 to index
    %c1 = arith.constant 1 : index
    %1 = memref.load %arg1[%0, %c1] : memref<3x3xi32, #tpu.memory_space<smem>>
    %c0_i32 = arith.constant 0 : i32
    %c0_i32_0 = arith.constant 0 : i32
    %2 = arith.maxsi %c0_i32, %1 : i32
    %3 = arith.minsi %c0_i32_0, %2 : i32
    %c0 = arith.constant 0 : index
    %c0_1 = arith.constant 0 : index
    %c0_2 = arith.constant 0 : index
    %4 = vector.load %arg2[%c0, %c0_1, %c0_2] : memref<1x90x32xbf16, #tpu.memory_space<vmem>>, vector<1x90x32xbf16>
    %5 = vector.shape_cast %4 : vector<1x90x32xbf16> to vector<90x32xbf16>
    %6 = tpu.iota {dimensions = array<i32: 0>} : vector<90x1xi32>
    %c10_i32 = arith.constant 10 : i32
    %7 = arith.muli %3, %c10_i32 : i32
    %8 = vector.broadcast %7 : i32 to vector<90x1xi32>
    %9 = arith.cmpi sge, %6, %8 : vector<90x1xi32>
    %c8_i32 = arith.constant 8 : i32
    %10 = arith.addi %3, %c8_i32 : i32
    %c10_i32_3 = arith.constant 10 : i32
    %11 = arith.muli %10, %c10_i32_3 : i32
    %12 = vector.broadcast %11 : i32 to vector<90x1xi32>
    %13 = arith.cmpi slt, %6, %12 : vector<90x1xi32>
    %14 = arith.andi %9, %13 : vector<90x1xi1>
    %cst = arith.constant 0.000000e+00 : bf16
    %15 = vector.broadcast %cst : bf16 to vector<90x32xbf16>
    %16 = vector.shape_cast %14 : vector<90x1xi1> to vector<90x1xi1>
    %17 = vector.broadcast %16 : vector<90x1xi1> to vector<90x32xi1>
    %18 = arith.select %17, %5, %15 : vector<90x32xi1>, vector<90x32xbf16>
    %cst_4 = arith.constant 0.000000e+00 : bf16
    %19 = vector.broadcast %cst_4 : bf16 to vector<120x32xbf16>
    %c0_5 = arith.constant 0 : index
    %c0_6 = arith.constant 0 : index
    %20 = vector.load %arg12[%c0_5, %c0_6] : memref<120x32xbf16, #tpu.memory_space<vmem>>, vector<120x32xbf16>
    tpu.vector_store %arg12[%c0_5, %c0_6], %19 {strides = array<i32>} : memref<120x32xbf16, #tpu.memory_space<vmem>>, vector<120x32xbf16>,
    %c10 = arith.constant 10 : index
    %c0_7 = arith.constant 0 : index
    %21 = vector.load %arg12[%c10, %c0_7] : memref<120x32xbf16, #tpu.memory_space<vmem>>, vector<90x32xbf16>
    tpu.vector_store %arg12[%c10, %c0_7], %18 {strides = array<i32>} : memref<120x32xbf16, #tpu.memory_space<vmem>>, vector<90x32xbf16>,
    %cst_8 = arith.constant 0.000000e+00 : f32
    %22 = vector.broadcast %cst_8 : f32 to vector<80x32xf32>
    %c0_9 = arith.constant 0 : index
    %c0_10 = arith.constant 0 : index
    %23 = vector.load %arg12[%c0_9, %c0_10] : memref<120x32xbf16, #tpu.memory_space<vmem>>, vector<80x32xbf16>
    %c0_11 = arith.constant 0 : index
    %c0_12 = arith.constant 0 : index
    %c0_13 = arith.constant 0 : index
    %24 = vector.load %arg3[%c0_11, %c0_12, %c0_13] : memref<9x32x32xbf16, #tpu.memory_space<vmem>>, vector<1x32x32xbf16>
    %25 = vector.shape_cast %24 : vector<1x32x32xbf16> to vector<32x32xbf16>
    %cst_14 = arith.constant dense<0.000000e+00> : vector<80x32xf32>
    %26 = tpu.matmul %23, %25, %cst_14 {dimension_numbers = #tpu.dot_dimension_numbers<[1], [0], [0], [1], [0, 0, 1, 1], [], []>} : vector<80x32xbf16>, vector<32x32xbf16>, vector<80x32xf32> -> vector<80x32xf32>
    %27 = arith.addf %22, %26 : vector<80x32xf32>
    %c1_15 = arith.constant 1 : index
    %c0_16 = arith.constant 0 : index
    %28 = vector.load %arg12[%c1_15, %c0_16] : memref<120x32xbf16, #tpu.memory_space<vmem>>, vector<80x32xbf16>
    %c1_17 = arith.constant 1 : index
    %c0_18 = arith.constant 0 : index
    %c0_19 = arith.constant 0 : index
    %29 = vector.load %arg3[%c1_17, %c0_18, %c0_19] : memref<9x32x32xbf16, #tpu.memory_space<vmem>>, vector<1x32x32xbf16>
    %30 = vector.shape_cast %29 : vector<1x32x32xbf16> to vector<32x32xbf16>
    %cst_20 = arith.constant dense<0.000000e+00> : vector<80x32xf32>
    %31 = tpu.matmul %28, %30, %cst_20 {dimension_numbers = #tpu.dot_dimension_numbers<[1], [0], [0], [1], [0, 0, 1, 1], [], []>} : vector<80x32xbf16>, vector<32x32xbf16>, vector<80x32xf32> -> vector<80x32xf32>
    %32 = arith.addf %27, %31 : vector<80x32xf32>
    %c2 = arith.constant 2 : index
    %c0_21 = arith.constant 0 : index
    %33 = vector.load %arg12[%c2, %c0_21] : memref<120x32xbf16, #tpu.memory_space<vmem>>, vector<80x32xbf16>
    %c2_22 = arith.constant 2 : index
    %c0_23 = arith.constant 0 : index
    %c0_24 = arith.constant 0 : index
    %34 = vector.load %arg3[%c2_22, %c0_23, %c0_24] : memref<9x32x32xbf16, #tpu.memory_space<vmem>>, vector<1x32x32xbf16>
    %35 = vector.shape_cast %34 : vector<1x32x32xbf16> to vector<32x32xbf16>
    %cst_25 = arith.constant dense<0.000000e+00> : vector<80x32xf32>
    %36 = tpu.matmul %33, %35, %cst_25 {dimension_numbers = #tpu.dot_dimension_numbers<[1], [0], [0], [1], [0, 0, 1, 1], [], []>} : vector<80x32xbf16>, vector<32x32xbf16>, vector<80x32xf32> -> vector<80x32xf32>
    %37 = arith.addf %32, %36 : vector<80x32xf32>
    %c10_26 = arith.constant 10 : index
    %c0_27 = arith.constant 0 : index
    %38 = vector.load %arg12[%c10_26, %c0_27] : memref<120x32xbf16, #tpu.memory_space<vmem>>, vector<80x32xbf16>
    %c3 = arith.constant 3 : index
    %c0_28 = arith.constant 0 : index
    %c0_29 = arith.constant 0 : index
    %39 = vector.load %arg3[%c3, %c0_28, %c0_29] : memref<9x32x32xbf16, #tpu.memory_space<vmem>>, vector<1x32x32xbf16>
    %40 = vector.shape_cast %39 : vector<1x32x32xbf16> to vector<32x32xbf16>
    %cst_30 = arith.constant dense<0.000000e+00> : vector<80x32xf32>
    %41 = tpu.matmul %38, %40, %cst_30 {dimension_numbers = #tpu.dot_dimension_numbers<[1], [0], [0], [1], [0, 0, 1, 1], [], []>} : vector<80x32xbf16>, vector<32x32xbf16>, vector<80x32xf32> -> vector<80x32xf32>
    %42 = arith.addf %37, %41 : vector<80x32xf32>
    %c11 = arith.constant 11 : index
    %c0_31 = arith.constant 0 : index
    %43 = vector.load %arg12[%c11, %c0_31] : memref<120x32xbf16, #tpu.memory_space<vmem>>, vector<80x32xbf16>
    %c4 = arith.constant 4 : index
    %c0_32 = arith.constant 0 : index
    %c0_33 = arith.constant 0 : index
    %44 = vector.load %arg3[%c4, %c0_32, %c0_33] : memref<9x32x32xbf16, #tpu.memory_space<vmem>>, vector<1x32x32xbf16>
    %45 = vector.shape_cast %44 : vector<1x32x32xbf16> to vector<32x32xbf16>
    %cst_34 = arith.constant dense<0.000000e+00> : vector<80x32xf32>
    %46 = tpu.matmul %43, %45, %cst_34 {dimension_numbers = #tpu.dot_dimension_numbers<[1], [0], [0], [1], [0, 0, 1, 1], [], []>} : vector<80x32xbf16>, vector<32x32xbf16>, vector<80x32xf32> -> vector<80x32xf32>
    %47 = arith.addf %42, %46 : vector<80x32xf32>
    %c12 = arith.constant 12 : index
    %c0_35 = arith.constant 0 : index
    %48 = vector.load %arg12[%c12, %c0_35] : memref<120x32xbf16, #tpu.memory_space<vmem>>, vector<80x32xbf16>
    %c5 = arith.constant 5 : index
    %c0_36 = arith.constant 0 : index
    %c0_37 = arith.constant 0 : index
    %49 = vector.load %arg3[%c5, %c0_36, %c0_37] : memref<9x32x32xbf16, #tpu.memory_space<vmem>>, vector<1x32x32xbf16>
    %50 = vector.shape_cast %49 : vector<1x32x32xbf16> to vector<32x32xbf16>
    %cst_38 = arith.constant dense<0.000000e+00> : vector<80x32xf32>
    %51 = tpu.matmul %48, %50, %cst_38 {dimension_numbers = #tpu.dot_dimension_numbers<[1], [0], [0], [1], [0, 0, 1, 1], [], []>} : vector<80x32xbf16>, vector<32x32xbf16>, vector<80x32xf32> -> vector<80x32xf32>
    %52 = arith.addf %47, %51 : vector<80x32xf32>
    %c20 = arith.constant 20 : index
    %c0_39 = arith.constant 0 : index
    %53 = vector.load %arg12[%c20, %c0_39] : memref<120x32xbf16, #tpu.memory_space<vmem>>, vector<80x32xbf16>
    %c6 = arith.constant 6 : index
    %c0_40 = arith.constant 0 : index
    %c0_41 = arith.constant 0 : index
    %54 = vector.load %arg3[%c6, %c0_40, %c0_41] : memref<9x32x32xbf16, #tpu.memory_space<vmem>>, vector<1x32x32xbf16>
    %55 = vector.shape_cast %54 : vector<1x32x32xbf16> to vector<32x32xbf16>
    %cst_42 = arith.constant dense<0.000000e+00> : vector<80x32xf32>
    %56 = tpu.matmul %53, %55, %cst_42 {dimension_numbers = #tpu.dot_dimension_numbers<[1], [0], [0], [1], [0, 0, 1, 1], [], []>} : vector<80x32xbf16>, vector<32x32xbf16>, vector<80x32xf32> -> vector<80x32xf32>
    %57 = arith.addf %52, %56 : vector<80x32xf32>
    %c21 = arith.constant 21 : index
    %c0_43 = arith.constant 0 : index
    %58 = vector.load %arg12[%c21, %c0_43] : memref<120x32xbf16, #tpu.memory_space<vmem>>, vector<80x32xbf16>
    %c7 = arith.constant 7 : index
    %c0_44 = arith.constant 0 : index
    %c0_45 = arith.constant 0 : index
    %59 = vector.load %arg3[%c7, %c0_44, %c0_45] : memref<9x32x32xbf16, #tpu.memory_space<vmem>>, vector<1x32x32xbf16>
    %60 = vector.shape_cast %59 : vector<1x32x32xbf16> to vector<32x32xbf16>
    %cst_46 = arith.constant dense<0.000000e+00> : vector<80x32xf32>
    %61 = tpu.matmul %58, %60, %cst_46 {dimension_numbers = #tpu.dot_dimension_numbers<[1], [0], [0], [1], [0, 0, 1, 1], [], []>} : vector<80x32xbf16>, vector<32x32xbf16>, vector<80x32xf32> -> vector<80x32xf32>
    %62 = arith.addf %57, %61 : vector<80x32xf32>
    %c22 = arith.constant 22 : index
    %c0_47 = arith.constant 0 : index
    %63 = vector.load %arg12[%c22, %c0_47] : memref<120x32xbf16, #tpu.memory_space<vmem>>, vector<80x32xbf16>
    %c8 = arith.constant 8 : index
    %c0_48 = arith.constant 0 : index
    %c0_49 = arith.constant 0 : index
    %64 = vector.load %arg3[%c8, %c0_48, %c0_49] : memref<9x32x32xbf16, #tpu.memory_space<vmem>>, vector<1x32x32xbf16>
    %65 = vector.shape_cast %64 : vector<1x32x32xbf16> to vector<32x32xbf16>
    %cst_50 = arith.constant dense<0.000000e+00> : vector<80x32xf32>
    %66 = tpu.matmul %63, %65, %cst_50 {dimension_numbers = #tpu.dot_dimension_numbers<[1], [0], [0], [1], [0, 0, 1, 1], [], []>} : vector<80x32xbf16>, vector<32x32xbf16>, vector<80x32xf32> -> vector<80x32xf32>
    %67 = arith.addf %62, %66 : vector<80x32xf32>
    %c0_51 = arith.constant 0 : index
    %c0_52 = arith.constant 0 : index
    %68 = vector.load %arg4[%c0_51, %c0_52] : memref<1x32xf32, #tpu.memory_space<vmem>>, vector<1x32xf32>
    %69 = vector.broadcast %68 : vector<1x32xf32> to vector<80x32xf32>
    %70 = arith.addf %67, %69 : vector<80x32xf32>
    %cst_53 = arith.constant 0.000000e+00 : f32
    %71 = vector.broadcast %cst_53 : f32 to vector<80x32xf32>
    %72 = arith.maximumf %70, %71 : vector<80x32xf32>
    %cst_54 = arith.constant 0.000000e+00 : f32
    %73 = vector.broadcast %cst_54 : f32 to vector<8x32xf32>
    %c0_i32_55 = arith.constant 0 : i32
    %74 = arith.cmpi sle, %3, %c0_i32_55 : i32
    %c8_i32_56 = arith.constant 8 : i32
    %75 = arith.addi %3, %c8_i32_56 : i32
    %c0_i32_57 = arith.constant 0 : i32
    %76 = arith.cmpi sgt, %75, %c0_i32_57 : i32
    %77 = arith.andi %74, %76 : i1
    %78 = arith.extui %77 : i1 to i32
    %79 = arith.sitofp %78 : i32 to f32
    %80 = vector.extract_strided_slice %72 {offsets = [0, 0], sizes = [8, 32], strides = [1, 1]} : vector<80x32xf32> to vector<8x32xf32>
    %81 = vector.broadcast %79 : f32 to vector<8x32xf32>
    %82 = arith.mulf %81, %80 : vector<8x32xf32>
    %83 = arith.addf %73, %82 : vector<8x32xf32>
    %c1_i32 = arith.constant 1 : i32
    %84 = arith.cmpi sle, %3, %c1_i32 : i32
    %c8_i32_58 = arith.constant 8 : i32
    %85 = arith.addi %3, %c8_i32_58 : i32
    %c1_i32_59 = arith.constant 1 : i32
    %86 = arith.cmpi sgt, %85, %c1_i32_59 : i32
    %87 = arith.andi %84, %86 : i1
    %88 = arith.extui %87 : i1 to i32
    %89 = arith.sitofp %88 : i32 to f32
    %90 = vector.extract_strided_slice %72 {offsets = [10, 0], sizes = [8, 32], strides = [1, 1]} : vector<80x32xf32> to vector<8x32xf32>
    %91 = vector.broadcast %89 : f32 to vector<8x32xf32>
    %92 = arith.mulf %91, %90 : vector<8x32xf32>
    %93 = arith.addf %83, %92 : vector<8x32xf32>
    %c2_i32 = arith.constant 2 : i32
    %94 = arith.cmpi sle, %3, %c2_i32 : i32
    %c8_i32_60 = arith.constant 8 : i32
    %95 = arith.addi %3, %c8_i32_60 : i32
    %c2_i32_61 = arith.constant 2 : i32
    %96 = arith.cmpi sgt, %95, %c2_i32_61 : i32
    %97 = arith.andi %94, %96 : i1
    %98 = arith.extui %97 : i1 to i32
    %99 = arith.sitofp %98 : i32 to f32
    %100 = vector.extract_strided_slice %72 {offsets = [20, 0], sizes = [8, 32], strides = [1, 1]} : vector<80x32xf32> to vector<8x32xf32>
    %101 = vector.broadcast %99 : f32 to vector<8x32xf32>
    %102 = arith.mulf %101, %100 : vector<8x32xf32>
    %103 = arith.addf %93, %102 : vector<8x32xf32>
    %c3_i32 = arith.constant 3 : i32
    %104 = arith.cmpi sle, %3, %c3_i32 : i32
    %c8_i32_62 = arith.constant 8 : i32
    %105 = arith.addi %3, %c8_i32_62 : i32
    %c3_i32_63 = arith.constant 3 : i32
    %106 = arith.cmpi sgt, %105, %c3_i32_63 : i32
    %107 = arith.andi %104, %106 : i1
    %108 = arith.extui %107 : i1 to i32
    %109 = arith.sitofp %108 : i32 to f32
    %110 = vector.extract_strided_slice %72 {offsets = [30, 0], sizes = [8, 32], strides = [1, 1]} : vector<80x32xf32> to vector<8x32xf32>
    %111 = vector.broadcast %109 : f32 to vector<8x32xf32>
    %112 = arith.mulf %111, %110 : vector<8x32xf32>
    %113 = arith.addf %103, %112 : vector<8x32xf32>
    %c4_i32 = arith.constant 4 : i32
    %114 = arith.cmpi sle, %3, %c4_i32 : i32
    %c8_i32_64 = arith.constant 8 : i32
    %115 = arith.addi %3, %c8_i32_64 : i32
    %c4_i32_65 = arith.constant 4 : i32
    %116 = arith.cmpi sgt, %115, %c4_i32_65 : i32
    %117 = arith.andi %114, %116 : i1
    %118 = arith.extui %117 : i1 to i32
    %119 = arith.sitofp %118 : i32 to f32
    %120 = vector.extract_strided_slice %72 {offsets = [40, 0], sizes = [8, 32], strides = [1, 1]} : vector<80x32xf32> to vector<8x32xf32>
    %121 = vector.broadcast %119 : f32 to vector<8x32xf32>
    %122 = arith.mulf %121, %120 : vector<8x32xf32>
    %123 = arith.addf %113, %122 : vector<8x32xf32>
    %c5_i32 = arith.constant 5 : i32
    %124 = arith.cmpi sle, %3, %c5_i32 : i32
    %c8_i32_66 = arith.constant 8 : i32
    %125 = arith.addi %3, %c8_i32_66 : i32
    %c5_i32_67 = arith.constant 5 : i32
    %126 = arith.cmpi sgt, %125, %c5_i32_67 : i32
    %127 = arith.andi %124, %126 : i1
    %128 = arith.extui %127 : i1 to i32
    %129 = arith.sitofp %128 : i32 to f32
    %130 = vector.extract_strided_slice %72 {offsets = [50, 0], sizes = [8, 32], strides = [1, 1]} : vector<80x32xf32> to vector<8x32xf32>
    %131 = vector.broadcast %129 : f32 to vector<8x32xf32>
    %132 = arith.mulf %131, %130 : vector<8x32xf32>
    %133 = arith.addf %123, %132 : vector<8x32xf32>
    %c6_i32 = arith.constant 6 : i32
    %134 = arith.cmpi sle, %3, %c6_i32 : i32
    %c8_i32_68 = arith.constant 8 : i32
    %135 = arith.addi %3, %c8_i32_68 : i32
    %c6_i32_69 = arith.constant 6 : i32
    %136 = arith.cmpi sgt, %135, %c6_i32_69 : i32
    %137 = arith.andi %134, %136 : i1
    %138 = arith.extui %137 : i1 to i32
    %139 = arith.sitofp %138 : i32 to f32
    %140 = vector.extract_strided_slice %72 {offsets = [60, 0], sizes = [8, 32], strides = [1, 1]} : vector<80x32xf32> to vector<8x32xf32>
    %141 = vector.broadcast %139 : f32 to vector<8x32xf32>
    %142 = arith.mulf %141, %140 : vector<8x32xf32>
    %143 = arith.addf %133, %142 : vector<8x32xf32>
    %c7_i32 = arith.constant 7 : i32
    %144 = arith.cmpi sle, %3, %c7_i32 : i32
    %c8_i32_70 = arith.constant 8 : i32
    %145 = arith.addi %3, %c8_i32_70 : i32
    %c7_i32_71 = arith.constant 7 : i32
    %146 = arith.cmpi sgt, %145, %c7_i32_71 : i32
    %147 = arith.andi %144, %146 : i1
    %148 = arith.extui %147 : i1 to i32
    %149 = arith.sitofp %148 : i32 to f32
    %150 = vector.extract_strided_slice %72 {offsets = [70, 0], sizes = [8, 32], strides = [1, 1]} : vector<80x32xf32> to vector<8x32xf32>
    %151 = vector.broadcast %149 : f32 to vector<8x32xf32>
    %152 = arith.mulf %151, %150 : vector<8x32xf32>
    %153 = arith.addf %143, %152 : vector<8x32xf32>
    %cst_72 = arith.constant 1.250000e-01 : f32
    %154 = vector.broadcast %cst_72 : f32 to vector<8x32xf32>
    %155 = arith.mulf %153, %154 : vector<8x32xf32>
    %cst_73 = arith.constant 0.000000e+00 : bf16
    %156 = vector.broadcast %cst_73 : bf16 to vector<12x32xbf16>
    %c0_74 = arith.constant 0 : index
    %c0_75 = arith.constant 0 : index
    %157 = vector.load %arg13[%c0_74, %c0_75] : memref<12x32xbf16, #tpu.memory_space<vmem>>, vector<12x32xbf16>
    tpu.vector_store %arg13[%c0_74, %c0_75], %156 {strides = array<i32>} : memref<12x32xbf16, #tpu.memory_space<vmem>>, vector<12x32xbf16>,
    %158 = arith.truncf %155 : vector<8x32xf32> to vector<8x32xbf16>
    %c4_76 = arith.constant 4 : index
    %c0_77 = arith.constant 0 : index
    %159 = vector.load %arg13[%c4_76, %c0_77] : memref<12x32xbf16, #tpu.memory_space<vmem>>, vector<8x32xbf16>
    tpu.vector_store %arg13[%c4_76, %c0_77], %158 {strides = array<i32>} : memref<12x32xbf16, #tpu.memory_space<vmem>>, vector<8x32xbf16>,
    %cst_78 = arith.constant 0.000000e+00 : f32
    %160 = vector.broadcast %cst_78 : f32 to vector<8x32xf32>
    %c2_79 = arith.constant 2 : index
    %c0_80 = arith.constant 0 : index
    %161 = vector.load %arg13[%c2_79, %c0_80] : memref<12x32xbf16, #tpu.memory_space<vmem>>, vector<8x32xbf16>
    %c0_81 = arith.constant 0 : index
    %c0_82 = arith.constant 0 : index
    %c0_83 = arith.constant 0 : index
    %162 = vector.load %arg5[%c0_81, %c0_82, %c0_83] : memref<3x32x32xbf16, #tpu.memory_space<vmem>>, vector<1x32x32xbf16>
    %163 = vector.shape_cast %162 : vector<1x32x32xbf16> to vector<32x32xbf16>
    %cst_84 = arith.constant dense<0.000000e+00> : vector<8x32xf32>
    %164 = tpu.matmul %161, %163, %cst_84 {dimension_numbers = #tpu.dot_dimension_numbers<[1], [0], [0], [1], [0, 0, 1, 1], [], []>} : vector<8x32xbf16>, vector<32x32xbf16>, vector<8x32xf32> -> vector<8x32xf32>
    %165 = arith.addf %160, %164 : vector<8x32xf32>
    %c3_85 = arith.constant 3 : index
    %c0_86 = arith.constant 0 : index
    %166 = vector.load %arg13[%c3_85, %c0_86] : memref<12x32xbf16, #tpu.memory_space<vmem>>, vector<8x32xbf16>
    %c1_87 = arith.constant 1 : index
    %c0_88 = arith.constant 0 : index
    %c0_89 = arith.constant 0 : index
    %167 = vector.load %arg5[%c1_87, %c0_88, %c0_89] : memref<3x32x32xbf16, #tpu.memory_space<vmem>>, vector<1x32x32xbf16>
    %168 = vector.shape_cast %167 : vector<1x32x32xbf16> to vector<32x32xbf16>
    %cst_90 = arith.constant dense<0.000000e+00> : vector<8x32xf32>
    %169 = tpu.matmul %166, %168, %cst_90 {dimension_numbers = #tpu.dot_dimension_numbers<[1], [0], [0], [1], [0, 0, 1, 1], [], []>} : vector<8x32xbf16>, vector<32x32xbf16>, vector<8x32xf32> -> vector<8x32xf32>
    %170 = arith.addf %165, %169 : vector<8x32xf32>
    %c4_91 = arith.constant 4 : index
    %c0_92 = arith.constant 0 : index
    %171 = vector.load %arg13[%c4_91, %c0_92] : memref<12x32xbf16, #tpu.memory_space<vmem>>, vector<8x32xbf16>
    %c2_93 = arith.constant 2 : index
    %c0_94 = arith.constant 0 : index
    %c0_95 = arith.constant 0 : index
    %172 = vector.load %arg5[%c2_93, %c0_94, %c0_95] : memref<3x32x32xbf16, #tpu.memory_space<vmem>>, vector<1x32x32xbf16>
    %173 = vector.shape_cast %172 : vector<1x32x32xbf16> to vector<32x32xbf16>
    %cst_96 = arith.constant dense<0.000000e+00> : vector<8x32xf32>
    %174 = tpu.matmul %171, %173, %cst_96 {dimension_numbers = #tpu.dot_dimension_numbers<[1], [0], [0], [1], [0, 0, 1, 1], [], []>} : vector<8x32xbf16>, vector<32x32xbf16>, vector<8x32xf32> -> vector<8x32xf32>
    %175 = arith.addf %170, %174 : vector<8x32xf32>
    %c0_97 = arith.constant 0 : index
    %c0_98 = arith.constant 0 : index
    %176 = vector.load %arg6[%c0_97, %c0_98] : memref<1x32xf32, #tpu.memory_space<vmem>>, vector<1x32xf32>
    %177 = vector.broadcast %176 : vector<1x32xf32> to vector<8x32xf32>
    %178 = arith.addf %175, %177 : vector<8x32xf32>
    %cst_99 = arith.constant 0.000000e+00 : f32
    %179 = vector.broadcast %cst_99 : f32 to vector<8x32xf32>
    %180 = arith.maximumf %178, %179 : vector<8x32xf32>
    %181 = arith.addf %180, %155 : vector<8x32xf32>
    %182 = arith.truncf %181 : vector<8x32xf32> to vector<8x32xbf16>
    %c4_100 = arith.constant 4 : index
    %c0_101 = arith.constant 0 : index
    %183 = vector.load %arg13[%c4_100, %c0_101] : memref<12x32xbf16, #tpu.memory_space<vmem>>, vector<8x32xbf16>
    tpu.vector_store %arg13[%c4_100, %c0_101], %182 {strides = array<i32>} : memref<12x32xbf16, #tpu.memory_space<vmem>>, vector<8x32xbf16>,
    %cst_102 = arith.constant 0.000000e+00 : f32
    %184 = vector.broadcast %cst_102 : f32 to vector<8x32xf32>
    %c0_103 = arith.constant 0 : index
    %c0_104 = arith.constant 0 : index
    %185 = vector.load %arg13[%c0_103, %c0_104] : memref<12x32xbf16, #tpu.memory_space<vmem>>, vector<8x32xbf16>
    %c0_105 = arith.constant 0 : index
    %c0_106 = arith.constant 0 : index
    %c0_107 = arith.constant 0 : index
    %186 = vector.load %arg7[%c0_105, %c0_106, %c0_107] : memref<3x32x32xbf16, #tpu.memory_space<vmem>>, vector<1x32x32xbf16>
    %187 = vector.shape_cast %186 : vector<1x32x32xbf16> to vector<32x32xbf16>
    %cst_108 = arith.constant dense<0.000000e+00> : vector<8x32xf32>
    %188 = tpu.matmul %185, %187, %cst_108 {dimension_numbers = #tpu.dot_dimension_numbers<[1], [0], [0], [1], [0, 0, 1, 1], [], []>} : vector<8x32xbf16>, vector<32x32xbf16>, vector<8x32xf32> -> vector<8x32xf32>
    %189 = arith.addf %184, %188 : vector<8x32xf32>
    %c2_109 = arith.constant 2 : index
    %c0_110 = arith.constant 0 : index
    %190 = vector.load %arg13[%c2_109, %c0_110] : memref<12x32xbf16, #tpu.memory_space<vmem>>, vector<8x32xbf16>
    %c1_111 = arith.constant 1 : index
    %c0_112 = arith.constant 0 : index
    %c0_113 = arith.constant 0 : index
    %191 = vector.load %arg7[%c1_111, %c0_112, %c0_113] : memref<3x32x32xbf16, #tpu.memory_space<vmem>>, vector<1x32x32xbf16>
    %192 = vector.shape_cast %191 : vector<1x32x32xbf16> to vector<32x32xbf16>
    %cst_114 = arith.constant dense<0.000000e+00> : vector<8x32xf32>
    %193 = tpu.matmul %190, %192, %cst_114 {dimension_numbers = #tpu.dot_dimension_numbers<[1], [0], [0], [1], [0, 0, 1, 1], [], []>} : vector<8x32xbf16>, vector<32x32xbf16>, vector<8x32xf32> -> vector<8x32xf32>
    %194 = arith.addf %189, %193 : vector<8x32xf32>
    %c4_115 = arith.constant 4 : index
    %c0_116 = arith.constant 0 : index
    %195 = vector.load %arg13[%c4_115, %c0_116] : memref<12x32xbf16, #tpu.memory_space<vmem>>, vector<8x32xbf16>
    %c2_117 = arith.constant 2 : index
    %c0_118 = arith.constant 0 : index
    %c0_119 = arith.constant 0 : index
    %196 = vector.load %arg7[%c2_117, %c0_118, %c0_119] : memref<3x32x32xbf16, #tpu.memory_space<vmem>>, vector<1x32x32xbf16>
    %197 = vector.shape_cast %196 : vector<1x32x32xbf16> to vector<32x32xbf16>
    %cst_120 = arith.constant dense<0.000000e+00> : vector<8x32xf32>
    %198 = tpu.matmul %195, %197, %cst_120 {dimension_numbers = #tpu.dot_dimension_numbers<[1], [0], [0], [1], [0, 0, 1, 1], [], []>} : vector<8x32xbf16>, vector<32x32xbf16>, vector<8x32xf32> -> vector<8x32xf32>
    %199 = arith.addf %194, %198 : vector<8x32xf32>
    %c0_121 = arith.constant 0 : index
    %c0_122 = arith.constant 0 : index
    %200 = vector.load %arg8[%c0_121, %c0_122] : memref<1x32xf32, #tpu.memory_space<vmem>>, vector<1x32xf32>
    %201 = vector.broadcast %200 : vector<1x32xf32> to vector<8x32xf32>
    %202 = arith.addf %199, %201 : vector<8x32xf32>
    %cst_123 = arith.constant 0.000000e+00 : f32
    %203 = vector.broadcast %cst_123 : f32 to vector<8x32xf32>
    %204 = arith.maximumf %202, %203 : vector<8x32xf32>
    %205 = arith.addf %204, %181 : vector<8x32xf32>
    %206 = arith.truncf %205 : vector<8x32xf32> to vector<8x32xbf16>
    %c0_124 = arith.constant 0 : index
    %c0_125 = arith.constant 0 : index
    %207 = vector.load %arg9[%c0_124, %c0_125] : memref<32x256xbf16, #tpu.memory_space<vmem>>, vector<32x256xbf16>
    %cst_126 = arith.constant dense<0.000000e+00> : vector<8x256xf32>
    %208 = tpu.matmul %206, %207, %cst_126 {dimension_numbers = #tpu.dot_dimension_numbers<[1], [0], [0], [1], [0, 0, 1, 1], [], []>} : vector<8x32xbf16>, vector<32x256xbf16>, vector<8x256xf32> -> vector<8x256xf32>
    %c0_127 = arith.constant 0 : index
    %c0_128 = arith.constant 0 : index
    %209 = vector.load %arg10[%c0_127, %c0_128] : memref<1x256xf32, #tpu.memory_space<vmem>>, vector<1x256xf32>
    %210 = vector.broadcast %209 : vector<1x256xf32> to vector<8x256xf32>
    %211 = arith.addf %208, %210 : vector<8x256xf32>
    %c0_129 = arith.constant 0 : index
    %c0_130 = arith.constant 0 : index
    %c0_131 = arith.constant 0 : index
    %212 = vector.load %arg11[%c0_129, %c0_130, %c0_131] : memref<1x8x256xf32, #tpu.memory_space<vmem>>, vector<1x8x256xf32>
    %213 = vector.shape_cast %212 : vector<1x8x256xf32> to vector<8x256xf32>
    %214 = vector.shape_cast %211 : vector<8x256xf32> to vector<1x8x256xf32>
    tpu.vector_store %arg11[%c0_129, %c0_130, %c0_131], %214 {strides = array<i32>} : memref<1x8x256xf32, #tpu.memory_space<vmem>>, vector<1x8x256xf32>,
    return
  }
  func.func @transform_0(%arg0: i32, %arg1: memref<3x3xi32, #tpu.memory_space<smem>>) -> (i32, i32, i32) {
    %0 = arith.index_cast %arg0 : i32 to index
    %c0 = arith.constant 0 : index
    %1 = memref.load %arg1[%0, %c0] : memref<3x3xi32, #tpu.memory_space<smem>>
    %c0_i32 = arith.constant 0 : i32
    %c1_i32 = arith.constant 1 : i32
    %2 = arith.maxsi %c0_i32, %1 : i32
    %3 = arith.minsi %c1_i32, %2 : i32
    %c0_i32_0 = arith.constant 0 : i32
    %c0_i32_1 = arith.constant 0 : i32
    %c0_i32_2 = arith.constant 0 : i32
    return %3, %c0_i32_0, %c0_i32_1 : i32, i32, i32
  }
  func.func @transform_1(%arg0: i32, %arg1: memref<3x3xi32, #tpu.memory_space<smem>>) -> (i32, i32, i32) {
    %c0_i32 = arith.constant 0 : i32
    %c0_i32_0 = arith.constant 0 : i32
    %c0_i32_1 = arith.constant 0 : i32
    %c0_i32_2 = arith.constant 0 : i32
    return %c0_i32, %c0_i32_0, %c0_i32_1 : i32, i32, i32
  }
  func.func @transform_2(%arg0: i32, %arg1: memref<3x3xi32, #tpu.memory_space<smem>>) -> (i32, i32) {
    %c0_i32 = arith.constant 0 : i32
    %c0_i32_0 = arith.constant 0 : i32
    %c0_i32_1 = arith.constant 0 : i32
    return %c0_i32, %c0_i32_0 : i32, i32
  }
  func.func @transform_3(%arg0: i32, %arg1: memref<3x3xi32, #tpu.memory_space<smem>>) -> (i32, i32, i32) {
    %c0_i32 = arith.constant 0 : i32
    %c0_i32_0 = arith.constant 0 : i32
    %c0_i32_1 = arith.constant 0 : i32
    %c0_i32_2 = arith.constant 0 : i32
    return %c0_i32, %c0_i32_0, %c0_i32_1 : i32, i32, i32
  }
  func.func @transform_4(%arg0: i32, %arg1: memref<3x3xi32, #tpu.memory_space<smem>>) -> (i32, i32) {
    %c0_i32 = arith.constant 0 : i32
    %c0_i32_0 = arith.constant 0 : i32
    %c0_i32_1 = arith.constant 0 : i32
    return %c0_i32, %c0_i32_0 : i32, i32
  }
  func.func @transform_5(%arg0: i32, %arg1: memref<3x3xi32, #tpu.memory_space<smem>>) -> (i32, i32, i32) {
    %c0_i32 = arith.constant 0 : i32
    %c0_i32_0 = arith.constant 0 : i32
    %c0_i32_1 = arith.constant 0 : i32
    %c0_i32_2 = arith.constant 0 : i32
    return %c0_i32, %c0_i32_0, %c0_i32_1 : i32, i32, i32
  }
  func.func @transform_6(%arg0: i32, %arg1: memref<3x3xi32, #tpu.memory_space<smem>>) -> (i32, i32) {
    %c0_i32 = arith.constant 0 : i32
    %c0_i32_0 = arith.constant 0 : i32
    %c0_i32_1 = arith.constant 0 : i32
    return %c0_i32, %c0_i32_0 : i32, i32
  }
  func.func @transform_7(%arg0: i32, %arg1: memref<3x3xi32, #tpu.memory_space<smem>>) -> (i32, i32) {
    %c0_i32 = arith.constant 0 : i32
    %c0_i32_0 = arith.constant 0 : i32
    %c0_i32_1 = arith.constant 0 : i32
    return %c0_i32, %c0_i32_0 : i32, i32
  }
  func.func @transform_8(%arg0: i32, %arg1: memref<3x3xi32, #tpu.memory_space<smem>>) -> (i32, i32) {
    %c0_i32 = arith.constant 0 : i32
    %c0_i32_0 = arith.constant 0 : i32
    %c0_i32_1 = arith.constant 0 : i32
    return %c0_i32, %c0_i32_0 : i32, i32
  }
  func.func @transform_9(%arg0: i32, %arg1: memref<3x3xi32, #tpu.memory_space<smem>>) -> (i32, i32, i32) {
    %c0_i32 = arith.constant 0 : i32
    %c0_i32_0 = arith.constant 0 : i32
    %c0_i32_1 = arith.constant 0 : i32
    return %arg0, %c0_i32, %c0_i32_0 : i32, i32, i32
  }
}

</mosaic_0001>

<bundles_post_ra>
// kernel: model_forward.3
= control target key start
LH: loop header
LB: loop body
LE: loop exit
PB: predicated region body
PF: predicated region fallthrough
CT: control target
= control target key end

     0   :  { %s2036_s12 = smov 0   ;;  %s2446_s0 = inlined_call_operand.vmem [shape: bf16[2,324,12], index: 0, kind: input, shape index: {}]   ;;  %s2447_s1 = inlined_call_operand.vmem [shape: bf16[4,12,16], index: 1, kind: input, shape index: {}]   ;;  %s2448_s2 = inlined_call_operand.vmem [shape: f32[1,16], index: 2, kind: input, shape index: {}]   ;;  %s2449_s3 = inlined_call_operand.vmem [shape: bf16[2,288,16], index: 3, kind: output, shape index: {}]  }
   0x1 LB: > { %s1709_s13 = sadd.s32 4294967295, %s2014_s12   ;;  %p1713_p0 = scmp.ge.s32.totalorder %s2014_s12, 1  ;;  %s2014_s12 = sphi %s2036_s12, %s13_s12  }
   0x2   : > { %p137_p1 = scmp.lt.s32.totalorder %s2014_s12, 3 }
   0x4   : > { %p138_p2 = pnand %p1713_p0, %p137_p1 }
   0x5   : > { %p161_p3 = scmp.lt.s32.totalorder (!%p138_p2), %s1709_s13, 1 }
   0x6   : > { %141 = sbr.rel (%p138_p2) target bundleno = 448 (0x1c0), region = 32 }
   0xb   : > { %v1814_v0 = vld [vmem:[%s2447_s1] sm:$0xf]  ;;  %v1974_v1 = vld [vmem:[%s2447_s1] sm:$0x30]  ;;  %vm516_vm0 = vcmask 1045504   ;;  %s2451_s13 = smov (!%p161_p3, %s1709_s13), 1 }
   0xc   : > { %v1815_v2 = vor.u32 %v1974_v1, %v1814_v0  ;;  %v1910_v3 = vld [vmem:[%s2447_s1 + $0x10] sm:$0xf]  ;;  %v1994_v4 = vld [vmem:[%s2447_s1 + $0x10] sm:$0x30]  ;;  %v1792_v6 = vld [vmem:[%s2447_s1 + $0x8] sm:$0xf] }
   0xd   : > { %v1911_v5 = vor.u32 %v1994_v4, %v1910_v3  ;;  %v1975_v7 = vld [vmem:[%s2447_s1 + $0x8] sm:$0x30]  ;;  %v1934_v10 = vld [vmem:[%s2447_s1 + $0x18] sm:$0xf]  ;;  %v1995_v11 = vld [vmem:[%s2447_s1 + $0x18] sm:$0x30] }
   0xe   : > { %v661_v8 = vsel %vm516_vm0, %v1815_v2, 0  ;;  %v1793_v9 = vor.u32 %v1975_v7, %v1792_v6  ;;  %s1996_s30 = smul.u32 164, %s2451_s13  ;;  %v1935_v13 = vor.u32 %v1995_v11, %v1934_v10  ;;  %vm461_vm1 = vcmask 97280  }
   0xf   : > { %670 = vmatpush.bf16.msra.mxu1 %v661_v8  ;;  %v993_v12 = vsel %vm516_vm0, %v1911_v5, 0  ;;  %vm895_vm2 = vcmask 1046528   ;;  %vm307_vm3 = vsmask.f32 7424  ;;  %vm1137_vm4 = vsmask.f32 6400 }
  0x10   : > { %1002 = vmatpush.bf16.msra.mxu2 %v993_v12  ;;  %v518_v14 = vsel %vm516_vm0, %v1793_v9, 0  ;;  %s2077_s6 = scalar_lea.vmem %s2446_s0, %s1996_s30  ;;  %v1368_v15 = vsel %vm516_vm0, %v1935_v13, 0  ;;  %s1997_s9 = smul.u32 144, %s2451_s13  ;;  %vm1617_vm5 = vcmask 125952  }
  0x11   : > { %527 = vmatpush.bf16.msra.mxu0 %v518_v14  ;;  %v1956_v16 = vld [vmem:[%s2077_s6] sm:$0xff]  ;;  %v1838_v17 = vld [vmem:[%s2077_s6 + $0x8] sm:$0xe]  ;;  %v1976_v18 = vld [vmem:[%s2077_s6 + $0x8] sm:$0xf0]  ;;  %1377 = vmatpush.bf16.msra.mxu3 %v1368_v15 }
  0x12   : > { %v1977_v19 = vld [vmem:[%s2077_s6 + $0x10] sm:$0xff]  ;;  %v1839_v20 = vor.u32 %v1976_v18, %v1838_v17  ;;  %v1957_v21 = vld [vmem:[%s2077_s6 + $0x8] sm:$0xff]  ;;  %v311_v22 = vshll.u32 %v1956_v16, 16  ;;  %1816 = vmatmul.msk.bf16.vlgmr.msra.gmra.mxu1 %vm461_vm1, %v1956_v16  ;;  %v309_v23 = vshrl.u32 %v1956_v16, 16  ;;  %v1978_v42 = vld [vmem:[%s2077_s6 + $0x18] sm:$0xff]  ;;  %s2186_s14 = scalar_lea.vmem %s2449_s3, %s1997_s9 }
  0x13   : > { %v897_v25 = vrot.slane %v1977_v19, 1  ;;  %v316_v26 = vshll.u32 %v1957_v21, 16  ;;  %v1147_v30 = vshrl.u32 %v1977_v19, 16  ;;  %v1150_v31 = vshll.u32 %v1977_v19, 16  ;;  %v1958_v44 = vld [vmem:[%s2077_s6 + $0x10] sm:$0xff]  ;;  %v1979_v58 = vld [vmem:[%s2077_s6 + $0x20] sm:$0xff] }
  0x14   : > { %v896_v24 = vrot.slane %v1839_v20, 1  ;;  %v1139_v27 = vshrl.u32 %v1839_v20, 16  ;;  %v313_v28 = vrot.slane %v311_v22, 1  ;;  %v1142_v29 = vshll.u32 %v1839_v20, 16  ;;  %v1959_v59 = vld [vmem:[%s2077_s6 + $0x18] sm:$0xff]  ;;  %v1980_v9 = vld [vmem:[%s2077_s6 + $0x28] sm:$0xff] }
  0x15   : > { %v318_v33 = vrot.slane %v316_v26, 1  ;;  %v1149_v37 = vrot.slane %v1147_v30, 1  ;;  %v1152_v38 = vrot.slane %v1150_v31, 2  ;;  %v1156_v45 = vshrl.u32 %v1978_v42, 16  ;;  %v1960_v10 = vld [vmem:[%s2077_s6 + $0x20] sm:$0xff] }
  0x16   : > { %v898_v32 = vsel %vm895_vm2, %v896_v24, %v897_v25  ;;  %v1141_v34 = vrot.slane %v1139_v27, 1  ;;  %v314_v35 = vor.u32 %v313_v28, %v309_v23  ;;  %v1144_v36 = vrot.slane %v1142_v29, 2  ;;  %v1981_v24 = vld [vmem:[%s2077_s6 + $0x30] sm:$0xff] }
  0x17   : > { %1912 = vmatmul.msk.bf16.vlgmr.msra.gmra.mxu2 %vm461_vm1, %v898_v32  ;;  %v1153_v41 = vor.u32 %v1152_v38, %v1149_v37  ;;  %v1159_v46 = vshll.u32 %v1978_v42, 16  ;;  %v320_v47 = vshrl.u32 %v1957_v21, 16  ;;  %v324_v48 = vshll.u32 %v1958_v44, 16 }
  0x18   : > { %v319_v39 = vsel %vm307_vm3, %v314_v35, %v318_v33  ;;  %v1145_v40 = vor.u32 %v1144_v36, %v1141_v34  ;;  %v899_v49 = vrot.slane %v1978_v42, 1  ;;  %v1158_v50 = vrot.slane %v1156_v45, 1 }
  0x19   : > { %1794 = vmatmul.msk.bf16.vlgmr.msra.gmra.mxu0 %vm461_vm1, %v319_v39  ;;  %v1161_v51 = vrot.slane %v1159_v46, 2  ;;  %v322_v52 = vor.u32 %v320_v47, %v318_v33  ;;  %v326_v53 = vrot.slane %v324_v48, 1  ;;  %v1165_v60 = vshrl.u32 %v1979_v58, 16  ;;  %v1982_v39 = vld [vmem:[%s2077_s6 + $0x38] sm:$0xff] }
  0x1a   : > { %v1154_v43 = vsel %vm1137_vm4, %v1145_v40, %v1153_v41  ;;  %v900_v54 = vsel %vm895_vm2, %v897_v25, %v899_v49  ;;  %v1168_v61 = vshll.u32 %v1979_v58, 16  ;;  %v328_v62 = vshrl.u32 %v1958_v44, 16  ;;  %v1961_v25 = vld [vmem:[%s2077_s6 + $0x28] sm:$0xff]  ;;  %v1962_v40 = vld [vmem:[%s2077_s6 + $0x30] sm:$0xff] }
  0x1b   : > { %1936 = vmatmul.msk.bf16.vlgmr.msra.gmra.mxu3 %vm461_vm1, %v1154_v43  ;;  %v1162_v55 = vor.u32 %v1161_v51, %v1158_v50  ;;  %v327_v56 = vsel %vm307_vm3, %v322_v52, %v326_v53  ;;  %v332_v63 = vshll.u32 %v1959_v59, 16  ;;  %v901_v0 = vrot.slane %v1979_v58, 1 }
  0x1c   : > { %v1167_v1 = vrot.slane %v1165_v60, 1  ;;  %v1170_v2 = vrot.slane %v1168_v61, 2  ;;  %v330_v3 = vor.u32 %v328_v62, %v326_v53  ;;  %v1174_v11 = vshrl.u32 %v1980_v9, 16 }
  0x1d   : > { %v1163_v57 = vsel %vm1137_vm4, %v1153_v41, %v1162_v55  ;;  %v334_v4 = vrot.slane %v332_v63, 1  ;;  %v902_v5 = vsel %vm895_vm2, %v899_v49, %v901_v0  ;;  %v1177_v12 = vshll.u32 %v1980_v9, 16 }
  0x1e   : > { %v1171_v6 = vor.u32 %v1170_v2, %v1167_v1  ;;  %v336_v13 = vshrl.u32 %v1959_v59, 16  ;;  %v340_v14 = vshll.u32 %v1960_v10, 16  ;;  %v903_v15 = vrot.slane %v1980_v9, 1 }
  0x1f   : > { %v335_v7 = vsel %vm307_vm3, %v330_v3, %v334_v4  ;;  %v1176_v16 = vrot.slane %v1174_v11, 1  ;;  %v1179_v17 = vrot.slane %v1177_v12, 2  ;;  %v1183_v26 = vshrl.u32 %v1981_v24, 16 }
  0x20   : > { %v1172_v8 = vsel %vm1137_vm4, %v1162_v55, %v1171_v6  ;;  %v338_v18 = vor.u32 %v336_v13, %v334_v4  ;;  %v342_v19 = vrot.slane %v340_v14, 1  ;;  %v904_v20 = vsel %vm895_vm2, %v901_v0, %v903_v15  ;;  %v1963_v55 = vld [vmem:[%s2077_s6 + $0x38] sm:$0xff] }
  0x21   : > { %v1186_v27 = vshll.u32 %v1981_v24, 16  ;;  %v344_v28 = vshrl.u32 %v1960_v10, 16  ;;  %v348_v29 = vshll.u32 %v1961_v25, 16  ;;  %v905_v30 = vrot.slane %v1981_v24, 1 }
  0x22   : > { %1817 = vmatmul.msk.bf16.gmra.mxu1 %vm461_vm1, %v1957_v21  ;;  %v1180_v21 = vor.u32 %v1179_v17, %v1176_v16  ;;  %v343_v22 = vsel %vm307_vm3, %v338_v18, %v342_v19  ;;  %v1185_v31 = vrot.slane %v1183_v26, 1  ;;  %v1192_v41 = vshrl.u32 %v1982_v39, 16 }
  0x23   : > { %v1188_v32 = vrot.slane %v1186_v27, 2  ;;  %v346_v33 = vor.u32 %v344_v28, %v342_v19  ;;  %v350_v34 = vrot.slane %v348_v29, 1  ;;  %v906_v35 = vsel %vm895_vm2, %v903_v15, %v905_v30 }
  0x24   : > { %v1181_v23 = vsel %vm1137_vm4, %v1171_v6, %v1180_v21  ;;  %v1195_v42 = vshll.u32 %v1982_v39, 16  ;;  %v352_v43 = vshrl.u32 %v1961_v25, 16  ;;  %v907_v45 = vrot.slane %v1982_v39, 1  ;;  %v1964_v6 = vld [vmem:[%s2077_s6 + $0x40] sm:$0xff]  ;;  %v2163_v39 = vld [vmem:[%s2077_s6 + $0x58] sm:$0xff] }
  0x25   : > { %v1189_v36 = vor.u32 %v1188_v32, %v1185_v31  ;;  %v351_v37 = vsel %vm307_vm3, %v346_v33, %v350_v34  ;;  %v1194_v46 = vrot.slane %v1192_v41, 1  ;;  %v360_v58 = vshrl.u32 %v1962_v40, 16  ;;  %v2167_v41 = vld [vmem:[%s2077_s6 + $0x50] sm:$0xff] }
  0x26   : > { %v1197_v47 = vrot.slane %v1195_v42, 2  ;;  %v354_v48 = vor.u32 %v352_v43, %v350_v34  ;;  %v908_v50 = vsel %vm895_vm2, %v905_v30, %v907_v45  ;;  %v368_v9 = vshrl.u32 %v1963_v55, 16 }
  0x27   : > { %1913 = vmatmul.msk.bf16.gmra.mxu2 %vm461_vm1, %v900_v54  ;;  %v1190_v38 = vsel %vm1137_vm4, %v1180_v21, %v1189_v36  ;;  %v1983_v54 = vld [vmem:[%s2077_s6 + $0x40] sm:$0xff]  ;;  %v1965_v21 = vld [vmem:[%s2077_s6 + $0x48] sm:$0xff]  ;;  %v376_v24 = vshrl.u32 %v1964_v6, 16  ;;  %v1228_v43 = vshrl.u32 %v2163_v39, 16 }
  0x28   : > { %v1198_v51 = vor.u32 %v1197_v47, %v1194_v46  ;;  %v909_v60 = vrot.slane %v1983_v54, 1 }
  0x29   : > { %1795 = vmatmul.msk.bf16.gmra.mxu0 %vm461_vm1, %v327_v56  ;;  %v1201_v56 = vshrl.u32 %v1983_v54, 16 }
  0x2a   : > { %v1199_v53 = vsel %vm1137_vm4, %v1189_v36, %v1198_v51  ;;  %v910_v1 = vsel %vm895_vm2, %v907_v45, %v909_v60  ;;  %v2175_v45 = vld [vmem:[%s2448_s2] ss:$0 sm:$0xff] }
  0x2b   : > { %1937 = vmatmul.msk.bf16.gmra.mxu3 %vm461_vm1, %v1163_v57  ;;  %v1204_v57 = vshll.u32 %v1983_v54, 16  ;;  %v1203_v61 = vrot.slane %v1201_v56, 1 }
  0x2d   : > { %v1206_v62 = vrot.slane %v1204_v57, 2 }
  0x2f   : > { %v1207_v2 = vor.u32 %v1206_v62, %v1203_v61 }
  0x31   : > { %v1208_v4 = vsel %vm1137_vm4, %v1198_v51, %v1207_v2 }
  0x32   : > { %1818 = vmatmul.msk.bf16.gmra.mxu1 %vm461_vm1, %v1958_v44  ;;  %v356_v44 = vshll.u32 %v1962_v40, 16 }
  0x34   : > { %v358_v49 = vrot.slane %v356_v44, 1  ;;  %v1231_v44 = vshll.u32 %v2163_v39, 16 }
  0x36   : > { %v359_v52 = vsel %vm307_vm3, %v354_v48, %v358_v49  ;;  %v362_v63 = vor.u32 %v360_v58, %v358_v49  ;;  %v384_v48 = vshrl.u32 %v1965_v21, 16  ;;  %v388_v49 = vshll.u32 %v2167_v41, 16 }
  0x37   : > { %1914 = vmatmul.msk.bf16.gmra.mxu2 %vm461_vm1, %v902_v5  ;;  %v1984_v5 = vld [vmem:[%s2077_s6 + $0x48] sm:$0xff]  ;;  %v1233_v54 = vrot.slane %v1231_v44, 2 }
  0x38   : > { %v911_v11 = vrot.slane %v1984_v5, 1 }
  0x39   : > { %1796 = vmatmul.msk.bf16.gmra.mxu0 %vm461_vm1, %v335_v7  ;;  %v1210_v7 = vshrl.u32 %v1984_v5, 16 }
  0x3a   : > { %v912_v16 = vsel %vm895_vm2, %v909_v60, %v911_v11 }
  0x3b   : > { %1938 = vmatmul.msk.bf16.gmra.mxu3 %vm461_vm1, %v1172_v8  ;;  %v1213_v8 = vshll.u32 %v1984_v5, 16  ;;  %v1212_v12 = vrot.slane %v1210_v7, 1 }
  0x3d   : > { %v1215_v13 = vrot.slane %v1213_v8, 2  ;;  %v2194_v8 = vld [vmem:[%s2077_s6 + $0x60] sm:$0xff] }
  0x3f   : > { %v1216_v17 = vor.u32 %v1215_v13, %v1212_v12 }
  0x41   : > { %v1217_v19 = vsel %vm1137_vm4, %v1207_v2, %v1216_v17 }
  0x42   : > { %1819 = vmatmul.msk.bf16.gmra.mxu1 %vm461_vm1, %v1959_v59  ;;  %v364_v59 = vshll.u32 %v1963_v55, 16 }
  0x44   : > { %v366_v0 = vrot.slane %v364_v59, 1  ;;  %v390_v59 = vrot.slane %v388_v49, 1 }
  0x46   : > { %v367_v3 = vsel %vm307_vm3, %v362_v63, %v366_v0  ;;  %v370_v14 = vor.u32 %v368_v9, %v366_v0 }
  0x47   : > { %1915 = vmatmul.msk.bf16.gmra.mxu2 %vm461_vm1, %v904_v20  ;;  %v1985_v20 = vld [vmem:[%s2077_s6 + $0x50] sm:$0xff] }
  0x48   : > { %v913_v27 = vrot.slane %v1985_v20, 1 }
  0x49   : > { %1797 = vmatmul.msk.bf16.gmra.mxu0 %vm461_vm1, %v343_v22  ;;  %v1219_v22 = vshrl.u32 %v1985_v20, 16 }
  0x4a   : > { %v914_v32 = vsel %vm895_vm2, %v911_v11, %v913_v27  ;;  %v2199_v11 = vld [vmem:[%s2077_s6 + $0x58] sm:$0xff] }
  0x4b   : > { %1939 = vmatmul.msk.bf16.gmra.mxu3 %vm461_vm1, %v1181_v23  ;;  %v1222_v23 = vshll.u32 %v1985_v20, 16  ;;  %v1221_v28 = vrot.slane %v1219_v22, 1  ;;  %v396_v20 = vshll.u32 %v2199_v11, 16 }
  0x4d   : > { %v1224_v29 = vrot.slane %v1222_v23, 2  ;;  %v917_v23 = vrot.slane %v2194_v8, 1 }
  0x4f   : > { %v1225_v33 = vor.u32 %v1224_v29, %v1221_v28 }
  0x52   : > { %1820 = vmatmul.msk.bf16.gmra.mxu1 %vm461_vm1, %v1960_v10  ;;  %v372_v10 = vshll.u32 %v1964_v6, 16 }
  0x54   : > { %v374_v15 = vrot.slane %v372_v10, 1 }
  0x56   : > { %v375_v18 = vsel %vm307_vm3, %v370_v14, %v374_v15  ;;  %v378_v30 = vor.u32 %v376_v24, %v374_v15  ;;  %v1237_v14 = vshrl.u32 %v2194_v8, 16  ;;  %v1240_v15 = vshll.u32 %v2194_v8, 16 }
  0x57   : > { %1916 = vmatmul.msk.bf16.gmra.mxu2 %vm461_vm1, %v906_v35 }
  0x58   : > { %v1239_v24 = vrot.slane %v1237_v14, 1 }
  0x59   : > { %1798 = vmatmul.msk.bf16.gmra.mxu0 %vm461_vm1, %v351_v37 }
  0x5b   : > { %1940 = vmatmul.msk.bf16.gmra.mxu3 %vm461_vm1, %v1190_v38  ;;  %v1226_v38 = vsel %vm1137_vm4, %v1216_v17, %v1225_v33 }
  0x62   : > { %1821 = vmatmul.msk.bf16.gmra.mxu1 %vm461_vm1, %v1961_v25  ;;  %v380_v25 = vshll.u32 %v1965_v21, 16 }
  0x64   : > { %v382_v31 = vrot.slane %v380_v25, 1  ;;  %v1242_v25 = vrot.slane %v1240_v15, 2  ;;  %v2244_v15 = vld [vmem:[%s2077_s6 + $0x70] sm:$0xff] }
  0x66   : > { %v383_v35 = vsel %vm307_vm3, %v378_v30, %v382_v31  ;;  %v386_v58 = vor.u32 %v384_v48, %v382_v31  ;;  %v398_v30 = vrot.slane %v396_v20, 1 }
  0x67   : > { %1917 = vmatmul.msk.bf16.gmra.mxu2 %vm461_vm1, %v908_v50 }
  0x69   : > { %1799 = vmatmul.msk.bf16.gmra.mxu0 %vm461_vm1, %v359_v52  ;;  %v915_v52 = vrot.slane %v2163_v39, 1 }
  0x6b   : > { %1941 = vmatmul.msk.bf16.gmra.mxu3 %vm461_vm1, %v1199_v53  ;;  %v1230_v53 = vrot.slane %v1228_v43, 1  ;;  %v916_v61 = vsel %vm895_vm2, %v913_v27, %v915_v52  ;;  %v2219_v43 = vld [vmem:[%s2077_s6 + $0x68] sm:$0xff] }
  0x6d   : > { %v1234_v62 = vor.u32 %v1233_v54, %v1230_v53 }
  0x6f   : > { %v1235_v7 = vsel %vm1137_vm4, %v1225_v33, %v1234_v62  ;;  %v1243_v33 = vor.u32 %v1242_v25, %v1239_v24 }
  0x72   : > { %1822 = vmatmul.msk.bf16.gmra.mxu1 %vm461_vm1, %v1962_v40 }
  0x77   : > { %1918 = vmatmul.msk.bf16.gmra.mxu2 %vm461_vm1, %v910_v1 }
  0x79   : > { %1800 = vmatmul.msk.bf16.gmra.mxu0 %vm461_vm1, %v367_v3  ;;  %v391_v3 = vsel %vm307_vm3, %v386_v58, %v390_v59 }
  0x7b   : > { %1942 = vmatmul.msk.bf16.gmra.mxu3 %vm461_vm1, %v1208_v4 }
  0x82   : > { %1823 = vmatmul.msk.bf16.gmra.mxu1 %vm461_vm1, %v1963_v55 }
  0x87   : > { %1919 = vmatmul.msk.bf16.gmra.mxu2 %vm461_vm1, %v912_v16 }
  0x89   : > { %1801 = vmatmul.msk.bf16.gmra.mxu0 %vm461_vm1, %v375_v18 }
  0x8b   : > { %1943 = vmatmul.msk.bf16.gmra.mxu3 %vm461_vm1, %v1217_v19  ;;  %v392_v19 = vshrl.u32 %v2167_v41, 16 }
  0x8d   : > { %v394_v29 = vor.u32 %v392_v19, %v390_v59  ;;  %v919_v59 = vrot.slane %v2219_v43, 1 }
  0x8f   : > { %v672_v26 = vpop.f32.mrf.mxu1 }
  0x92   : > { %1824 = vmatmul.msk.bf16.gmra.mxu1 %vm461_vm1, %v1964_v6 }
  0x96   : > { %v529_v34 = vpop.f32.mrf.mxu0 }
  0x97   : > { %1920 = vmatmul.msk.bf16.gmra.mxu2 %vm461_vm1, %v914_v32  ;;  %v673_v36 = vadd.f32 %v672_v26, %v529_v34  ;;  %v674_v37 = vpop.f32.mrf.mxu1  ;;  %v918_v32 = vsel %vm895_vm2, %v915_v52, %v917_v23 }
  0x99   : > { %1802 = vmatmul.msk.bf16.gmra.mxu0 %vm461_vm1, %v383_v35 }
  0x9a   : > { %v1004_v40 = vpop.f32.mrf.mxu2 }
  0x9b   : > { %v1094_v42 = vadd.f32 %v1004_v40, %v673_v36  ;;  %1944 = vmatmul.msk.bf16.gmra.mxu3 %vm461_vm1, %v1226_v38  ;;  %v399_v38 = vsel %vm307_vm3, %v394_v29, %v398_v30 }
  0x9e   : > { %v1379_v46 = vpop.f32.mrf.mxu3  ;;  %v531_v47 = vpop.f32.mrf.mxu0 }
  0x9f   : > { %v1469_v50 = vadd.f32 %v1379_v46, %v1094_v42  ;;  %v677_v51 = vpop.f32.mrf.mxu1  ;;  %v675_v56 = vadd.f32 %v674_v37, %v531_v47  ;;  %v1244_v42 = vsel %vm1137_vm4, %v1234_v62, %v1243_v33  ;;  %v2224_v47 = vld [vmem:[%s2077_s6 + $0x60] sm:$0xff] }
  0xa1   : > { %v1509_v55 = vadd.f32 %v2175_v45, %v1469_v50  ;;  %v1246_v50 = vshrl.u32 %v2219_v43, 16 }
  0xa2   : > { %v1006_v57 = vpop.f32.mrf.mxu2  ;;  %1825 = vmatmul.msk.bf16.gmra.mxu1 %vm461_vm1, %v1965_v21 }
  0xa3   : > { %v1545_v60 = vmax.f32 %v1509_v55, 0.0  ;;  %v1095_v0 = vadd.f32 %v1006_v57, %v675_v56  ;;  %v400_v55 = vshrl.u32 %v2199_v11, 16  ;;  %v404_v56 = vshll.u32 %v2224_v47, 16 }
  0xa5   : > { %v1581_v63 = vpack.c.bf16 %v1545_v60, %v1545_v60  ;;  %v1248_v60 = vrot.slane %v1246_v50, 1 }
  0xa6   : > { %v1381_v1 = vpop.f32.mrf.mxu3  ;;  %v534_v2 = vpop.f32.mrf.mxu0 }
  0xa7   : > { %1921 = vmatmul.msk.bf16.gmra.mxu2 %vm461_vm1, %v916_v61  ;;  %1618 = vst.msk [vmem:[%s2186_s14] sm:$0xf] %vm1617_vm5, %v1581_v63  ;;  %v1470_v4 = vadd.f32 %v1381_v1, %v1095_v0  ;;  %v678_v5 = vadd.f32 %v677_v51, %v534_v2  ;;  %v679_v6 = vpop.f32.mrf.mxu1  ;;  %v1249_v51 = vshll.u32 %v2219_v43, 16  ;;  %v402_v1 = vor.u32 %v400_v55, %v398_v30 }
  0xa8   : > { %v406_v2 = vrot.slane %v404_v56, 1  ;;  %v921_v30 = vrot.slane %v2244_v15, 1 }
  0xa9   : > { %v1510_v9 = vadd.f32 %v2175_v45, %v1470_v4  ;;  %1803 = vmatmul.msk.bf16.gmra.mxu0 %vm461_vm1, %v391_v3  ;;  %v1251_v61 = vrot.slane %v1249_v51, 2  ;;  %v920_v4 = vsel %vm895_vm2, %v917_v23, %v919_v59  ;;  %v2269_v51 = vld [vmem:[%s2077_s6 + $0x78] sm:$0xff] }
  0xaa   : > { %v1009_v10 = vpop.f32.mrf.mxu2 }
  0xab   : > { %v1546_v12 = vmax.f32 %v1510_v9, 0.0  ;;  %v1096_v13 = vadd.f32 %v1009_v10, %v678_v5  ;;  %1945 = vmatmul.msk.bf16.gmra.mxu3 %vm461_vm1, %v1235_v7  ;;  %v1252_v5 = vor.u32 %v1251_v61, %v1248_v60  ;;  %v407_v10 = vsel %vm307_vm3, %v402_v1, %v406_v2 }
  0xad   : > { %v1582_v16 = vpack.c.bf16 %v1546_v12, %v1546_v12  ;;  %v1253_v14 = vsel %vm1137_vm4, %v1243_v33, %v1252_v5 }
  0xae   : > { %v1384_v17 = vpop.f32.mrf.mxu3  ;;  %v536_v18 = vpop.f32.mrf.mxu0 }
  0xaf   : > { %1619 = vst.msk [vmem:[%s2186_s14 + $0x4] sm:$0xf] %vm1617_vm5, %v1582_v16  ;;  %v1471_v21 = vadd.f32 %v1384_v17, %v1096_v13  ;;  %v682_v22 = vpop.f32.mrf.mxu1  ;;  %v680_v27 = vadd.f32 %v679_v6, %v536_v18  ;;  %v2249_v18 = vld [vmem:[%s2077_s6 + $0x68] sm:$0xff] }
  0xb1   : > { %v1511_v26 = vadd.f32 %v2175_v45, %v1471_v21  ;;  %v1255_v21 = vshrl.u32 %v2244_v15, 16 }
  0xb2   : > { %v1011_v28 = vpop.f32.mrf.mxu2  ;;  %1826 = vmatmul.msk.bf16.gmra.mxu1 %vm461_vm1, %v2167_v41 }
  0xb3   : > { %v1547_v31 = vmax.f32 %v1511_v26, 0.0  ;;  %v1097_v35 = vadd.f32 %v1011_v28, %v680_v27  ;;  %v408_v26 = vshrl.u32 %v2224_v47, 16  ;;  %v412_v27 = vshll.u32 %v2249_v18, 16 }
  0xb5   : > { %v1583_v34 = vpack.c.bf16 %v1547_v31, %v1547_v31  ;;  %v1257_v31 = vrot.slane %v1255_v21, 1 }
  0xb6   : > { %v1386_v36 = vpop.f32.mrf.mxu3  ;;  %v539_v37 = vpop.f32.mrf.mxu0 }
  0xb7   : > { %1922 = vmatmul.msk.bf16.gmra.mxu2 %vm461_vm1, %v918_v32  ;;  %1620 = vst.msk [vmem:[%s2186_s14 + $0x8] sm:$0xf] %vm1617_vm5, %v1583_v34  ;;  %v1472_v39 = vadd.f32 %v1386_v36, %v1097_v35  ;;  %v683_v40 = vadd.f32 %v682_v22, %v539_v37  ;;  %v684_v41 = vpop.f32.mrf.mxu1  ;;  %v1258_v22 = vshll.u32 %v2244_v15, 16  ;;  %v410_v36 = vor.u32 %v408_v26, %v406_v2 }
  0xb8   : > { %v414_v37 = vrot.slane %v412_v27, 1  ;;  %v923_v2 = vrot.slane %v2269_v51, 1 }
  0xb9   : > { %v1512_v44 = vadd.f32 %v2175_v45, %v1472_v39  ;;  %1804 = vmatmul.msk.bf16.gmra.mxu0 %vm461_vm1, %v399_v38  ;;  %v1260_v32 = vrot.slane %v1258_v22, 2  ;;  %v922_v39 = vsel %vm895_vm2, %v919_v59, %v921_v30  ;;  %v2294_v22 = vld [vmem:[%s2077_s6 + $0x80] sm:$0xff] }
  0xba   : > { %v1014_v46 = vpop.f32.mrf.mxu2 }
  0xbb   : > { %v1548_v48 = vmax.f32 %v1512_v44, 0.0  ;;  %v1098_v49 = vadd.f32 %v1014_v46, %v683_v40  ;;  %1946 = vmatmul.msk.bf16.gmra.mxu3 %vm461_vm1, %v1244_v42  ;;  %v1261_v40 = vor.u32 %v1260_v32, %v1257_v31  ;;  %v415_v46 = vsel %vm307_vm3, %v410_v36, %v414_v37 }
  0xbd   : > { %v1584_v52 = vpack.c.bf16 %v1548_v48, %v1548_v48  ;;  %v1262_v50 = vsel %vm1137_vm4, %v1252_v5, %v1261_v40 }
  0xbe   : > { %v1389_v53 = vpop.f32.mrf.mxu3  ;;  %v541_v54 = vpop.f32.mrf.mxu0 }
  0xbf   : > { %1621 = vst.msk [vmem:[%s2186_s14 + $0xc] sm:$0xf] %vm1617_vm5, %v1584_v52  ;;  %v1473_v57 = vadd.f32 %v1389_v53, %v1098_v49  ;;  %v687_v58 = vpop.f32.mrf.mxu1  ;;  %v685_v63 = vadd.f32 %v684_v41, %v541_v54  ;;  %v2274_v54 = vld [vmem:[%s2077_s6 + $0x70] sm:$0xff] }
  0xc1   : > { %v1513_v62 = vadd.f32 %v2175_v45, %v1473_v57  ;;  %v1264_v57 = vshrl.u32 %v2269_v51, 16 }
  0xc2   : > { %v1016_v0 = vpop.f32.mrf.mxu2  ;;  %1827 = vmatmul.msk.bf16.gmra.mxu1 %vm461_vm1, %v2199_v11 }
  0xc3   : > { %v1549_v3 = vmax.f32 %v1513_v62, 0.0  ;;  %v1099_v7 = vadd.f32 %v1016_v0, %v685_v63  ;;  %v416_v62 = vshrl.u32 %v2249_v18, 16  ;;  %v420_v63 = vshll.u32 %v2274_v54, 16 }
  0xc5   : > { %v1585_v6 = vpack.c.bf16 %v1549_v3, %v1549_v3  ;;  %v1266_v3 = vrot.slane %v1264_v57, 1 }
  0xc6   : > { %v1391_v8 = vpop.f32.mrf.mxu3  ;;  %v544_v9 = vpop.f32.mrf.mxu0 }
  0xc7   : > { %1923 = vmatmul.msk.bf16.gmra.mxu2 %vm461_vm1, %v920_v4  ;;  %1622 = vst.msk [vmem:[%s2186_s14 + $0x10] sm:$0xf] %vm1617_vm5, %v1585_v6  ;;  %v1474_v12 = vadd.f32 %v1391_v8, %v1099_v7  ;;  %v688_v11 = vadd.f32 %v687_v58, %v544_v9  ;;  %v689_v13 = vpop.f32.mrf.mxu1  ;;  %v1267_v58 = vshll.u32 %v2269_v51, 16  ;;  %v418_v8 = vor.u32 %v416_v62, %v414_v37 }
  0xc8   : > { %v422_v9 = vrot.slane %v420_v63, 1  ;;  %v925_v37 = vrot.slane %v2294_v22, 1 }
  0xc9   : > { %v1514_v16 = vadd.f32 %v2175_v45, %v1474_v12  ;;  %1805 = vmatmul.msk.bf16.gmra.mxu0 %vm461_vm1, %v407_v10  ;;  %v1269_v4 = vrot.slane %v1267_v58, 2  ;;  %v924_v12 = vsel %vm895_vm2, %v921_v30, %v923_v2  ;;  %v2319_v58 = vld [vmem:[%s2077_s6 + $0x88] sm:$0xff] }
  0xca   : > { %v1019_v17 = vpop.f32.mrf.mxu2 }
  0xcb   : > { %v1550_v19 = vmax.f32 %v1514_v16, 0.0  ;;  %v1100_v20 = vadd.f32 %v1019_v17, %v688_v11  ;;  %1947 = vmatmul.msk.bf16.gmra.mxu3 %vm461_vm1, %v1253_v14  ;;  %v1270_v11 = vor.u32 %v1269_v4, %v1266_v3  ;;  %v423_v17 = vsel %vm307_vm3, %v418_v8, %v422_v9 }
  0xcd   : > { %v1586_v23 = vpack.c.bf16 %v1550_v19, %v1550_v19  ;;  %v1271_v21 = vsel %vm1137_vm4, %v1261_v40, %v1270_v11 }
  0xce   : > { %v1394_v24 = vpop.f32.mrf.mxu3  ;;  %v546_v25 = vpop.f32.mrf.mxu0 }
  0xcf   : > { %1623 = vst.msk [vmem:[%s2186_s14 + $0x14] sm:$0xf] %vm1617_vm5, %v1586_v23  ;;  %v1475_v28 = vadd.f32 %v1394_v24, %v1100_v20  ;;  %v692_v29 = vpop.f32.mrf.mxu1  ;;  %v690_v34 = vadd.f32 %v689_v13, %v546_v25  ;;  %v2299_v25 = vld [vmem:[%s2077_s6 + $0x78] sm:$0xff] }
  0xd1   : > { %v1515_v33 = vadd.f32 %v2175_v45, %v1475_v28  ;;  %v1273_v28 = vshrl.u32 %v2294_v22, 16 }
  0xd2   : > { %v1021_v35 = vpop.f32.mrf.mxu2  ;;  %1828 = vmatmul.msk.bf16.gmra.mxu1 %vm461_vm1, %v2224_v47 }
  0xd3   : > { %v1551_v38 = vmax.f32 %v1515_v33, 0.0  ;;  %v1101_v42 = vadd.f32 %v1021_v35, %v690_v34  ;;  %v424_v33 = vshrl.u32 %v2274_v54, 16  ;;  %v428_v34 = vshll.u32 %v2299_v25, 16 }
  0xd5   : > { %v1587_v41 = vpack.c.bf16 %v1551_v38, %v1551_v38  ;;  %v1275_v38 = vrot.slane %v1273_v28, 1 }
  0xd6   : > { %v1396_v43 = vpop.f32.mrf.mxu3  ;;  %v549_v44 = vpop.f32.mrf.mxu0 }
  0xd7   : > { %1924 = vmatmul.msk.bf16.gmra.mxu2 %vm461_vm1, %v922_v39  ;;  %1624 = vst.msk [vmem:[%s2186_s14 + $0x18] sm:$0xf] %vm1617_vm5, %v1587_v41  ;;  %v1476_v48 = vadd.f32 %v1396_v43, %v1101_v42  ;;  %v693_v47 = vadd.f32 %v692_v29, %v549_v44  ;;  %v694_v49 = vpop.f32.mrf.mxu1  ;;  %v1276_v29 = vshll.u32 %v2294_v22, 16  ;;  %v426_v43 = vor.u32 %v424_v33, %v422_v9 }
  0xd8   : > { %v430_v44 = vrot.slane %v428_v34, 1  ;;  %v927_v9 = vrot.slane %v2319_v58, 1 }
  0xd9   : > { %v1516_v52 = vadd.f32 %v2175_v45, %v1476_v48  ;;  %1806 = vmatmul.msk.bf16.gmra.mxu0 %vm461_vm1, %v415_v46  ;;  %v1278_v39 = vrot.slane %v1276_v29, 2  ;;  %v926_v48 = vsel %vm895_vm2, %v923_v2, %v925_v37  ;;  %v2344_v29 = vld [vmem:[%s2077_s6 + $0x90] sm:$0xff] }
  0xda   : > { %v1024_v53 = vpop.f32.mrf.mxu2 }
  0xdb   : > { %v1552_v55 = vmax.f32 %v1516_v52, 0.0  ;;  %v1102_v56 = vadd.f32 %v1024_v53, %v693_v47  ;;  %1948 = vmatmul.msk.bf16.gmra.mxu3 %vm461_vm1, %v1262_v50  ;;  %v1279_v47 = vor.u32 %v1278_v39, %v1275_v38  ;;  %v431_v53 = vsel %vm307_vm3, %v426_v43, %v430_v44 }
  0xdd   : > { %v1588_v59 = vpack.c.bf16 %v1552_v55, %v1552_v55  ;;  %v1280_v57 = vsel %vm1137_vm4, %v1270_v11, %v1279_v47 }
  0xde   : > { %v1399_v60 = vpop.f32.mrf.mxu3  ;;  %v551_v61 = vpop.f32.mrf.mxu0 }
  0xdf   : > { %1625 = vst.msk [vmem:[%s2186_s14 + $0x1c] sm:$0xf] %vm1617_vm5, %v1588_v59  ;;  %v1477_v0 = vadd.f32 %v1399_v60, %v1102_v56  ;;  %v697_v1 = vpop.f32.mrf.mxu1  ;;  %v695_v6 = vadd.f32 %v694_v49, %v551_v61  ;;  %v2324_v61 = vld [vmem:[%s2077_s6 + $0x80] sm:$0xff] }
  0xe1   : > { %v1517_v5 = vadd.f32 %v2175_v45, %v1477_v0  ;;  %v1282_v0 = vshrl.u32 %v2319_v58, 16 }
  0xe2   : > { %v1026_v7 = vpop.f32.mrf.mxu2  ;;  %1829 = vmatmul.msk.bf16.gmra.mxu1 %vm461_vm1, %v2249_v18 }
  0xe3   : > { %v1553_v10 = vmax.f32 %v1517_v5, 0.0  ;;  %v1103_v14 = vadd.f32 %v1026_v7, %v695_v6  ;;  %v432_v5 = vshrl.u32 %v2299_v25, 16  ;;  %v436_v6 = vshll.u32 %v2324_v61, 16 }
  0xe5   : > { %v1589_v13 = vpack.c.bf16 %v1553_v10, %v1553_v10  ;;  %v1284_v10 = vrot.slane %v1282_v0, 1 }
  0xe6   : > { %v1401_v15 = vpop.f32.mrf.mxu3  ;;  %v554_v16 = vpop.f32.mrf.mxu0 }
  0xe7   : > { %1925 = vmatmul.msk.bf16.gmra.mxu2 %vm461_vm1, %v924_v12  ;;  %1626 = vst.msk [vmem:[%s2186_s14 + $0x20] sm:$0xf] %vm1617_vm5, %v1589_v13  ;;  %v1478_v19 = vadd.f32 %v1401_v15, %v1103_v14  ;;  %v698_v18 = vadd.f32 %v697_v1, %v554_v16  ;;  %v699_v20 = vpop.f32.mrf.mxu1  ;;  %v1285_v1 = vshll.u32 %v2319_v58, 16  ;;  %v434_v15 = vor.u32 %v432_v5, %v430_v44  ;;  %v798_v58 = vld [vmem:[%s2077_s6 + $0x98] sm:$0x1] }
  0xe8   : > { %v438_v16 = vrot.slane %v436_v6, 1  ;;  %v929_v44 = vrot.slane %v2344_v29, 1  ;;  %v875_v5 = vunpack.c.l.b16 %v798_v58 }
  0xe9   : > { %v1518_v23 = vadd.f32 %v2175_v45, %v1478_v19  ;;  %1807 = vmatmul.msk.bf16.gmra.mxu0 %vm461_vm1, %v423_v17  ;;  %v1287_v12 = vrot.slane %v1285_v1, 2  ;;  %v928_v19 = vsel %vm895_vm2, %v925_v37, %v927_v9 }
  0xea   : > { %v1029_v24 = vpop.f32.mrf.mxu2 }
  0xeb   : > { %v1554_v26 = vmax.f32 %v1518_v23, 0.0  ;;  %v1104_v27 = vadd.f32 %v1029_v24, %v698_v18  ;;  %1949 = vmatmul.msk.bf16.gmra.mxu3 %vm461_vm1, %v1271_v21  ;;  %v1288_v18 = vor.u32 %v1287_v12, %v1284_v10  ;;  %v439_v24 = vsel %vm307_vm3, %v434_v15, %v438_v16 }
  0xed   : > { %v1590_v30 = vpack.c.bf16 %v1554_v26, %v1554_v26  ;;  %v1289_v28 = vsel %vm1137_vm4, %v1279_v47, %v1288_v18 }
  0xee   : > { %v1404_v31 = vpop.f32.mrf.mxu3  ;;  %v556_v32 = vpop.f32.mrf.mxu0 }
  0xef   : > { %1627 = vst.msk [vmem:[%s2186_s14 + $0x24] sm:$0xf] %vm1617_vm5, %v1590_v30  ;;  %v1479_v35 = vadd.f32 %v1404_v31, %v1104_v27  ;;  %v702_v36 = vpop.f32.mrf.mxu1  ;;  %v700_v41 = vadd.f32 %v699_v20, %v556_v32  ;;  %v2349_v32 = vld [vmem:[%s2077_s6 + $0x88] sm:$0xff] }
  0xf1   : > { %v1519_v40 = vadd.f32 %v2175_v45, %v1479_v35  ;;  %v1291_v35 = vshrl.u32 %v2344_v29, 16 }
  0xf2   : > { %v1031_v42 = vpop.f32.mrf.mxu2  ;;  %1830 = vmatmul.msk.bf16.gmra.mxu1 %vm461_vm1, %v2274_v54 }
  0xf3   : > { %v1555_v46 = vmax.f32 %v1519_v40, 0.0  ;;  %v1105_v50 = vadd.f32 %v1031_v42, %v700_v41  ;;  %v440_v40 = vshrl.u32 %v2324_v61, 16  ;;  %v444_v41 = vshll.u32 %v2349_v32, 16 }
  0xf5   : > { %v1591_v49 = vpack.c.bf16 %v1555_v46, %v1555_v46  ;;  %v1293_v46 = vrot.slane %v1291_v35, 1 }
  0xf6   : > { %v1406_v51 = vpop.f32.mrf.mxu3  ;;  %v559_v52 = vpop.f32.mrf.mxu0 }
  0xf7   : > { %1926 = vmatmul.msk.bf16.gmra.mxu2 %vm461_vm1, %v926_v48  ;;  %1628 = vst.msk [vmem:[%s2186_s14 + $0x28] sm:$0xf] %vm1617_vm5, %v1591_v49  ;;  %v1480_v55 = vadd.f32 %v1406_v51, %v1105_v50  ;;  %v703_v54 = vadd.f32 %v702_v36, %v559_v52  ;;  %v704_v56 = vpop.f32.mrf.mxu1  ;;  %v1294_v36 = vshll.u32 %v2344_v29, 16  ;;  %v1130_v51 = vld [vmem:[%s2077_s6 + $0x98] sm:$0x3]  ;;  %v442_v52 = vor.u32 %v440_v40, %v438_v16 }
  0xf9   : > { %v1520_v59 = vadd.f32 %v2175_v45, %v1480_v55  ;;  %1808 = vmatmul.msk.bf16.gmra.mxu0 %vm461_vm1, %v431_v53  ;;  %v1296_v48 = vrot.slane %v1294_v36, 2  ;;  %v446_v53 = vrot.slane %v444_v41, 1 }
  0xfa   : > { %v1034_v60 = vpop.f32.mrf.mxu2 }
  0xfb   : > { %v1556_v62 = vmax.f32 %v1520_v59, 0.0  ;;  %v1106_v63 = vadd.f32 %v1034_v60, %v703_v54  ;;  %1950 = vmatmul.msk.bf16.gmra.mxu3 %vm461_vm1, %v1280_v57  ;;  %v930_v54 = vsel %vm895_vm2, %v927_v9, %v929_v44  ;;  %v1297_v57 = vor.u32 %v1296_v48, %v1293_v46 }
  0xfc   : > { %v1135_v59 = vunpack.c.l.b16 %v1130_v51  ;;  %v447_v1 = vsel %vm307_vm3, %v442_v52, %v446_v53 }
  0xfd   : > { %v1592_v2 = vpack.c.bf16 %v1556_v62, %v1556_v62  ;;  %v1298_v6 = vsel %vm1137_vm4, %v1288_v18, %v1297_v57  ;;  %v448_v18 = vshrl.u32 %v2349_v32, 16 }
  0xfe   : > { %v1409_v3 = vpop.f32.mrf.mxu3  ;;  %v561_v4 = vpop.f32.mrf.mxu0 }
  0xff   : > { %1629 = vst.msk [vmem:[%s2186_s14 + $0x2c] sm:$0xf] %vm1617_vm5, %v1592_v2  ;;  %v1481_v7 = vadd.f32 %v1409_v3, %v1106_v63  ;;  %v707_v8 = vpop.f32.mrf.mxu1  ;;  %v705_v13 = vadd.f32 %v704_v56, %v561_v4  ;;  %v210_v56 = vld [vmem:[%s2077_s6 + $0x90] sm:$0x1]  ;;  %v450_v29 = vor.u32 %v448_v18, %v446_v53 }
 0x100   : > { %v287_v2 = vunpack.c.l.b16 %v210_v56 }
 0x101   : > { %v1521_v11 = vadd.f32 %v2175_v45, %v1481_v7  ;;  %v1136_v7 = vpack.c.b16 %v1135_v59, %v1135_v59 }
 0x102   : > { %v1036_v14 = vpop.f32.mrf.mxu2  ;;  %1831 = vmatmul.msk.bf16.gmra.mxu1 %vm461_vm1, %v2299_v25  ;;  %v306_v10 = vpack.c.b16 %v287_v2, %v287_v2 }
 0x103   : > { %v1557_v17 = vmax.f32 %v1521_v11, 0.0  ;;  %v1107_v21 = vadd.f32 %v1036_v14, %v705_v13  ;;  %v894_v13 = vpack.c.b16 %v875_v5, %v875_v5  ;;  %v1300_v14 = vshrl.u32 %v1136_v7, 16 }
 0x104   : > { %v1303_v15 = vshll.u32 %v1136_v7, 16 }
 0x105   : > { %v1593_v20 = vpack.c.bf16 %v1557_v17, %v1557_v17 }
 0x106   : > { %v1411_v22 = vpop.f32.mrf.mxu3  ;;  %v564_v23 = vpop.f32.mrf.mxu0 }
 0x107   : > { %1927 = vmatmul.msk.bf16.gmra.mxu2 %vm461_vm1, %v928_v19  ;;  %1630 = vst.msk [vmem:[%s2186_s14 + $0x30] sm:$0xf] %vm1617_vm5, %v1593_v20  ;;  %v1482_v26 = vadd.f32 %v1411_v22, %v1107_v21  ;;  %v708_v25 = vadd.f32 %v707_v8, %v564_v23  ;;  %v709_v27 = vpop.f32.mrf.mxu1  ;;  %v452_v20 = vshll.u32 %v306_v10, 16  ;;  %v931_v23 = vrot.slane %v894_v13, 1 }
 0x109   : > { %v1522_v30 = vadd.f32 %v2175_v45, %v1482_v26  ;;  %1809 = vmatmul.msk.bf16.gmra.mxu0 %vm461_vm1, %v439_v24  ;;  %v1302_v24 = vrot.slane %v1300_v14, 1  ;;  %v1305_v26 = vrot.slane %v1303_v15, 2 }
 0x10a   : > { %v1039_v31 = vpop.f32.mrf.mxu2 }
 0x10b   : > { %v1558_v33 = vmax.f32 %v1522_v30, 0.0  ;;  %v1108_v34 = vadd.f32 %v1039_v31, %v708_v25  ;;  %1951 = vmatmul.msk.bf16.gmra.mxu3 %vm461_vm1, %v1289_v28  ;;  %v454_v30 = vrot.slane %v452_v20, 1 }
 0x10d   : > { %v1594_v37 = vpack.c.bf16 %v1558_v33, %v1558_v33  ;;  %v932_v33 = vsel %vm895_vm2, %v929_v44, %v931_v23 }
 0x10e   : > { %v1414_v38 = vpop.f32.mrf.mxu3  ;;  %v566_v39 = vpop.f32.mrf.mxu0 }
 0x10f   : > { %1631 = vst.msk [vmem:[%s2186_s14 + $0x34] sm:$0xf] %vm1617_vm5, %v1594_v37  ;;  %v1483_v42 = vadd.f32 %v1414_v38, %v1108_v34  ;;  %v712_v43 = vpop.f32.mrf.mxu1  ;;  %v710_v49 = vadd.f32 %v709_v27, %v566_v39  ;;  %v1306_v34 = vor.u32 %v1305_v26, %v1302_v24  ;;  %v455_v39 = vsel %vm307_vm3, %v450_v29, %v454_v30 }
 0x111   : > { %v1523_v47 = vadd.f32 %v2175_v45, %v1483_v42  ;;  %v1307_v42 = vsel %vm1137_vm4, %v1297_v57, %v1306_v34 }
 0x112   : > { %v1041_v50 = vpop.f32.mrf.mxu2  ;;  %1832 = vmatmul.msk.bf16.gmra.mxu1 %vm461_vm1, %v2324_v61 }
 0x113   : > { %v1559_v55 = vmax.f32 %v1523_v47, 0.0  ;;  %v1109_v62 = vadd.f32 %v1041_v50, %v710_v49 }
 0x115   : > { %v1595_v60 = vpack.c.bf16 %v1559_v55, %v1559_v55 }
 0x116   : > { %v1416_v63 = vpop.f32.mrf.mxu3  ;;  %v569_v0 = vpop.f32.mrf.mxu0 }
 0x117   : > { %1928 = vmatmul.msk.bf16.gmra.mxu2 %vm461_vm1, %v930_v54  ;;  %1632 = vst.msk [vmem:[%s2186_s14 + $0x38] sm:$0xf] %vm1617_vm5, %v1595_v60  ;;  %v1484_v61 = vadd.f32 %v1416_v63, %v1109_v62  ;;  %v713_v3 = vadd.f32 %v712_v43, %v569_v0  ;;  %v714_v4 = vpop.f32.mrf.mxu1 }
 0x119   : > { %v1524_v8 = vadd.f32 %v2175_v45, %v1484_v61  ;;  %1810 = vmatmul.msk.bf16.gmra.mxu0 %vm461_vm1, %v447_v1 }
 0x11a   : > { %v1044_v9 = vpop.f32.mrf.mxu2 }
 0x11b   : > { %v1560_v12 = vmax.f32 %v1524_v8, 0.0  ;;  %v1110_v11 = vadd.f32 %v1044_v9, %v713_v3  ;;  %1952 = vmatmul.msk.bf16.gmra.mxu3 %vm461_vm1, %v1298_v6 }
 0x11d   : > { %v1596_v16 = vpack.c.bf16 %v1560_v12, %v1560_v12 }
 0x11e   : > { %v1419_v17 = vpop.f32.mrf.mxu3  ;;  %v571_v19 = vpop.f32.mrf.mxu0 }
 0x11f   : > { %1633 = vst.msk [vmem:[%s2186_s14 + $0x3c] sm:$0xf] %vm1617_vm5, %v1596_v16  ;;  %v1485_v21 = vadd.f32 %v1419_v17, %v1110_v11  ;;  %v717_v22 = vpop.f32.mrf.mxu1  ;;  %v715_v27 = vadd.f32 %v714_v4, %v571_v19 }
 0x121   : > { %v1525_v25 = vadd.f32 %v2175_v45, %v1485_v21 }
 0x122   : > { %v1046_v28 = vpop.f32.mrf.mxu2  ;;  %1833 = vmatmul.msk.bf16.gmra.mxu1 %vm461_vm1, %v2349_v32 }
 0x123   : > { %v1561_v31 = vmax.f32 %v1525_v25, 0.0  ;;  %v1111_v36 = vadd.f32 %v1046_v28, %v715_v27 }
 0x125   : > { %v1597_v35 = vpack.c.bf16 %v1561_v31, %v1561_v31 }
 0x126   : > { %v1421_v37 = vpop.f32.mrf.mxu3  ;;  %v574_v38 = vpop.f32.mrf.mxu0 }
 0x127   : > { %1929 = vmatmul.msk.bf16.gmra.mxu2 %vm461_vm1, %v932_v33  ;;  %1634 = vst.msk [vmem:[%s2186_s14 + $0x40] sm:$0xf] %vm1617_vm5, %v1597_v35  ;;  %v1486_v40 = vadd.f32 %v1421_v37, %v1111_v36  ;;  %v718_v41 = vadd.f32 %v717_v22, %v574_v38  ;;  %v719_v32 = vpop.f32.mrf.mxu1 }
 0x129   : > { %v1526_v43 = vadd.f32 %v2175_v45, %v1486_v40  ;;  %1811 = vmatmul.msk.bf16.gmra.mxu0 %vm461_vm1, %v455_v39 }
 0x12a   : > { %v1049_v44 = vpop.f32.mrf.mxu2 }
 0x12b   : > { %v1562_v46 = vmax.f32 %v1526_v43, 0.0  ;;  %v1112_v48 = vadd.f32 %v1049_v44, %v718_v41  ;;  %1953 = vmatmul.msk.bf16.gmra.mxu3 %vm461_vm1, %v1307_v42 }
 0x12d   : > { %v1598_v47 = vpack.c.bf16 %v1562_v46, %v1562_v46 }
 0x12e   : > { %v1424_v49 = vpop.f32.mrf.mxu3  ;;  %v576_v50 = vpop.f32.mrf.mxu0 }
 0x12f   : > { %1635 = vst.msk [vmem:[%s2186_s14 + $0x44] sm:$0xf] %vm1617_vm5, %v1598_v47  ;;  %v1487_v51 = vadd.f32 %v1424_v49, %v1112_v48  ;;  %v722_v52 = vpop.f32.mrf.mxu1  ;;  %v720_v55 = vadd.f32 %v719_v32, %v576_v50 }
 0x131   : > { %v1527_v53 = vadd.f32 %v2175_v45, %v1487_v51 }
 0x132   : > { %v1051_v54 = vpop.f32.mrf.mxu2 }
 0x133   : > { %v1563_v56 = vmax.f32 %v1527_v53, 0.0  ;;  %v1113_v58 = vadd.f32 %v1051_v54, %v720_v55 }
 0x135   : > { %v1599_v57 = vpack.c.bf16 %v1563_v56, %v1563_v56 }
 0x136   : > { %v1426_v59 = vpop.f32.mrf.mxu3  ;;  %v579_v60 = vpop.f32.mrf.mxu0 }
 0x137   : > { %1636 = vst.msk [vmem:[%s2186_s14 + $0x48] sm:$0xf] %vm1617_vm5, %v1599_v57  ;;  %v1488_v62 = vadd.f32 %v1426_v59, %v1113_v58  ;;  %v723_v63 = vadd.f32 %v722_v52, %v579_v60  ;;  %v724_v0 = vpop.f32.mrf.mxu1 }
 0x139   : > { %v1528_v1 = vadd.f32 %v2175_v45, %v1488_v62 }
 0x13a   : > { %v1054_v2 = vpop.f32.mrf.mxu2 }
 0x13b   : > { %v1564_v61 = vmax.f32 %v1528_v1, 0.0  ;;  %v1114_v3 = vadd.f32 %v1054_v2, %v723_v63 }
 0x13d   : > { %v1600_v4 = vpack.c.bf16 %v1564_v61, %v1564_v61 }
 0x13e   : > { %v1429_v5 = vpop.f32.mrf.mxu3  ;;  %v581_v6 = vpop.f32.mrf.mxu0 }
 0x13f   : > { %1637 = vst.msk [vmem:[%s2186_s14 + $0x4c] sm:$0xf] %vm1617_vm5, %v1600_v4  ;;  %v1489_v7 = vadd.f32 %v1429_v5, %v1114_v3  ;;  %v727_v8 = vpop.f32.mrf.mxu1  ;;  %v725_v10 = vadd.f32 %v724_v0, %v581_v6 }
 0x141   : > { %v1529_v9 = vadd.f32 %v2175_v45, %v1489_v7 }
 0x142   : > { %v1056_v12 = vpop.f32.mrf.mxu2 }
 0x143   : > { %v1565_v11 = vmax.f32 %v1529_v9, 0.0  ;;  %v1115_v14 = vadd.f32 %v1056_v12, %v725_v10 }
 0x145   : > { %v1601_v13 = vpack.c.bf16 %v1565_v11, %v1565_v11 }
 0x146   : > { %v1431_v15 = vpop.f32.mrf.mxu3  ;;  %v584_v16 = vpop.f32.mrf.mxu0 }
 0x147   : > { %1638 = vst.msk [vmem:[%s2186_s14 + $0x50] sm:$0xf] %vm1617_vm5, %v1601_v13  ;;  %v1490_v17 = vadd.f32 %v1431_v15, %v1115_v14  ;;  %v728_v19 = vadd.f32 %v727_v8, %v584_v16  ;;  %v729_v18 = vpop.f32.mrf.mxu1 }
 0x149   : > { %v1530_v20 = vadd.f32 %v2175_v45, %v1490_v17 }
 0x14a   : > { %v1059_v21 = vpop.f32.mrf.mxu2 }
 0x14b   : > { %v1566_v22 = vmax.f32 %v1530_v20, 0.0  ;;  %v1116_v23 = vadd.f32 %v1059_v21, %v728_v19 }
 0x14d   : > { %v1602_v24 = vpack.c.bf16 %v1566_v22, %v1566_v22 }
 0x14e   : > { %v1434_v26 = vpop.f32.mrf.mxu3  ;;  %v586_v25 = vpop.f32.mrf.mxu0 }
 0x14f   : > { %1639 = vst.msk [vmem:[%s2186_s14 + $0x54] sm:$0xf] %vm1617_vm5, %v1602_v24  ;;  %v1491_v27 = vadd.f32 %v1434_v26, %v1116_v23  ;;  %v732_v28 = vpop.f32.mrf.mxu1  ;;  %v730_v30 = vadd.f32 %v729_v18, %v586_v25 }
 0x151   : > { %v1531_v29 = vadd.f32 %v2175_v45, %v1491_v27 }
 0x152   : > { %v1061_v31 = vpop.f32.mrf.mxu2 }
 0x153   : > { %v1567_v33 = vmax.f32 %v1531_v29, 0.0  ;;  %v1117_v35 = vadd.f32 %v1061_v31, %v730_v30 }
 0x155   : > { %v1603_v34 = vpack.c.bf16 %v1567_v33, %v1567_v33 }
 0x156   : > { %v1436_v36 = vpop.f32.mrf.mxu3  ;;  %v589_v37 = vpop.f32.mrf.mxu0 }
 0x157   : > { %1640 = vst.msk [vmem:[%s2186_s14 + $0x58] sm:$0xf] %vm1617_vm5, %v1603_v34  ;;  %v1492_v38 = vadd.f32 %v1436_v36, %v1117_v35  ;;  %v733_v39 = vadd.f32 %v732_v28, %v589_v37  ;;  %v734_v40 = vpop.f32.mrf.mxu1 }
 0x159   : > { %v1532_v41 = vadd.f32 %v2175_v45, %v1492_v38 }
 0x15a   : > { %v1064_v32 = vpop.f32.mrf.mxu2 }
 0x15b   : > { %v1568_v42 = vmax.f32 %v1532_v41, 0.0  ;;  %v1118_v43 = vadd.f32 %v1064_v32, %v733_v39 }
 0x15d   : > { %v1604_v44 = vpack.c.bf16 %v1568_v42, %v1568_v42 }
 0x15e   : > { %v1439_v46 = vpop.f32.mrf.mxu3  ;;  %v591_v48 = vpop.f32.mrf.mxu0 }
 0x15f   : > { %1641 = vst.msk [vmem:[%s2186_s14 + $0x5c] sm:$0xf] %vm1617_vm5, %v1604_v44  ;;  %v1493_v47 = vadd.f32 %v1439_v46, %v1118_v43  ;;  %v737_v49 = vpop.f32.mrf.mxu1  ;;  %v735_v51 = vadd.f32 %v734_v40, %v591_v48 }
 0x161   : > { %v1533_v50 = vadd.f32 %v2175_v45, %v1493_v47 }
 0x162   : > { %v1066_v52 = vpop.f32.mrf.mxu2 }
 0x163   : > { %v1569_v53 = vmax.f32 %v1533_v50, 0.0  ;;  %v1119_v54 = vadd.f32 %v1066_v52, %v735_v51 }
 0x165   : > { %v1605_v55 = vpack.c.bf16 %v1569_v53, %v1569_v53 }
 0x166   : > { %v1441_v56 = vpop.f32.mrf.mxu3  ;;  %v594_v57 = vpop.f32.mrf.mxu0 }
 0x167   : > { %1642 = vst.msk [vmem:[%s2186_s14 + $0x60] sm:$0xf] %vm1617_vm5, %v1605_v55  ;;  %v1494_v58 = vadd.f32 %v1441_v56, %v1119_v54  ;;  %v738_v59 = vadd.f32 %v737_v49, %v594_v57  ;;  %v739_v60 = vpop.f32.mrf.mxu1  ;;  %v2007_v57 = vld [vmem:[%s2448_s2] ss:$0 sm:$0xff] }
 0x169   : > { %v1534_v62 = vadd.f32 %v2175_v45, %v1494_v58 }
 0x16a   : > { %v1069_v63 = vpop.f32.mrf.mxu2 }
 0x16b   : > { %v1570_v0 = vmax.f32 %v1534_v62, 0.0  ;;  %v1120_v1 = vadd.f32 %v1069_v63, %v738_v59 }
 0x16d   : > { %v1606_v2 = vpack.c.bf16 %v1570_v0, %v1570_v0 }
 0x16e   : > { %v1444_v61 = vpop.f32.mrf.mxu3  ;;  %v596_v3 = vpop.f32.mrf.mxu0 }
 0x16f   : > { %1643 = vst.msk [vmem:[%s2186_s14 + $0x64] sm:$0xf] %vm1617_vm5, %v1606_v2  ;;  %v1495_v4 = vadd.f32 %v1444_v61, %v1120_v1  ;;  %v742_v5 = vpop.f32.mrf.mxu1  ;;  %v740_v7 = vadd.f32 %v739_v60, %v596_v3 }
 0x171   : > { %v1535_v6 = vadd.f32 %v2175_v45, %v1495_v4 }
 0x172   : > { %v1071_v8 = vpop.f32.mrf.mxu2 }
 0x173   : > { %v1571_v9 = vmax.f32 %v1535_v6, 0.0  ;;  %v1121_v12 = vadd.f32 %v1071_v8, %v740_v7 }
 0x175   : > { %v1607_v10 = vpack.c.bf16 %v1571_v9, %v1571_v9 }
 0x176   : > { %v1446_v11 = vpop.f32.mrf.mxu3  ;;  %v599_v13 = vpop.f32.mrf.mxu0 }
 0x177   : > { %1644 = vst.msk [vmem:[%s2186_s14 + $0x68] sm:$0xf] %vm1617_vm5, %v1607_v10  ;;  %v1496_v14 = vadd.f32 %v1446_v11, %v1121_v12  ;;  %v743_v15 = vadd.f32 %v742_v5, %v599_v13  ;;  %v744_v16 = vpop.f32.mrf.mxu1 }
 0x179   : > { %v1536_v17 = vadd.f32 %v2175_v45, %v1496_v14 }
 0x17a   : > { %v1074_v19 = vpop.f32.mrf.mxu2 }
 0x17b   : > { %v1572_v18 = vmax.f32 %v1536_v17, 0.0  ;;  %v1122_v20 = vadd.f32 %v1074_v19, %v743_v15 }
 0x17d   : > { %v1608_v21 = vpack.c.bf16 %v1572_v18, %v1572_v18 }
 0x17e   : > { %v1449_v22 = vpop.f32.mrf.mxu3  ;;  %v601_v23 = vpop.f32.mrf.mxu0 }
 0x17f   : > { %1645 = vst.msk [vmem:[%s2186_s14 + $0x6c] sm:$0xf] %vm1617_vm5, %v1608_v21  ;;  %v1497_v24 = vadd.f32 %v1449_v22, %v1122_v20  ;;  %v747_v26 = vpop.f32.mrf.mxu1  ;;  %v745_v27 = vadd.f32 %v744_v16, %v601_v23 }
 0x181   : > { %v1537_v25 = vadd.f32 %v2175_v45, %v1497_v24 }
 0x182   : > { %v1076_v28 = vpop.f32.mrf.mxu2 }
 0x183   : > { %v1573_v29 = vmax.f32 %v1537_v25, 0.0  ;;  %v1123_v31 = vadd.f32 %v1076_v28, %v745_v27 }
 0x185   : > { %v1609_v30 = vpack.c.bf16 %v1573_v29, %v1573_v29 }
 0x186   : > { %v1451_v33 = vpop.f32.mrf.mxu3  ;;  %v604_v34 = vpop.f32.mrf.mxu0 }
 0x187   : > { %1646 = vst.msk [vmem:[%s2186_s14 + $0x70] sm:$0xf] %vm1617_vm5, %v1609_v30  ;;  %v1498_v35 = vadd.f32 %v1451_v33, %v1123_v31  ;;  %v748_v36 = vadd.f32 %v747_v26, %v604_v34  ;;  %v749_v37 = vpop.f32.mrf.mxu1 }
 0x189   : > { %v1538_v38 = vadd.f32 %v2175_v45, %v1498_v35 }
 0x18a   : > { %v1079_v39 = vpop.f32.mrf.mxu2 }
 0x18b   : > { %v1574_v40 = vmax.f32 %v1538_v38, 0.0  ;;  %v1124_v41 = vadd.f32 %v1079_v39, %v748_v36 }
 0x18d   : > { %v1610_v32 = vpack.c.bf16 %v1574_v40, %v1574_v40 }
 0x18e   : > { %v1454_v42 = vpop.f32.mrf.mxu3  ;;  %v606_v43 = vpop.f32.mrf.mxu0 }
 0x18f   : > { %1647 = vst.msk [vmem:[%s2186_s14 + $0x74] sm:$0xf] %vm1617_vm5, %v1610_v32  ;;  %v1499_v44 = vadd.f32 %v1454_v42, %v1124_v41  ;;  %v750_v48 = vadd.f32 %v749_v37, %v606_v43  ;;  %v752_v47 = vpop.f32.mrf.mxu1 }
 0x191   : > { %v1539_v46 = vadd.f32 %v2175_v45, %v1499_v44 }
 0x192   : > { %v1081_v49 = vpop.f32.mrf.mxu2 }
 0x193   : > { %v1575_v50 = vmax.f32 %v1539_v46, 0.0  ;;  %v1125_v52 = vadd.f32 %v1081_v49, %v750_v48 }
 0x195   : > { %v1611_v51 = vpack.c.bf16 %v1575_v50, %v1575_v50 }
 0x196   : > { %v1456_v53 = vpop.f32.mrf.mxu3  ;;  %v609_v55 = vpop.f32.mrf.mxu0 }
 0x197   : > { %1648 = vst.msk [vmem:[%s2186_s14 + $0x78] sm:$0xf] %vm1617_vm5, %v1611_v51  ;;  %v1500_v54 = vadd.f32 %v1456_v53, %v1125_v52  ;;  %v753_v56 = vadd.f32 %v752_v47, %v609_v55  ;;  %v754_v60 = vpop.f32.mrf.mxu1 }
 0x199   : > { %v1540_v58 = vadd.f32 %v2007_v57, %v1500_v54 }
 0x19a   : > { %v1084_v59 = vpop.f32.mrf.mxu2 }
 0x19b   : > { %v1576_v45 = vmax.f32 %v1540_v58, 0.0  ;;  %v1126_v62 = vadd.f32 %v1084_v59, %v753_v56 }
 0x19d   : > { %v1612_v63 = vpack.c.bf16 %v1576_v45, %v1576_v45 }
 0x19e   : > { %v1459_v0 = vpop.f32.mrf.mxu3  ;;  %v611_v1 = vpop.f32.mrf.mxu0 }
 0x19f   : > { %1649 = vst.msk [vmem:[%s2186_s14 + $0x7c] sm:$0xf] %vm1617_vm5, %v1612_v63  ;;  %v1501_v2 = vadd.f32 %v1459_v0, %v1126_v62  ;;  %v755_v3 = vadd.f32 %v754_v60, %v611_v1  ;;  %v757_v7 = vpop.f32.mrf.mxu1 }
 0x1a1   : > { %v1541_v61 = vadd.f32 %v2007_v57, %v1501_v2 }
 0x1a2   : > { %v1086_v4 = vpop.f32.mrf.mxu2 }
 0x1a3   : > { %v1577_v5 = vmax.f32 %v1541_v61, 0.0  ;;  %v1127_v8 = vadd.f32 %v1086_v4, %v755_v3 }
 0x1a5   : > { %v1613_v6 = vpack.c.bf16 %v1577_v5, %v1577_v5 }
 0x1a6   : > { %v1461_v9 = vpop.f32.mrf.mxu3  ;;  %v614_v10 = vpop.f32.mrf.mxu0 }
 0x1a7   : > { %1650 = vst.msk [vmem:[%s2186_s14 + $0x80] sm:$0xf] %vm1617_vm5, %v1613_v6  ;;  %v1502_v12 = vadd.f32 %v1461_v9, %v1127_v8  ;;  %v758_v11 = vadd.f32 %v757_v7, %v614_v10  ;;  %v759_v21 = vpop.f32.mrf.mxu1 }
 0x1a9   : > { %v1542_v13 = vadd.f32 %v2007_v57, %v1502_v12 }
 0x1aa   : > { %v1089_v14 = vpop.f32.mrf.mxu2 }
 0x1ab   : > { %v1578_v15 = vmax.f32 %v1542_v13, 0.0  ;;  %v1128_v16 = vadd.f32 %v1089_v14, %v758_v11 }
 0x1ad   : > { %v1614_v17 = vpack.c.bf16 %v1578_v15, %v1578_v15 }
 0x1ae   : > { %v1464_v19 = vpop.f32.mrf.mxu3  ;;  %v616_v18 = vpop.f32.mrf.mxu0 }
 0x1af   : > { %1651 = vst.msk [vmem:[%s2186_s14 + $0x84] sm:$0xf] %vm1617_vm5, %v1614_v17  ;;  %v1503_v20 = vadd.f32 %v1464_v19, %v1128_v16  ;;  %v760_v23 = vadd.f32 %v759_v21, %v616_v18 }
 0x1b1   : > { %v1543_v22 = vadd.f32 %v2007_v57, %v1503_v20 }
 0x1b2   : > { %v1091_v24 = vpop.f32.mrf.mxu2 }
 0x1b3   : > { %v1579_v26 = vmax.f32 %v1543_v22, 0.0  ;;  %v1129_v27 = vadd.f32 %v1091_v24, %v760_v23 }
 0x1b5   : > { %v1615_v25 = vpack.c.bf16 %v1579_v26, %v1579_v26 }
 0x1b6   : > { %v1466_v28 = vpop.f32.mrf.mxu3 }
 0x1b7   : > { %1652 = vst.msk [vmem:[%s2186_s14 + $0x88] sm:$0xf] %vm1617_vm5, %v1615_v25  ;;  %v1504_v29 = vadd.f32 %v1466_v28, %v1129_v27 }
 0x1b9   : > { %v1544_v30 = vadd.f32 %v2007_v57, %v1504_v29 }
 0x1bb   : > { %v1580_v31 = vmax.f32 %v1544_v30, 0.0 }
 0x1bd   : > { %v1616_v33 = vpack.c.bf16 %v1580_v31, %v1580_v31 }
 0x1bf   : > { %1653 = vst.msk [vmem:[%s2186_s14 + $0x8c] sm:$0xf] %vm1617_vm5, %v1616_v33 }
 0x1c0 PF: > { %s13_s12 = sadd.s32 1, %s2014_s12  }
 0x1c1   : > { %p10_p4 = scmp.ge.s32.totalorder %s13_s12, 4  }
 0x1c3   :  { %12 = sbr.rel (!%p10_p4) target bundleno = 1 (0x1), region = 65 }

// kernel: model_forward.4
= control target key start
LH: loop header
LB: loop body
LE: loop exit
PB: predicated region body
PF: predicated region fallthrough
CT: control target
= control target key end

     0   :  { %s3041_s30 = smov 0   ;;  %s3839_s0 = inlined_call_operand.vmem [shape: bf16[2,100,64], index: 0, kind: input, shape index: {}]   ;;  %s3840_s1 = inlined_call_operand.vmem [shape: f32[80,1], index: 1, kind: input, shape index: {}]   ;;  %s3841_s2 = inlined_call_operand.vmem [shape: bf16[4,64,32], index: 2, kind: input, shape index: {}]   ;;  %s3842_s3 = inlined_call_operand.vmem [shape: f32[1,32], index: 3, kind: input, shape index: {}]   ;;  %s3843_s4 = inlined_call_operand.vmem [shape: bf16[9,32,32], index: 4, kind: input, shape index: {}]   ;;  %s3844_s5 = inlined_call_operand.vmem [shape: f32[1,32], index: 5, kind: input, shape index: {}]   ;;  %s3845_s6 = inlined_call_operand.vmem [shape: bf16[32,7], index: 6, kind: input, shape index: {}]   ;;  %s3846_s7 = inlined_call_operand.vmem [shape: f32[1,7], index: 7, kind: input, shape index: {}]   ;;  %s3847_s8 = inlined_call_operand.vmem [shape: bf16[2,90,32], index: 8, kind: output, shape index: {0}]   ;;  %s3848_s9 = inlined_call_operand.vmem [shape: f32[2,80,7], index: 9, kind: output, shape index: {1}]  }
   0x1 LB: > { %s2523_s10 = sadd.s32 4294967295, %s2988_s30   ;;  %p2527_p0 = scmp.ge.s32.totalorder %s2988_s30, 1  ;;  %s2988_s30 = sphi %s3041_s30, %s20_s30  }
   0x2   : > { %p290_p1 = scmp.lt.s32.totalorder %s2988_s30, 3 }
   0x4   : > { %p291_p2 = pnand %p2527_p0, %p290_p1 }
   0x5   : > { %p331_p3 = scmp.lt.s32.totalorder (!%p291_p2), %s2523_s10, 1 }
   0x6   : > { %294 = sbr.rel (%p291_p2) target bundleno = 750 (0x2ee), region = 52 }
   0xb   : > { %v2903_v0 = vld [vmem:[%s3841_s2 + $0x38] sm:$0xff]  ;;  %v2902_v2 = vld [vmem:[%s3841_s2 + $0x30] sm:$0xff]  ;;  %s3854_s10 = smov (!%p331_p3, %s2523_s10), 1  ;;  %v2901_v4 = vld [vmem:[%s3841_s2 + $0x28] sm:$0xff]  ;;  %vm413_vm0 = vsmask.f32 7424 }
   0xc   : > { %v2899_v1 = vld [vmem:[%s3841_s2 + $0x18] sm:$0xff]  ;;  %2956 = vmatpush.bf16.msra.mxu2 %v2903_v0  ;;  %v2898_v3 = vld [vmem:[%s3841_s2 + $0x10] sm:$0xff]  ;;  %502 = vmatpush.bf16.msra.mxu0 %v2903_v0  ;;  %s2964_s19 = smul.u32 52, %s3854_s10  ;;  %v2897_v5 = vld [vmem:[%s3841_s2 + $0x8] sm:$0xff]  ;;  %vm482_vm1 = vcmask 523264   ;;  %v2990_v33 = vmov 0  }
   0xd   : > { %2960 = vmatpush.bf16.msra.mxu3 %v2899_v1  ;;  %570 = vmatpush.bf16.msra.mxu1 %v2899_v1  ;;  %v2900_v13 = vld [vmem:[%s3841_s2 + $0x20] sm:$0xff]  ;;  %v2912_v20 = vld [vmem:[%s3841_s2 + $0x58] sm:$0xff]  ;;  %v2911_v29 = vld [vmem:[%s3841_s2 + $0x50] sm:$0xff]  ;;  %vm648_vm2 = vcmask 1046528   ;;  %vm756_vm3 = vsmask.f32 6400 }
   0xe   : > { %s3073_s26 = scalar_lea.vmem %s3839_s0, %s2964_s19  ;;  %v2896_v14 = vld [vmem:[%s3841_s2] sm:$0xff]  ;;  %v2916_v21 = vld [vmem:[%s3841_s2 + $0x78] sm:$0xff]  ;;  %v2915_v30 = vld [vmem:[%s3841_s2 + $0x70] sm:$0xff]  ;;  %2976 = vset.pattern.permute.xlu0 %v2990_v33  ;;  %2977 = vset.pattern.permute.xlu1 %v2990_v33  ;;  %vm977_vm4 = vcmask 257024   ;;  %vm1116_vm5 = vcmask 257025   ;;  %vm1240_vm11 = vcmask 261120  }
   0xf   : > { %v2894_v6 = vld [vmem:[%s3073_s26 + $0x18] sm:$0xff]  ;;  %v3077_v7 = vld [vmem:[%s3073_s26 + $0x20] sm:$0xff]  ;;  %v3081_v9 = vld [vmem:[%s3073_s26 + $0x8] sm:$0xff]  ;;  %2978 = vset.pattern.permute.xlu2 %v2990_v33  ;;  %979 = vst.msk [vmem:[#allocation2 + $0x4] sm:$0xf] %vm977_vm4, %v2990_v33  ;;  %vm2057_vm12 = vcmask 1044480  }
  0x10   : > { %2957 = vmatpush.bf16.msra.mxu2 %v2902_v2  ;;  %503 = vmatpush.bf16.msra.mxu0 %v2902_v2  ;;  %v2891_v8 = vld [vmem:[%s3073_s26] sm:$0xff]  ;;  %v438_v10 = vshll.u32 %v2894_v6, 16  ;;  %v442_v11 = vshrl.u32 %v2894_v6, 16  ;;  %v446_v12 = vshll.u32 %v3077_v7, 16  ;;  %v422_v17 = vshll.u32 %v3081_v9, 16  ;;  %v2910_v35 = vld [vmem:[%s3841_s2 + $0x48] sm:$0xff] }
  0x11   : > { %2961 = vmatpush.bf16.msra.mxu3 %v2898_v3  ;;  %571 = vmatpush.bf16.msra.mxu1 %v2898_v3  ;;  %v415_v15 = vshrl.u32 %v2891_v8, 16  ;;  %v417_v16 = vshll.u32 %v2891_v8, 16  ;;  %v375_v22 = vld [vmem:[%s3073_s26 + $0x28] sm:$0x1]  ;;  %v347_v34 = vld [vmem:[%s3840_s1] sm:$0xff]  ;;  %v2893_v37 = vld [vmem:[%s3073_s26 + $0x10] sm:$0xff] }
  0x12   : > { %v3091_v18 = vrot.slane %v438_v10, 1  ;;  %v448_v19 = vrot.slane %v446_v12, 1  ;;  %v424_v25 = vrot.slane %v422_v17, 1  ;;  %v406_v26 = vunpack.c.l.b16 %v375_v22  ;;  %v2914_v36 = vld [vmem:[%s3841_s2 + $0x68] sm:$0xff]  ;;  %919 = vperm.xlu0 %2976, %v347_v34   ;;  %v2909_v40 = vld [vmem:[%s3841_s2 + $0x40] sm:$0xff]  ;;  %v349_v55 = vld [vmem:[%s3840_s1 + $0x10] sm:$0xff] }
  0x13   : > { %v419_v23 = vrot.slane %v417_v16, 1  ;;  %v450_v38 = vshrl.u32 %v3077_v7, 16  ;;  %v2913_v41 = vld [vmem:[%s3841_s2 + $0x60] sm:$0xff]  ;;  %v426_v42 = vshrl.u32 %v3081_v9, 16  ;;  %v430_v43 = vshll.u32 %v2893_v37, 16  ;;  %v348_v46 = vld [vmem:[%s3840_s1 + $0x8] sm:$0xff]  ;;  %929 = vperm.xlu1 %2977, %v349_v55  }
  0x14   : > { %2958 = vmatpush.bf16.msra.mxu2 %v2901_v4  ;;  %504 = vmatpush.bf16.msra.mxu0 %v2901_v4  ;;  %v444_v24 = vor.u32 %v442_v11, %v3091_v18  ;;  %v412_v32 = vpack.c.b16 %v406_v26, %v406_v26  ;;  %v2611_v47 = vld [vmem:[%s3073_s26 + $0x4] sm:$0xe]  ;;  %v2904_v48 = vld [vmem:[%s3073_s26 + $0x4] sm:$0xf0]  ;;  %v2905_v52 = vld [vmem:[%s3073_s26 + $0xc] sm:$0xff]  ;;  %v434_v1 = vshrl.u32 %v2893_v37, 16 }
  0x15   : > { %2962 = vmatpush.bf16.msra.mxu3 %v2897_v5  ;;  %572 = vmatpush.bf16.msra.mxu1 %v2897_v5  ;;  %v420_v27 = vor.u32 %v419_v23, %v415_v15  ;;  %v452_v44 = vor.u32 %v450_v38, %v448_v19  ;;  %v428_v49 = vor.u32 %v426_v42, %v424_v25  ;;  %v432_v50 = vrot.slane %v430_v43, 1  ;;  %v353_v60 = vld [vmem:[%s3840_s1 + $0x30] sm:$0xff]  ;;  %v350_v12 = vld [vmem:[%s3840_s1 + $0x18] sm:$0xff]  ;;  %v743_v38 = vld [vmem:[%s3073_s26 + $0x2c] sm:$0x3]  ;;  %s2966_s23 = smul.u32 80, %s3854_s10 }
  0x16   : > { %v449_v28 = vsel %vm413_vm0, %v444_v24, %v448_v19  ;;  %v454_v39 = vshll.u32 %v412_v32, 16  ;;  %v2612_v53 = vor.u32 %v2904_v48, %v2611_v47  ;;  %v766_v58 = vshrl.u32 %v2905_v52, 16  ;;  %v2906_v10 = vld [vmem:[%s3073_s26 + $0x14] sm:$0xff]  ;;  %v2907_v22 = vld [vmem:[%s3073_s26 + $0x1c] sm:$0xff]  ;;  %978 = vst.msk [vmem:[#allocation2] sm:$0xf] %vm977_vm4, %v2990_v33 }
  0x17   : > { %v425_v31 = vsel %vm413_vm0, %v420_v27, %v424_v25  ;;  %v433_v54 = vsel %vm413_vm0, %v428_v49, %v432_v50  ;;  %v769_v59 = vshll.u32 %v2905_v52, 16  ;;  %v650_v3 = vrot.slane %v2905_v52, 1  ;;  %v354_v17 = vld [vmem:[%s3840_s1 + $0x38] sm:$0xff]  ;;  %v351_v32 = vld [vmem:[%s3840_s1 + $0x20] sm:$0xff]  ;;  %980 = vst.msk [vmem:[#allocation2 + $0x8] sm:$0xf] %vm977_vm4, %v2990_v33  ;;  %s3814_s29 = scalar_lea.vmem %s3848_s9, %s2966_s23 }
  0x18   : > { %2959 = vmatpush.bf16.msra.mxu2 %v2900_v13  ;;  %505 = vmatpush.bf16.msra.mxu0 %v2900_v13  ;;  %v456_v45 = vrot.slane %v454_v39, 1  ;;  %v758_v56 = vshrl.u32 %v2612_v53, 16  ;;  %v761_v57 = vshll.u32 %v2612_v53, 16  ;;  %v768_v63 = vrot.slane %v766_v58, 1  ;;  %v352_v39 = vld [vmem:[%s3840_s1 + $0x28] sm:$0xff]  ;;  %v355_v47 = vld [vmem:[%s3840_s1 + $0x40] sm:$0xff] }
  0x19   : > { %2963 = vmatpush.bf16.msra.mxu3 %v2896_v14  ;;  %573 = vmatpush.bf16.msra.mxu1 %v2896_v14  ;;  %v771_v0 = vrot.slane %v769_v59, 2  ;;  %v649_v2 = vrot.slane %v2612_v53, 1  ;;  %v775_v13 = vshrl.u32 %v2906_v10, 16  ;;  %v778_v14 = vshll.u32 %v2906_v10, 16  ;;  %981 = vst.msk [vmem:[#allocation2 + $0xc] sm:$0xf] %vm977_vm4, %v2990_v33 }
  0x1a   : > { %924 = vperm.xlu0 %2976, %v348_v46   ;;  %v457_v51 = vsel %vm413_vm0, %v452_v44, %v456_v45  ;;  %v760_v61 = vrot.slane %v758_v56, 1  ;;  %v763_v62 = vrot.slane %v761_v57, 2  ;;  %v652_v19 = vrot.slane %v2906_v10, 1  ;;  %939 = vperm.xlu2 %2978, %v351_v32   ;;  %v610_v46 = vld [vmem:[%s3073_s26 + $0x2c] sm:$0x1]  ;;  %v2923_v32 = vld [vmem:[%s3843_s4 + $0x10] sm:$0xff] }
  0x1b   : > { %2578 = vmatmul.msk.bf16.vlgmr.msra.gmra.mxu2 %vm482_vm1, %v449_v28  ;;  %2575 = vmatmul.msk.bf16.vlgmr.msra.gmra.mxu0 %vm482_vm1, %v425_v31  ;;  %v772_v5 = vor.u32 %v771_v0, %v768_v63  ;;  %v777_v15 = vrot.slane %v775_v13, 1  ;;  %v780_v16 = vrot.slane %v778_v14, 2  ;;  %v784_v23 = vshrl.u32 %v2907_v22, 16  ;;  %v2908_v31 = vld [vmem:[%s3073_s26 + $0x24] sm:$0xff]  ;;  %982 = vst.msk [vmem:[#allocation2 + $0x10] sm:$0xf] %vm977_vm4, %v2990_v33 }
  0x1c   : > { %703 = vmatpush.bf16.msrb.mxu2 %v2912_v20  ;;  %2599 = vmatmul.msk.bf16.vlgmr.msra.gmra.mxu3 %vm482_vm1, %v2894_v6  ;;  %v764_v4 = vor.u32 %v763_v62, %v760_v61  ;;  %v356_v6 = vld [vmem:[%s3840_s1 + $0x48] sm:$0xff]  ;;  %v653_v20 = vsel %vm648_vm2, %v650_v3, %v652_v19  ;;  %v787_v24 = vshll.u32 %v2907_v22, 16  ;;  %v654_v27 = vrot.slane %v2907_v22, 1  ;;  %983 = vst.msk [vmem:[#allocation2 + $0x14] sm:$0xf] %vm977_vm4, %v2990_v33  ;;  %s2965_s26 = smul.u32 48, %s3854_s10 }
  0x1d   : > { %853 = vmatpush.bf16.msrb.mxu3 %v2916_v21  ;;  %2596 = vmatmul.msk.bf16.vlgmr.msra.gmra.mxu1 %vm482_vm1, %v2891_v8  ;;  %v651_v8 = vsel %vm648_vm2, %v649_v2, %v650_v3  ;;  %v786_v25 = vrot.slane %v784_v23, 1  ;;  %v793_v34 = vshrl.u32 %v2908_v31, 16  ;;  %v754_v42 = vunpack.c.l.b16 %v743_v38  ;;  %984 = vst.msk [vmem:[#allocation2 + $0x18] sm:$0xf] %vm977_vm4, %v2990_v33  ;;  %v2926_v23 = vld [vmem:[%s3843_s4 + $0x28] sm:$0xff] }
  0x1e   : > { %934 = vperm.xlu1 %2977, %v350_v12   ;;  %v789_v26 = vrot.slane %v787_v24, 2  ;;  %v641_v48 = vunpack.c.l.b16 %v610_v46  ;;  %985 = vst.msk [vmem:[#allocation2 + $0x1c] sm:$0xf] %vm977_vm4, %v2990_v33  ;;  %s3236_s16 = scalar_lea.vmem %s3847_s8, %s2965_s26  ;;  %vm1117_vm6 = vsmask.f32 7942  ;;  %vm1131_vm13 = vcmask 254976  }
  0x1f   : > { %v755_v45 = vpack.c.b16 %v754_v42, %v754_v42  ;;  %986 = vst.msk [vmem:[#allocation2 + $0x20] sm:$0xf] %vm977_vm4, %v2990_v33  ;;  %vm1118_vm7 = vmand %vm1116_vm5, %vm1117_vm6  ;;  %vm1003_vm8 = vsmask.f32 1280  ;;  %vm1004_vm9 = vsmask.f32 5392 }
  0x20   : > { %704 = vmatpush.bf16.msrb.mxu2 %v2911_v29  ;;  %v790_v28 = vor.u32 %v789_v26, %v786_v25  ;;  %v655_v29 = vsel %vm648_vm2, %v652_v19, %v654_v27  ;;  %987 = vst.msk [vmem:[#allocation2 + $0x24] sm:$0xf] %vm977_vm4, %v2990_v33  ;;  %vm3328_vm10 = vmor %vm1003_vm8, %vm1004_vm9  ;;  %vm1705_vm15 = vcmask 1045504   ;;  %vm2302_vm5 = vsmask.f32 4368 }
  0x21   : > { %854 = vmatpush.bf16.msrb.mxu3 %v2915_v30  ;;  %v802_v49 = vshrl.u32 %v755_v45, 16  ;;  %988 = vst.msk [vmem:[#allocation2 + $0x28] sm:$0xf] %vm977_vm4, %v2990_v33  ;;  %vm1132_vm14 = vmand %vm1131_vm13, %vm1003_vm8  ;;  %vm2424_vm9 = vcmask 56320  }
  0x22   : > { %949 = vperm.xlu0 %2976, %v353_v60   ;;  %944 = vperm.xlu2 %2978, %v352_v39   ;;  %989 = vst.msk [vmem:[#allocation2 + $0x2c] sm:$0xf] %vm977_vm4, %v2990_v33 }
  0x23   : > { %v804_v52 = vrot.slane %v802_v49, 1  ;;  %990 = vst.msk [vmem:[#allocation2 + $0x30] sm:$0xf] %vm977_vm4, %v2990_v33 }
  0x24   : > { %705 = vmatpush.bf16.msrb.mxu2 %v2910_v35  ;;  %v796_v35 = vshll.u32 %v2908_v31, 16  ;;  %2288 = vst.msk [vmem:[%s3236_s16] sm:$0xf] %vm977_vm4, %v2990_v33 }
  0x25   : > { %855 = vmatpush.bf16.msrb.mxu3 %v2914_v36  ;;  %v795_v36 = vrot.slane %v793_v34, 1  ;;  %2289 = vst.msk [vmem:[%s3236_s16 + $0x4] sm:$0xf] %vm977_vm4, %v2990_v33 }
  0x26   : > { %954 = vperm.xlu1 %2977, %v354_v17   ;;  %2290 = vst.msk [vmem:[%s3236_s16 + $0x8] sm:$0xf] %vm977_vm4, %v2990_v33 }
  0x27   : > { %2291 = vst.msk [vmem:[%s3236_s16 + $0xc] sm:$0xf] %vm977_vm4, %v2990_v33 }
  0x28   : > { %706 = vmatpush.bf16.msrb.mxu2 %v2909_v40  ;;  %v656_v40 = vrot.slane %v2908_v31, 1  ;;  %2292 = vst.msk [vmem:[%s3236_s16 + $0x10] sm:$0xf] %vm977_vm4, %v2990_v33 }
  0x29   : > { %856 = vmatpush.bf16.msrb.mxu3 %v2913_v41  ;;  %2293 = vst.msk [vmem:[%s3236_s16 + $0x14] sm:$0xf] %vm977_vm4, %v2990_v33 }
  0x2a   : > { %964 = vperm.xlu0 %2976, %v356_v6   ;;  %v657_v43 = vsel %vm648_vm2, %v654_v27, %v656_v40  ;;  %959 = vperm.xlu2 %2978, %v355_v47   ;;  %v2921_v6 = vld [vmem:[%s3843_s4] sm:$0xff]  ;;  %2294 = vst.msk [vmem:[%s3236_s16 + $0x18] sm:$0xf] %vm977_vm4, %v2990_v33 }
  0x2b   : > { %2579 = vmatmul.msk.bf16.gmra.mxu2 %vm482_vm1, %v457_v51  ;;  %2576 = vmatmul.msk.bf16.gmra.mxu0 %vm482_vm1, %v433_v54  ;;  %v647_v51 = vpack.c.b16 %v641_v48, %v641_v48  ;;  %2295 = vst.msk [vmem:[%s3236_s16 + $0x1c] sm:$0xf] %vm977_vm4, %v2990_v33 }
  0x2c   : > { %2600 = vmatmul.msk.bf16.gmra.mxu3 %vm482_vm1, %v3077_v7  ;;  %v436_v7 = vor.u32 %v434_v1, %v432_v50  ;;  %v805_v50 = vshll.u32 %v755_v45, 16  ;;  %2296 = vst.msk [vmem:[%s3236_s16 + $0x20] sm:$0xf] %vm977_vm4, %v2990_v33  ;;  %1399 = vmatpush.bf16.msra.mxu2 %v2926_v23 }
  0x2d   : > { %2597 = vmatmul.msk.bf16.gmra.mxu1 %vm482_vm1, %v3081_v9  ;;  %v773_v9 = vsel %vm756_vm3, %v764_v4, %v772_v5  ;;  %v658_v54 = vrot.slane %v647_v51, 1  ;;  %v2922_v4 = vld [vmem:[%s3843_s4 + $0x8] sm:$0xff]  ;;  %2297 = vst.msk [vmem:[%s3236_s16 + $0x24] sm:$0xf] %vm977_vm4, %v2990_v33 }
  0x2e   : > { %v441_v11 = vsel %vm413_vm0, %v436_v7, %v3091_v18  ;;  %v781_v18 = vor.u32 %v780_v16, %v777_v15  ;;  %v807_v53 = vrot.slane %v805_v50, 2  ;;  %1318 = vmatpush.bf16.msrb.mxu1 %v2922_v4  ;;  %v3287_v15 = vld [vmem:[%s3842_s3] ss:$0 sm:$0xff]  ;;  %2298 = vst.msk [vmem:[%s3236_s16 + $0x28] sm:$0xf] %vm977_vm4, %v2990_v33 }
  0x2f   : > { %v659_v56 = vsel %vm648_vm2, %v656_v40, %v658_v54 }
  0x30   : > { %v782_v21 = vsel %vm756_vm3, %v772_v5, %v781_v18  ;;  %v791_v30 = vsel %vm756_vm3, %v781_v18, %v790_v28  ;;  %v808_v55 = vor.u32 %v807_v53, %v804_v52  ;;  %v2924_v5 = vld [vmem:[%s3843_s4 + $0x18] sm:$0xff]  ;;  %v2931_v53 = vld [vmem:[%s3843_s4 + $0x30] sm:$0xff] }
  0x31   : > { %1262 = vmatpush.bf16.msrb.mxu0 %v2924_v5 }
  0x32   : > { %1319 = vmatpush.bf16.msrb.mxu1 %v2921_v6 }
  0x35   : > { %1263 = vmatpush.bf16.msrb.mxu0 %v2923_v32 }
  0x3b   : > { %2645 = vmatmul.msk.bf16.vlgmr.msrb.gmra.mxu2 %vm482_vm1, %v651_v8  ;;  %2577 = vmatmul.msk.bf16.gmra.mxu0 %vm482_vm1, %v441_v11 }
  0x3c   : > { %2674 = vmatmul.msk.bf16.vlgmr.msrb.gmra.mxu3 %vm482_vm1, %v773_v9 }
  0x3d   : > { %2598 = vmatmul.msk.bf16.gmra.mxu1 %vm482_vm1, %v2893_v37  ;;  %v798_v37 = vrot.slane %v796_v35, 2 }
  0x3f   : > { %v799_v41 = vor.u32 %v798_v37, %v795_v36 }
  0x41   : > { %v800_v44 = vsel %vm756_vm3, %v790_v28, %v799_v41  ;;  %v809_v57 = vsel %vm756_vm3, %v799_v41, %v808_v55 }
  0x4b   : > { %2646 = vmatmul.msk.bf16.gmra.mxu2 %vm482_vm1, %v653_v20 }
  0x4c   : > { %2675 = vmatmul.msk.bf16.gmra.mxu3 %vm482_vm1, %v782_v21 }
  0x5b   : > { %2647 = vmatmul.msk.bf16.gmra.mxu2 %vm482_vm1, %v655_v29 }
  0x5c   : > { %2676 = vmatmul.msk.bf16.gmra.mxu3 %vm482_vm1, %v791_v30  ;;  %v2925_v30 = vld [vmem:[%s3843_s4 + $0x20] sm:$0xff] }
  0x5d   : > { %1400 = vmatpush.bf16.msra.mxu2 %v2925_v30 }
  0x6b   : > { %2648 = vmatmul.msk.bf16.gmra.mxu2 %vm482_vm1, %v657_v43  ;;  %v2932_v43 = vld [vmem:[%s3843_s4 + $0x38] sm:$0xff] }
  0x6c   : > { %2677 = vmatmul.msk.bf16.gmra.mxu3 %vm482_vm1, %v800_v44  ;;  %v1119_v44 = vld [vmem:[#allocation2 + $0x4] sm:$0xe] }
  0x6d   : > { %1525 = vmatpush.bf16.msra.mxu3 %v2932_v43 }
  0x71   : > { %1526 = vmatpush.bf16.msra.mxu3 %v2931_v53 }
  0x7b   : > { %2649 = vmatmul.msk.bf16.gmra.mxu2 %vm482_vm1, %v659_v56 }
  0x7c   : > { %2678 = vmatmul.msk.bf16.gmra.mxu3 %vm482_vm1, %v809_v57  ;;  %vm2405_vm1 = vsmask.f32 7938 }
  0x84   : > { %v3292_v17 = vpop.permute.xlu0 %919 }
  0x85   : > { %v3324_v54 = vpop.permute.xlu1 %929 }
  0x8c   : > { %v3310_v37 = vpop.permute.xlu0 %924 }
  0x90   : > { %v3345_v23 = vpop.permute.xlu1 %934 }
  0x98   : > { %v507_v2 = vpop.f32.mrf.mxu0 }
  0x9a   : > { %v575_v3 = vpop.f32.mrf.mxu1 }
  0x9b   : > { %v576_v11 = vadd.f32 %v575_v3, %v507_v2 }
  0x9e   : > { %v522_v58 = vpop.f32.mrf.mxu2 }
  0x9f   : > { %v590_v59 = vpop.f32.mrf.mxu3 }
  0xa0   : > { %v3201_v60 = vadd.f32 %v590_v59, %v522_v58  ;;  %v509_v9 = vpop.f32.mrf.mxu0 }
  0xa2   : > { %v577_v10 = vpop.f32.mrf.mxu1 }
  0xa3   : > { %v578_v21 = vadd.f32 %v577_v10, %v509_v9 }
  0xa6   : > { %v3203_v61 = vpop.f32.mrf.mxu2 }
  0xa7   : > { %v3205_v62 = vpop.f32.mrf.mxu3 }
  0xa8   : > { %v512_v18 = vpop.f32.mrf.mxu0 }
  0xaa   : > { %v580_v20 = vpop.f32.mrf.mxu1 }
  0xab   : > { %v581_v31 = vadd.f32 %v580_v20, %v512_v18 }
  0xae   : > { %v527_v63 = vpop.f32.mrf.mxu2 }
  0xaf   : > { %v595_v0 = vpop.f32.mrf.mxu3 }
  0xb0   : > { %v3222_v1 = vadd.f32 %v595_v0, %v527_v63  ;;  %v514_v41 = vpop.f32.mrf.mxu0 }
  0xb2   : > { %v582_v42 = vpop.f32.mrf.mxu1 }
  0xb3   : > { %v583_v63 = vadd.f32 %v582_v42, %v514_v41  ;;  %v2934_v41 = vld [vmem:[%s3843_s4 + $0x48] sm:$0xff]  ;;  %v3358_v42 = vpop.permute.xlu2 %939 }
  0xb4   : > { %1658 = vmatpush.bf16.msra.mxu0 %v2934_v41 }
  0xb6   : > { %v3253_v7 = vpop.f32.mrf.mxu2 }
  0xb7   : > { %v3255_v8 = vpop.f32.mrf.mxu3 }
  0xbe   : > { %v708_v12 = vpop.f32.mrf.mxu2 }
  0xbf   : > { %v858_v13 = vpop.f32.mrf.mxu3  ;;  %v733_v14 = vadd.f32 %v708_v12, %v576_v11  ;;  %v517_v11 = vpop.f32.mrf.mxu0 }
  0xc0   : > { %v585_v12 = vpop.f32.mrf.mxu1 }
  0xc1   : > { %v883_v16 = vadd.f32 %v858_v13, %v733_v14 }
  0xc3   : > { %v897_v19 = vadd.f32 %v3287_v15, %v883_v16 }
  0xc5   : > { %v907_v22 = vmax.f32 %v897_v19, 0.0 }
  0xc6   : > { %v710_v24 = vpop.f32.mrf.mxu2 }
  0xc7   : > { %v860_v25 = vpop.f32.mrf.mxu3  ;;  %v3299_v26 = vmul.f32 %v3292_v17, %v907_v22  ;;  %v734_v27 = vadd.f32 %v710_v24, %v578_v21  ;;  %v586_v21 = vadd.f32 %v585_v12, %v517_v11 }
  0xc9   : > { %v993_v28 = vpack.c.bf16 %v3299_v26, %v3299_v26  ;;  %v884_v29 = vadd.f32 %v860_v25, %v734_v27 }
  0xcb   : > { %v1007_v34 = vshrl.u32 %v993_v28, 16  ;;  %v1010_v35 = vshll.u32 %v993_v28, 16  ;;  %v898_v36 = vadd.f32 %v3287_v15, %v884_v29 }
  0xcd   : > { %v1009_v38 = vrot.slane %v1007_v34, 6  ;;  %v1012_v39 = vrot.slane %v1010_v35, 7  ;;  %v908_v40 = vmax.f32 %v898_v36, 0.0 }
  0xce   : > { %v713_v45 = vpop.f32.mrf.mxu2 }
  0xcf   : > { %v863_v46 = vpop.f32.mrf.mxu3  ;;  %v1013_v47 = vor.u32 %v1012_v39, %v1009_v38  ;;  %v3317_v48 = vmul.f32 %v3310_v37, %v908_v40  ;;  %v735_v49 = vadd.f32 %v713_v45, %v581_v31  ;;  %v519_v39 = vpop.f32.mrf.mxu0 }
  0xd0   : > { %v587_v40 = vpop.f32.mrf.mxu1 }
  0xd1   : > { %v1120_v50 = vsel %vm1118_vm7, %v1013_v47, %v1119_v44  ;;  %v994_v51 = vpack.c.bf16 %v3317_v48, %v3317_v48  ;;  %v885_v52 = vadd.f32 %v863_v46, %v735_v49  ;;  %v1014_v5 = vrot.slane %v1013_v47, 4  ;;  %v2954_v47 = vld [vmem:[#allocation2] sm:$0xe] }
  0xd2   : > { %1121 = vst [vmem:[#allocation2 + $0x4] sm:$0xe] %v1120_v50  ;;  %vm2299_vm7 = vcmask 253952  }
  0xd3   : > { %v1016_v55 = vshrl.u32 %v994_v51, 16  ;;  %v1019_v56 = vshll.u32 %v994_v51, 16  ;;  %v899_v57 = vadd.f32 %v3287_v15, %v885_v52  ;;  %v588_v51 = vadd.f32 %v587_v40, %v519_v39  ;;  %2300 = vst.msk [vmem:[%s3236_s16 + $0x2c] sm:$0x1] %vm2299_vm7, %v2990_v33 }
  0xd5   : > { %v1018_v58 = vrot.slane %v1016_v55, 6  ;;  %v1021_v59 = vrot.slane %v1019_v56, 7  ;;  %v909_v0 = vmax.f32 %v899_v57, 0.0 }
  0xd6   : > { %v715_v3 = vpop.f32.mrf.mxu2 }
  0xd7   : > { %v865_v4 = vpop.f32.mrf.mxu3  ;;  %v1022_v6 = vor.u32 %v1021_v59, %v1018_v58  ;;  %v3333_v9 = vmul.f32 %v3324_v54, %v909_v0  ;;  %v736_v10 = vadd.f32 %v715_v3, %v583_v63 }
  0xd9   : > { %v1023_v13 = vsel %vm3328_vm10, %v1014_v5, %v1022_v6  ;;  %v995_v14 = vpack.c.bf16 %v3333_v9, %v3333_v9  ;;  %v886_v16 = vadd.f32 %v865_v4, %v736_v10  ;;  %v3339_v19 = vld [vmem:[#allocation2] sm:$0xff]   ;;  %v1024_v30 = vrot.slane %v1022_v6, 4 }
  0xda   : > { %1122 = vst.msk [vmem:[#allocation2 + $0x8] sm:$0xf] %vm977_vm4, %v1023_v13  ;;  %2720 = vmatmul.msk.bf16.vlgmr.msrb.gmra.mxu1 %vm1240_vm11, %v3339_v19  ;;  %v2953_v46 = vld [vmem:[#allocation2] sm:$0xf0]  ;;  %v1187_v53 = vshll.u32 %v3339_v19, 16 }
  0xdb   : > { %v1026_v18 = vshrl.u32 %v995_v14, 16  ;;  %v1029_v20 = vshll.u32 %v995_v14, 16  ;;  %v900_v22 = vadd.f32 %v3287_v15, %v886_v16  ;;  %v2955_v57 = vor.u32 %v2954_v47, %v2953_v46  ;;  %v1437_v3 = vld [vmem:[#allocation2 + $0x4] sm:$0xe] }
  0xdc   : > { %v1189_v12 = vrot.slane %v1187_v53, 1  ;;  %v1464_v14 = vunpack.c.l.b16 %v1437_v3 }
  0xdd   : > { %v1028_v24 = vrot.slane %v1026_v18, 6  ;;  %v1031_v25 = vrot.slane %v1029_v20, 7  ;;  %v910_v27 = vmax.f32 %v900_v22, 0.0  ;;  %v1355_v13 = vrot.slane %v2955_v57, 1 }
  0xde   : > { %v718_v28 = vpop.f32.mrf.mxu2 }
  0xdf   : > { %v868_v29 = vpop.f32.mrf.mxu3  ;;  %v1032_v31 = vor.u32 %v1031_v25, %v1028_v24  ;;  %v3348_v32 = vmul.f32 %v3345_v23, %v910_v27  ;;  %v737_v34 = vadd.f32 %v718_v28, %v586_v21  ;;  %v1185_v24 = vshrl.u32 %v3339_v19, 16  ;;  %v3383_v28 = vpop.permute.xlu2 %944 }
  0xe1   : > { %v1033_v35 = vsel %vm3328_vm10, %v1024_v30, %v1032_v31  ;;  %v996_v36 = vpack.c.bf16 %v3348_v32, %v3348_v32  ;;  %v887_v38 = vadd.f32 %v868_v29, %v737_v34  ;;  %v1034_v58 = vrot.slane %v1032_v31, 4 }
  0xe2   : > { %1123 = vst.msk [vmem:[#allocation2 + $0xc] sm:$0xf] %vm977_vm4, %v1033_v35  ;;  %v1190_v35 = vor.u32 %v1189_v12, %v1185_v24 }
  0xe3   : > { %v1036_v43 = vshrl.u32 %v996_v36, 16  ;;  %v1039_v44 = vshll.u32 %v996_v36, 16  ;;  %v901_v45 = vadd.f32 %v3287_v15, %v887_v38 }
  0xe5   : > { %v1038_v49 = vrot.slane %v1036_v43, 6  ;;  %v1041_v50 = vrot.slane %v1039_v44, 7  ;;  %v911_v52 = vmax.f32 %v901_v45, 0.0 }
  0xe6   : > { %v720_v55 = vpop.f32.mrf.mxu2 }
  0xe7   : > { %v870_v56 = vpop.f32.mrf.mxu3  ;;  %v1042_v59 = vor.u32 %v1041_v50, %v1038_v49  ;;  %v3363_v63 = vmul.f32 %v3358_v42, %v911_v52  ;;  %v738_v0 = vadd.f32 %v720_v55, %v588_v51  ;;  %v593_v52 = vadd.f32 %v3205_v62, %v3203_v61 }
  0xe9   : > { %v1043_v4 = vsel %vm3328_vm10, %v1034_v58, %v1042_v59  ;;  %v997_v5 = vpack.c.bf16 %v3363_v63, %v3363_v63  ;;  %v888_v6 = vadd.f32 %v870_v56, %v738_v0  ;;  %v3369_v10 = vld [vmem:[#allocation2 + $0x8] sm:$0xff]  ;;  %v1044_v39 = vrot.slane %v1042_v59, 4 }
  0xea   : > { %v3371_v11 = vld [vmem:[#allocation2 + $0x8] sm:$0xff]   ;;  %1124 = vst.msk [vmem:[#allocation2 + $0x10] sm:$0xf] %vm977_vm4, %v1043_v4  ;;  %2721 = vmatmul.msk.bf16.gmra.mxu1 %vm1240_vm11, %v3369_v10  ;;  %v1356_v22 = vrot.slane %v3369_v10, 1  ;;  %v1192_v25 = vshll.u32 %v3369_v10, 16  ;;  %v3411_v4 = vpop.permute.xlu0 %949 }
  0xeb   : > { %v1465_v16 = vunpack.c.l.b16 %v3371_v11  ;;  %v1046_v18 = vshrl.u32 %v997_v5, 16  ;;  %v1049_v20 = vshll.u32 %v997_v5, 16  ;;  %v902_v21 = vadd.f32 %v3287_v15, %v888_v6 }
  0xec   : > { %v1357_v34 = vsel %vm648_vm2, %v1355_v13, %v1356_v22  ;;  %v3389_v19 = vrot.slane %v1192_v25, 1 }
  0xed   : > { %v1475_v27 = vpack.c.b16 %v1465_v16, %v1464_v14  ;;  %v1048_v29 = vrot.slane %v1046_v18, 6  ;;  %v1051_v30 = vrot.slane %v1049_v20, 7  ;;  %v912_v31 = vmax.f32 %v902_v21, 0.0  ;;  %2737 = vmatmul.msk.bf16.vlgmr.msra.gmra.mxu2 %vm1240_vm11, %v1357_v34 }
  0xee   : > { %v723_v36 = vpop.f32.mrf.mxu2  ;;  %v1195_v44 = vsel %vm413_vm0, %v1190_v35, %v3389_v19 }
  0xef   : > { %v873_v38 = vpop.f32.mrf.mxu3  ;;  %v1052_v40 = vor.u32 %v1051_v30, %v1048_v29  ;;  %v3392_v41 = vmul.f32 %v3383_v28, %v912_v31  ;;  %v739_v43 = vadd.f32 %v723_v36, %v3201_v60  ;;  %v1573_v45 = vshrl.u32 %v1475_v27, 16  ;;  %2707 = vmatmul.msk.bf16.vlgmr.msrb.gmra.mxu0 %vm1240_vm11, %v1195_v44 }
  0xf0   : > { %v1576_v46 = vshll.u32 %v1475_v27, 16  ;;  %v1481_v60 = vrot.slane %v1475_v27, 1  ;;  %v2048_v27 = vld [vmem:[#allocation2 + $0x8] sm:$0x8]  ;;  %v1816_v29 = vunpack.c.h.b16 %v3371_v11 }
  0xf1   : > { %v1053_v47 = vsel %vm3328_vm10, %v1044_v39, %v1052_v40  ;;  %v998_v49 = vpack.c.bf16 %v3392_v41, %v3392_v41  ;;  %v889_v50 = vadd.f32 %v873_v38, %v739_v43  ;;  %v3402_v51 = vld [vmem:[#allocation2 + $0xc] sm:$0xff]  ;;  %v1575_v58 = vrot.slane %v1573_v45, 1 }
  0xf2   : > { %1125 = vst.msk [vmem:[#allocation2 + $0x14] sm:$0xf] %vm977_vm4, %v1053_v47  ;;  %v1482_v57 = vrot.slane %v3402_v51, 1  ;;  %v1578_v59 = vrot.slane %v1576_v46, 2  ;;  %v1581_v0 = vshrl.u32 %v3402_v51, 16  ;;  %v1584_v3 = vshll.u32 %v3402_v51, 16 }
  0xf3   : > { %v1056_v53 = vshrl.u32 %v998_v49, 16  ;;  %v1059_v55 = vshll.u32 %v998_v49, 16  ;;  %v903_v56 = vadd.f32 %v3287_v15, %v889_v50  ;;  %v1054_v20 = vrot.slane %v1052_v40, 4 }
  0xf4   : > { %v1483_v62 = vsel %vm648_vm2, %v1481_v60, %v1482_v57  ;;  %v1583_v14 = vrot.slane %v1581_v0, 1  ;;  %v1586_v18 = vrot.slane %v1584_v3, 2  ;;  %v1579_v30 = vor.u32 %v1578_v59, %v1575_v58 }
  0xf5   : > { %v1058_v5 = vrot.slane %v1056_v53, 6  ;;  %v1061_v6 = vrot.slane %v1059_v55, 7  ;;  %v913_v61 = vmax.f32 %v903_v56, 0.0  ;;  %2770 = vmatmul.msk.bf16.vlgmr.msra.gmra.mxu3 %vm1240_vm11, %v1483_v62  ;;  %v2055_v40 = vunpack.c.l.b16 %v2048_v27  ;;  %v3447_v53 = vpop.permute.xlu1 %954 }
  0xf6   : > { %v725_v12 = vpop.f32.mrf.mxu2  ;;  %v3421_v31 = vor.u32 %v1586_v18, %v1583_v14  ;;  %v1196_v49 = vshrl.u32 %v3369_v10, 16 }
  0xf7   : > { %v875_v13 = vpop.f32.mrf.mxu3  ;;  %v1062_v21 = vor.u32 %v1061_v6, %v1058_v5  ;;  %v3418_v24 = vmul.f32 %v3411_v4, %v913_v61  ;;  %v740_v25 = vadd.f32 %v725_v12, %v593_v52  ;;  %v2933_v52 = vld [vmem:[%s3843_s4 + $0x40] sm:$0xff]  ;;  %v2056_v60 = vpack.c.b16 %v1816_v29, %v2055_v40 }
  0xf8   : > { %v3432_v39 = vsel %vm756_vm3, %v1579_v30, %v3421_v31  ;;  %v1198_v6 = vor.u32 %v1196_v49, %v3389_v19  ;;  %1659 = vmatpush.bf16.msra.mxu0 %v2933_v52  ;;  %v3489_v52 = vpop.permute.xlu2 %959 }
  0xf9   : > { %v1063_v34 = vsel %vm3328_vm10, %v1054_v20, %v1062_v21  ;;  %v999_v35 = vpack.c.bf16 %v3418_v24, %v3418_v24  ;;  %v890_v36 = vadd.f32 %v875_v13, %v740_v25  ;;  %v3427_v38 = vld [vmem:[#allocation2 + $0x10] sm:$0xff]  ;;  %v1064_v0 = vrot.slane %v1062_v21, 4 }
  0xfa   : > { %1126 = vst.msk [vmem:[#allocation2 + $0x18] sm:$0xf] %vm977_vm4, %v1063_v34  ;;  %2722 = vmatmul.msk.bf16.gmra.mxu1 %vm1240_vm11, %v3427_v38  ;;  %v1358_v46 = vrot.slane %v3427_v38, 1  ;;  %v3438_v47 = vld [vmem:[#allocation2 + $0x10] sm:$0xff]  ;;  %v1200_v50 = vshll.u32 %v3427_v38, 16  ;;  %v2058_v14 = vrot.slane %v2056_v60, 3 }
  0xfb   : > { %v1066_v43 = vshrl.u32 %v999_v35, 16  ;;  %v1069_v44 = vshll.u32 %v999_v35, 16  ;;  %v904_v45 = vadd.f32 %v3287_v15, %v890_v36  ;;  %v2059_v10 = vrot.slane %v3438_v47, 3 }
  0xfc   : > { %v1359_v59 = vsel %vm648_vm2, %v1356_v22, %v1358_v46  ;;  %v1202_v61 = vrot.slane %v1200_v50, 1  ;;  %v598_v36 = vadd.f32 %v3255_v8, %v3253_v7  ;;  %v2935_v7 = vld [vmem:[%s3843_s4 + $0x50] sm:$0xff] }
  0xfd   : > { %v1068_v55 = vrot.slane %v1066_v43, 6  ;;  %v1071_v56 = vrot.slane %v1069_v44, 7  ;;  %v914_v58 = vmax.f32 %v904_v45, 0.0  ;;  %2738 = vmatmul.msk.bf16.gmra.mxu2 %vm1240_vm11, %v1359_v59  ;;  %v3476_v25 = vsel %vm2057_vm12, %v2058_v14, %v2059_v10 }
  0xfe   : > { %v728_v3 = vpop.f32.mrf.mxu2  ;;  %v1203_v22 = vsel %vm413_vm0, %v1198_v6, %v1202_v61 }
  0xff   : > { %v878_v5 = vpop.f32.mrf.mxu3  ;;  %v1072_v62 = vor.u32 %v1071_v56, %v1068_v55  ;;  %v3457_v12 = vmul.f32 %v3447_v53, %v914_v58  ;;  %v741_v13 = vadd.f32 %v728_v3, %v3222_v1  ;;  %2708 = vmatmul.msk.bf16.gmra.mxu0 %vm1240_vm11, %v1203_v22  ;;  %v2936_v1 = vld [vmem:[%s3843_s4 + $0x58] sm:$0xff] }
 0x100   : > { %1750 = vmatpush.bf16.msra.mxu1 %v2936_v1  ;;  %v1204_v1 = vshrl.u32 %v3427_v38, 16 }
 0x101   : > { %v1073_v18 = vsel %vm3328_vm10, %v1064_v0, %v1072_v62  ;;  %v1000_v19 = vpack.c.bf16 %v3457_v12, %v3457_v12  ;;  %v891_v20 = vadd.f32 %v878_v5, %v741_v13  ;;  %v3467_v21 = vld [vmem:[#allocation2 + $0x14] sm:$0xff]  ;;  %v1074_v56 = vrot.slane %v1072_v62, 4 }
 0x102   : > { %1127 = vst.msk [vmem:[#allocation2 + $0x1c] sm:$0xf] %vm977_vm4, %v1073_v18  ;;  %v1484_v35 = vrot.slane %v3467_v21, 1  ;;  %v1590_v40 = vshrl.u32 %v3467_v21, 16  ;;  %v1593_v43 = vshll.u32 %v3467_v21, 16 }
 0x103   : > { %v1076_v27 = vshrl.u32 %v1000_v19, 16  ;;  %v1079_v30 = vshll.u32 %v1000_v19, 16  ;;  %v905_v34 = vadd.f32 %v3287_v15, %v891_v20 }
 0x104   : > { %v1485_v50 = vsel %vm648_vm2, %v1482_v57, %v1484_v35  ;;  %v1592_v8 = vrot.slane %v1590_v40, 1  ;;  %v1595_v55 = vrot.slane %v1593_v43, 2  ;;  %1751 = vmatpush.bf16.msra.mxu1 %v2935_v7  ;;  %v3520_v43 = vpop.permute.xlu0 %964 }
 0x105   : > { %v1078_v44 = vrot.slane %v1076_v27, 6  ;;  %v1081_v45 = vrot.slane %v1079_v30, 7  ;;  %v915_v49 = vmax.f32 %v905_v34, 0.0  ;;  %2771 = vmatmul.msk.bf16.gmra.mxu3 %vm1240_vm11, %v1485_v50 }
 0x106   : > { %v730_v60 = vpop.f32.mrf.mxu2  ;;  %v1596_v57 = vor.u32 %v1595_v55, %v1592_v8 }
 0x107   : > { %v1082_v58 = vor.u32 %v1081_v45, %v1078_v44  ;;  %v3496_v59 = vmul.f32 %v3489_v52, %v915_v49  ;;  %v742_v0 = vadd.f32 %v730_v60, %v598_v36  ;;  %v880_v3 = vpop.f32.mrf.mxu3 }
 0x108   : > { %v3507_v62 = vsel %vm756_vm3, %v3421_v31, %v1596_v57 }
 0x109   : > { %v1083_v5 = vsel %vm3328_vm10, %v1074_v56, %v1082_v58  ;;  %v1001_v6 = vpack.c.bf16 %v3496_v59, %v3496_v59  ;;  %v892_v13 = vadd.f32 %v880_v3, %v742_v0  ;;  %v3502_v22 = vld [vmem:[#allocation2 + $0x18] sm:$0xff]  ;;  %v1084_v45 = vrot.slane %v1082_v58, 4 }
 0x10a   : > { %1128 = vst.msk [vmem:[#allocation2 + $0x20] sm:$0xf] %vm977_vm4, %v1083_v5  ;;  %2723 = vmatmul.msk.bf16.gmra.mxu1 %vm1240_vm11, %v3502_v22  ;;  %v1360_v20 = vrot.slane %v3502_v22, 1  ;;  %v1208_v27 = vshll.u32 %v3502_v22, 16  ;;  %v3515_v30 = vld [vmem:[#allocation2 + $0x18] sm:$0xff]  ;;  %v1212_v2 = vshrl.u32 %v3502_v22, 16 }
 0x10b   : > { %v1086_v14 = vshrl.u32 %v1001_v6, 16  ;;  %v1089_v18 = vshll.u32 %v1001_v6, 16  ;;  %v906_v19 = vadd.f32 %v3287_v15, %v892_v13  ;;  %v1206_v15 = vor.u32 %v1204_v1, %v1202_v61 }
 0x10c   : > { %v1361_v31 = vsel %vm648_vm2, %v1358_v46, %v1360_v20  ;;  %v1210_v44 = vrot.slane %v1208_v27, 1  ;;  %v2061_v7 = vrot.slane %v3515_v30, 3 }
 0x10d   : > { %v1088_v34 = vrot.slane %v1086_v14, 6  ;;  %v1091_v36 = vrot.slane %v1089_v18, 7  ;;  %v916_v40 = vmax.f32 %v906_v19, 0.0  ;;  %2739 = vmatmul.msk.bf16.gmra.mxu2 %vm1240_vm11, %v1361_v31  ;;  %v2944_v14 = vld [vmem:[%s3843_s4 + $0x78] sm:$0xff] }
 0x10e   : > { %v1211_v60 = vsel %vm413_vm0, %v1206_v15, %v1210_v44  ;;  %v3539_v61 = vsel %vm2057_vm12, %v2059_v10, %v2061_v7  ;;  %v2942_v10 = vld [vmem:[%s3843_s4 + $0x68] sm:$0xff]  ;;  %2010 = vmatpush.bf16.msrb.mxu3 %v2944_v14 }
 0x10f   : > { %v1092_v49 = vor.u32 %v1091_v36, %v1088_v34  ;;  %v3524_v50 = vmul.f32 %v3520_v43, %v916_v40  ;;  %2709 = vmatmul.msk.bf16.gmra.mxu0 %vm1240_vm11, %v1211_v60  ;;  %v1133_v34 = vld [vmem:[#allocation2 + $0x2c] sm:$0x3]  ;;  %1876 = vmatpush.bf16.msrb.mxu2 %v2942_v10 }
 0x111   : > { %v1093_v38 = vsel %vm3328_vm10, %v1084_v45, %v1092_v49  ;;  %v1002_v46 = vpack.c.bf16 %v3524_v50, %v3524_v50  ;;  %v3533_v8 = vld [vmem:[#allocation2 + $0x1c] sm:$0xff]  ;;  %v1094_v1 = vrot.slane %v1092_v49, 4 }
 0x112   : > { %1129 = vst.msk [vmem:[#allocation2 + $0x24] sm:$0xf] %vm977_vm4, %v1093_v38  ;;  %v1486_v58 = vrot.slane %v3533_v8, 1  ;;  %v1599_v0 = vshrl.u32 %v3533_v8, 16  ;;  %v1602_v3 = vshll.u32 %v3533_v8, 16  ;;  %v2941_v45 = vld [vmem:[%s3843_s4 + $0x60] sm:$0xff] }
 0x113   : > { %v1096_v55 = vshrl.u32 %v1002_v46, 16  ;;  %v1099_v56 = vshll.u32 %v1002_v46, 16  ;;  %1877 = vmatpush.bf16.msrb.mxu2 %v2941_v45  ;;  %v1707_v45 = vrot.slane %v3402_v51, 2 }
 0x114   : > { %v1487_v13 = vsel %vm648_vm2, %v1484_v35, %v1486_v58  ;;  %v1601_v18 = vrot.slane %v1599_v0, 1  ;;  %v1604_v19 = vrot.slane %v1602_v3, 2  ;;  %v1214_v0 = vor.u32 %v1212_v2, %v1210_v44 }
 0x115   : > { %v1098_v5 = vrot.slane %v1096_v55, 6  ;;  %v1101_v6 = vrot.slane %v1099_v56, 7  ;;  %2772 = vmatmul.msk.bf16.gmra.mxu3 %vm1240_vm11, %v1487_v13  ;;  %v1914_v13 = vld [vmem:[#allocation2 + $0x30] sm:$0x7] }
 0x116   : > { %v1605_v35 = vor.u32 %v1604_v19, %v1601_v18  ;;  %v1921_v18 = vunpack.c.l.b16 %v1914_v13 }
 0x117   : > { %v1102_v27 = vor.u32 %v1101_v6, %v1098_v5  ;;  %v1696_v6 = vld [vmem:[#allocation2 + $0x4] sm:$0xc] }
 0x118   : > { %v3564_v49 = vsel %vm756_vm3, %v1596_v57, %v1605_v35  ;;  %v1703_v44 = vunpack.c.l.b16 %v1696_v6  ;;  %v3592_v2 = vpack.c.b16 %v1921_v18, %v1921_v18 }
 0x119   : > { %v1103_v36 = vsel %vm3328_vm10, %v1094_v1, %v1102_v27  ;;  %v1104_v40 = vrot.slane %v1102_v27, 4  ;;  %v2920_v31 = vld [vmem:[#allocation2 + $0x20] sm:$0xff] }
 0x11a   : > { %v3557_v15 = vld [vmem:[#allocation2 + $0x20] sm:$0xff]  ;;  %1130 = vst.msk [vmem:[#allocation2 + $0x28] sm:$0xf] %vm977_vm4, %v1103_v36  ;;  %2724 = vmatmul.msk.bf16.gmra.mxu1 %vm1240_vm11, %v2920_v31  ;;  %v1362_v38 = vrot.slane %v2920_v31, 1  ;;  %v1216_v46 = vshll.u32 %v2920_v31, 16  ;;  %v1704_v1 = vpack.c.b16 %v1465_v16, %v1703_v44  ;;  %v1220_v44 = vshrl.u32 %v2920_v31, 16 }
 0x11b   : > { %v1134_v60 = vsel %vm1132_vm14, %v1104_v40, %v1133_v34  ;;  %v2063_v55 = vrot.slane %v3557_v15, 3  ;;  %v1788_v31 = vld [vmem:[#allocation2 + $0x8] sm:$0xc] }
 0x11c   : > { %1135 = vst [vmem:[#allocation2 + $0x2c] sm:$0x3] %v1134_v60  ;;  %v1363_v56 = vsel %vm648_vm2, %v1360_v20, %v1362_v38  ;;  %v1218_v3 = vrot.slane %v1216_v46, 1  ;;  %v2946_v20 = vld [vmem:[%s3843_s4 + $0x88] sm:$0xff] }
 0x11d   : > { %2740 = vmatmul.msk.bf16.gmra.mxu2 %vm1240_vm11, %v1363_v56  ;;  %v3572_v57 = vsel %vm2057_vm12, %v2061_v7, %v2063_v55  ;;  %v2943_v7 = vld [vmem:[%s3843_s4 + $0x70] sm:$0xff]  ;;  %2102 = vmatpush.bf16.msrb.mxu0 %v2946_v20  ;;  %v2067_v20 = vrot.slane %v3592_v2, 3 }
 0x11e   : > { %v1219_v5 = vsel %vm413_vm0, %v1214_v0, %v1218_v3  ;;  %2011 = vmatpush.bf16.msrb.mxu3 %v2943_v7  ;;  %v1706_v0 = vrot.slane %v1704_v1, 2 }
 0x11f   : > { %2710 = vmatmul.msk.bf16.gmra.mxu0 %vm1240_vm11, %v1219_v5 }
 0x121   : > { %v3576_v22 = vld [vmem:[#allocation2 + $0x24] sm:$0xff] }
 0x122   : > { %v1150_v10 = vld [vmem:[#allocation2 + $0x28] sm:$0x1]  ;;  %v1488_v19 = vrot.slane %v3576_v22, 1  ;;  %v1608_v34 = vshrl.u32 %v3576_v22, 16  ;;  %v1611_v40 = vshll.u32 %v3576_v22, 16 }
 0x123   : > { %v1177_v14 = vunpack.c.l.b16 %v1150_v10  ;;  %v1447_v60 = vld [vmem:[#allocation2 + $0x2c] sm:$0x1] }
 0x124   : > { %v1489_v36 = vsel %vm648_vm2, %v1486_v58, %v1488_v19  ;;  %v1610_v46 = vrot.slane %v1608_v34, 1  ;;  %v1613_v56 = vrot.slane %v1611_v40, 2  ;;  %v3594_v5 = vld [vmem:[#allocation2 + $0x28] sm:$0xff]  ;;  %v1474_v13 = vunpack.c.l.b16 %v1447_v60 }
 0x125   : > { %v1183_v27 = vpack.c.b16 %v1177_v14, %v1177_v14  ;;  %2773 = vmatmul.msk.bf16.gmra.mxu3 %vm1240_vm11, %v1489_v36  ;;  %v1708_v58 = vsel %vm1705_vm15, %v1706_v0, %v1707_v45  ;;  %v2065_v7 = vrot.slane %v3594_v5, 3  ;;  %v1936_v0 = vshll.u32 %v3438_v47, 16 }
 0x126   : > { %v3596_v10 = vor.u32 %v1613_v56, %v1610_v46  ;;  %v1480_v1 = vpack.c.b16 %v1474_v13, %v1474_v13  ;;  %v1815_v46 = vunpack.c.l.b16 %v1788_v31  ;;  %v1933_v56 = vshrl.u32 %v3438_v47, 16 }
 0x127   : > { %v1224_v16 = vshll.u32 %v1183_v27, 16  ;;  %v1364_v6 = vrot.slane %v1183_v27, 1  ;;  %v1222_v27 = vor.u32 %v1220_v44, %v1218_v3  ;;  %v3609_v34 = vsel %vm2057_vm12, %v2063_v55, %v2065_v7 }
 0x128   : > { %v3603_v51 = vsel %vm756_vm3, %v1605_v35, %v3596_v10  ;;  %v3612_v36 = vsel %vm2057_vm12, %v2065_v7, %v2067_v20  ;;  %v1490_v35 = vrot.slane %v1480_v1, 1  ;;  %v1826_v55 = vpack.c.b16 %v1816_v29, %v1815_v46  ;;  %v2945_v7 = vld [vmem:[%s3843_s4 + $0x80] sm:$0xff] }
 0x129   : > { %v1226_v14 = vrot.slane %v1224_v16, 1  ;;  %v1365_v18 = vsel %vm648_vm2, %v1362_v38, %v1364_v6  ;;  %v1709_v38 = vrot.slane %v3467_v21, 2  ;;  %v1833_v3 = vrot.slane %v3438_v47, 2  ;;  %2103 = vmatpush.bf16.msrb.mxu0 %v2945_v7  ;;  %v1798_v7 = vld [vmem:[#allocation2 + $0x30] sm:$0x3] }
 0x12a   : > { %2804 = vmatmul.msk.bf16.vlgmr.msra.gmra.mxu1 %vm1240_vm11, %v1708_v58  ;;  %v1491_v60 = vsel %vm648_vm2, %v1488_v19, %v1490_v35  ;;  %v1832_v6 = vrot.slane %v1826_v55, 2  ;;  %v1925_v19 = vshrl.u32 %v1826_v55, 16  ;;  %v1928_v13 = vshll.u32 %v1826_v55, 16  ;;  %vm2406_vm2 = vmand %vm977_vm4, %vm2405_vm1 }
 0x12b   : > { %v1227_v40 = vsel %vm413_vm0, %v1222_v27, %v1226_v14  ;;  %v1710_v16 = vsel %vm1705_vm15, %v1707_v45, %v1709_v38  ;;  %v1935_v20 = vrot.slane %v1933_v56, 2  ;;  %v1938_v21 = vrot.slane %v1936_v0, 3  ;;  %v1563_v56 = vld [vmem:[#allocation2 + $0x2c] sm:$0x3] }
 0x12c   : > { %v1834_v58 = vsel %vm1705_vm15, %v1832_v6, %v1833_v3  ;;  %v1927_v11 = vrot.slane %v1925_v19, 2  ;;  %v1930_v29 = vrot.slane %v1928_v13, 3  ;;  %vm1923_vm0 = vsmask.f32 5376 }
 0x12d   : > { %2741 = vmatmul.msk.bf16.gmra.mxu2 %vm1240_vm11, %v1365_v18  ;;  %v1939_v44 = vor.u32 %v1938_v21, %v1935_v20  ;;  %v1711_v14 = vrot.slane %v3533_v8, 2  ;;  %v1835_v18 = vrot.slane %v3515_v30, 2  ;;  %v1942_v1 = vshrl.u32 %v3515_v30, 16 }
 0x12e   : > { %v1931_v47 = vor.u32 %v1930_v29, %v1927_v11  ;;  %v1945_v27 = vshll.u32 %v3515_v30, 16  ;;  %v1713_v30 = vrot.slane %v3576_v22, 2  ;;  %v1837_v46 = vrot.slane %v3557_v15, 2 }
 0x12f   : > { %2711 = vmatmul.msk.bf16.gmra.mxu0 %vm1240_vm11, %v1227_v40  ;;  %v1836_v40 = vsel %vm1705_vm15, %v1833_v3, %v1835_v18  ;;  %v1944_v35 = vrot.slane %v1942_v1, 2  ;;  %v1954_v55 = vshll.u32 %v3557_v15, 16  ;;  %v1570_v19 = vunpack.c.l.b16 %v1563_v56 }
 0x130   : > { %v1940_v45 = vsel %vm1923_vm0, %v1931_v47, %v1939_v44  ;;  %v1947_v31 = vrot.slane %v1945_v27, 3  ;;  %v1714_v3 = vsel %vm1705_vm15, %v1711_v14, %v1713_v30  ;;  %v1839_v21 = vrot.slane %v3594_v5, 2 }
 0x131   : > { %v1956_v6 = vrot.slane %v1954_v55, 3  ;;  %v1571_v13 = vpack.c.b16 %v1570_v19, %v1570_v19  ;;  %v1960_v11 = vshrl.u32 %v3594_v5, 16  ;;  %v1963_v29 = vshll.u32 %v3594_v5, 16 }
 0x132   : > { %v1948_v8 = vor.u32 %v1947_v31, %v1944_v35  ;;  %v1825_v5 = vunpack.c.l.b16 %v1798_v7 }
 0x133   : > { %v1715_v20 = vrot.slane %v1571_v13, 2  ;;  %v1962_v47 = vrot.slane %v1960_v11, 2  ;;  %v1617_v35 = vshrl.u32 %v1571_v13, 16  ;;  %v1620_v31 = vshll.u32 %v1571_v13, 16 }
 0x135   : > { %2774 = vmatmul.msk.bf16.gmra.mxu3 %vm1240_vm11, %v1491_v60  ;;  %v1949_v60 = vsel %vm1923_vm0, %v1939_v44, %v1948_v8  ;;  %v1716_v44 = vsel %vm1705_vm15, %v1713_v30, %v1715_v20  ;;  %v1622_v55 = vrot.slane %v1620_v31, 2 }
 0x13a   : > { %2805 = vmatmul.msk.bf16.gmra.mxu1 %vm1240_vm11, %v1710_v16 }
 0x13d   : > { %2837 = vmatmul.msk.bf16.vlgmr.msrb.gmra.mxu2 %vm1240_vm11, %v1834_v58 }
 0x13f   : > { %2787 = vmatmul.msk.bf16.vlgmr.msra.gmra.mxu0 %vm1240_vm11, %v3432_v39  ;;  %v1712_v39 = vsel %vm1705_vm15, %v1709_v38, %v1711_v14  ;;  %v1951_v38 = vshrl.u32 %v3557_v15, 16 }
 0x141   : > { %v1953_v16 = vrot.slane %v1951_v38, 2  ;;  %v1619_v38 = vrot.slane %v1617_v35, 1 }
 0x143   : > { %v1957_v22 = vor.u32 %v1956_v6, %v1953_v16  ;;  %v1623_v13 = vor.u32 %v1622_v55, %v1619_v38 }
 0x145   : > { %2854 = vmatmul.msk.bf16.vlgmr.msrb.gmra.mxu3 %vm1240_vm11, %v1940_v45  ;;  %v1958_v15 = vsel %vm1923_vm0, %v1948_v8, %v1957_v22  ;;  %v1965_v45 = vrot.slane %v1963_v29, 3  ;;  %v1624_v29 = vsel %vm756_vm3, %v3596_v10, %v1623_v13  ;;  %vm2301_vm3 = vsmask.f32 256 }
 0x146   : > { %vm3728_vm6 = vmor %vm2301_vm3, %vm2302_vm5 }
 0x147   : > { %vm2420_vm8 = vmand %vm2299_vm7, %vm2301_vm3 }
 0x14a   : > { %2806 = vmatmul.msk.bf16.gmra.mxu1 %vm1240_vm11, %v1712_v39  ;;  %v1966_v39 = vor.u32 %v1965_v45, %v1962_v47 }
 0x14c   : > { %v1967_v8 = vsel %vm1923_vm0, %v1957_v22, %v1966_v39 }
 0x14d   : > { %2838 = vmatmul.msk.bf16.gmra.mxu2 %vm1240_vm11, %v1836_v40 }
 0x14f   : > { %2788 = vmatmul.msk.bf16.gmra.mxu0 %vm1240_vm11, %v3507_v62  ;;  %v1838_v62 = vsel %vm1705_vm15, %v1835_v18, %v1837_v46 }
 0x155   : > { %2855 = vmatmul.msk.bf16.gmra.mxu3 %vm1240_vm11, %v1949_v60  ;;  %v1831_v60 = vpack.c.b16 %v1825_v5, %v1825_v5 }
 0x157   : > { %v1321_v0 = vpop.f32.mrf.mxu1 }
 0x15a   : > { %2807 = vmatmul.msk.bf16.gmra.mxu1 %vm1240_vm11, %v1714_v3 }
 0x15d   : > { %2839 = vmatmul.msk.bf16.gmra.mxu2 %vm1240_vm11, %v1838_v62  ;;  %v1972_v62 = vshll.u32 %v3592_v2, 16 }
 0x15f   : > { %2789 = vmatmul.msk.bf16.gmra.mxu0 %vm1240_vm11, %v3564_v49  ;;  %v1323_v58 = vpop.f32.mrf.mxu1  ;;  %v1840_v49 = vsel %vm1705_vm15, %v1837_v46, %v1839_v21  ;;  %v1974_v20 = vrot.slane %v1972_v62, 3 }
 0x165   : > { %2856 = vmatmul.msk.bf16.gmra.mxu3 %vm1240_vm11, %v1958_v15 }
 0x167   : > { %v1326_v1 = vpop.f32.mrf.mxu1 }
 0x16a   : > { %2808 = vmatmul.msk.bf16.gmra.mxu1 %vm1240_vm11, %v1716_v44 }
 0x16c   : > { %v1265_v14 = vpop.f32.mrf.mxu0 }
 0x16d   : > { %2840 = vmatmul.msk.bf16.gmra.mxu2 %vm1240_vm11, %v1840_v49  ;;  %v1322_v18 = vadd.f32 %v1321_v0, %v1265_v14  ;;  %v1841_v0 = vrot.slane %v1831_v60, 2 }
 0x16f   : > { %2790 = vmatmul.msk.bf16.gmra.mxu0 %vm1240_vm11, %v3603_v51  ;;  %v1969_v51 = vshrl.u32 %v3592_v2, 16  ;;  %v1328_v16 = vpop.f32.mrf.mxu1  ;;  %v1842_v22 = vsel %vm1705_vm15, %v1839_v21, %v1841_v0 }
 0x170   : > { %v1402_v27 = vpop.f32.mrf.mxu2 }
 0x171   : > { %v1427_v40 = vadd.f32 %v1402_v27, %v1322_v18  ;;  %v1971_v15 = vrot.slane %v1969_v51, 2 }
 0x173   : > { %v1975_v49 = vor.u32 %v1974_v20, %v1971_v15 }
 0x174   : > { %v1267_v30 = vpop.f32.mrf.mxu0 }
 0x175   : > { %2857 = vmatmul.msk.bf16.gmra.mxu3 %vm1240_vm11, %v1967_v8  ;;  %v1324_v46 = vadd.f32 %v1323_v58, %v1267_v30  ;;  %v1976_v7 = vsel %vm1923_vm0, %v1966_v39, %v1975_v49 }
 0x177   : > { %v1331_v14 = vpop.f32.mrf.mxu1 }
 0x178   : > { %v1404_v3 = vpop.f32.mrf.mxu2  ;;  %v1528_v56 = vpop.f32.mrf.mxu3 }
 0x179   : > { %v1428_v6 = vadd.f32 %v1404_v3, %v1324_v46  ;;  %v3672_v19 = vadd.f32 %v1528_v56, %v1427_v40 }
 0x17c   : > { %v1270_v11 = vpop.f32.mrf.mxu0 }
 0x17d   : > { %2841 = vmatmul.msk.bf16.gmra.mxu2 %vm1240_vm11, %v1842_v22  ;;  %v1327_v58 = vadd.f32 %v1326_v1, %v1270_v11 }
 0x17f   : > { %2791 = vmatmul.msk.bf16.gmra.mxu0 %vm1240_vm11, %v1624_v29  ;;  %v1333_v35 = vpop.f32.mrf.mxu1 }
 0x180   : > { %v1407_v44 = vpop.f32.mrf.mxu2  ;;  %v1530_v2 = vpop.f32.mrf.mxu3 }
 0x181   : > { %v1429_v47 = vadd.f32 %v1407_v44, %v1327_v58  ;;  %v1554_v45 = vadd.f32 %v1530_v2, %v1428_v6 }
 0x184   : > { %v1272_v21 = vpop.f32.mrf.mxu0 }
 0x185   : > { %2858 = vmatmul.msk.bf16.gmra.mxu3 %vm1240_vm11, %v1976_v7  ;;  %v1329_v18 = vadd.f32 %v1328_v16, %v1272_v21 }
 0x187   : > { %v1336_v39 = vpop.f32.mrf.mxu1 }
 0x188   : > { %v1409_v27 = vpop.f32.mrf.mxu2  ;;  %v1533_v5 = vpop.f32.mrf.mxu3 }
 0x189   : > { %v1430_v1 = vadd.f32 %v1409_v27, %v1329_v18  ;;  %v1555_v40 = vadd.f32 %v1533_v5, %v1429_v47 }
 0x18c   : > { %v1275_v10 = vpop.f32.mrf.mxu0 }
 0x18d   : > { %v1332_v31 = vadd.f32 %v1331_v14, %v1275_v10 }
 0x18f   : > { %2871 = vmatmul.msk.bf16.vlgmr.msrb.gmra.mxu0 %vm1240_vm11, %v3476_v25  ;;  %v1338_v22 = vpop.f32.mrf.mxu1 }
 0x190   : > { %v1412_v8 = vpop.f32.mrf.mxu2  ;;  %v1535_v60 = vpop.f32.mrf.mxu3 }
 0x191   : > { %v1431_v30 = vadd.f32 %v1412_v8, %v1332_v31  ;;  %v1556_v46 = vadd.f32 %v1535_v60, %v1430_v1 }
 0x194   : > { %v1277_v38 = vpop.f32.mrf.mxu0 }
 0x195   : > { %v1334_v55 = vadd.f32 %v1333_v35, %v1277_v38  ;;  %v2948_v35 = vld [vmem:[%s3845_s6 + $0x8] sm:$0xff] }
 0x196   : > { %2260 = vmatpush.bf16.msrb.mxu1 %v2948_v35 }
 0x197   : > { %v1341_v49 = vpop.f32.mrf.mxu1 }
 0x198   : > { %v1414_v3 = vpop.f32.mrf.mxu2  ;;  %v1538_v56 = vpop.f32.mrf.mxu3 }
 0x199   : > { %v1432_v0 = vadd.f32 %v1414_v3, %v1334_v55  ;;  %v1557_v51 = vadd.f32 %v1538_v56, %v1431_v30 }
 0x19c   : > { %v1280_v62 = vpop.f32.mrf.mxu0 }
 0x19d   : > { %v1337_v16 = vadd.f32 %v1336_v39, %v1280_v62 }
 0x19f   : > { %2872 = vmatmul.msk.bf16.gmra.mxu0 %vm1240_vm11, %v3539_v61  ;;  %v1343_v27 = vpop.f32.mrf.mxu1 }
 0x1a0   : > { %v1417_v6 = vpop.f32.mrf.mxu2  ;;  %v1540_v13 = vpop.f32.mrf.mxu3 }
 0x1a1   : > { %v1433_v25 = vadd.f32 %v1417_v6, %v1337_v16  ;;  %v1558_v15 = vadd.f32 %v1540_v13, %v1432_v0 }
 0x1a4   : > { %v1282_v20 = vpop.f32.mrf.mxu0 }
 0x1a5   : > { %v1339_v11 = vadd.f32 %v1338_v22, %v1282_v20 }
 0x1a8   : > { %v1419_v58 = vpop.f32.mrf.mxu2  ;;  %v1543_v29 = vpop.f32.mrf.mxu3 }
 0x1a9   : > { %v1434_v44 = vadd.f32 %v1419_v58, %v1339_v11  ;;  %v1559_v2 = vadd.f32 %v1543_v29, %v1433_v25 }
 0x1ac   : > { %v1285_v47 = vpop.f32.mrf.mxu0 }
 0x1ad   : > { %v1342_v14 = vadd.f32 %v1341_v49, %v1285_v47 }
 0x1af   : > { %2873 = vmatmul.msk.bf16.gmra.mxu0 %vm1240_vm11, %v3572_v57 }
 0x1b0   : > { %v1422_v7 = vpop.f32.mrf.mxu2  ;;  %v1545_v21 = vpop.f32.mrf.mxu3 }
 0x1b1   : > { %v1435_v61 = vadd.f32 %v1422_v7, %v1342_v14  ;;  %v1560_v18 = vadd.f32 %v1545_v21, %v1434_v44 }
 0x1b4   : > { %v1287_v5 = vpop.f32.mrf.mxu0 }
 0x1b5   : > { %v1344_v1 = vadd.f32 %v1343_v27, %v1287_v5 }
 0x1b8   : > { %v1424_v10 = vpop.f32.mrf.mxu2  ;;  %v1548_v31 = vpop.f32.mrf.mxu3 }
 0x1b9   : > { %v1436_v8 = vadd.f32 %v1424_v10, %v1344_v1  ;;  %v1561_v60 = vadd.f32 %v1548_v31, %v1435_v61 }
 0x1bc   : > { %v1661_v30 = vpop.f32.mrf.mxu0 }
 0x1bd   : > { %v1686_v38 = vadd.f32 %v1661_v30, %v3672_v19  ;;  %v2947_v19 = vld [vmem:[%s3845_s6] sm:$0xff] }
 0x1be   : > { %2261 = vmatpush.bf16.msrb.mxu1 %v2947_v19 }
 0x1bf   : > { %2874 = vmatmul.msk.bf16.gmra.mxu0 %vm1240_vm11, %v3609_v34 }
 0x1c0   : > { %v1550_v57 = vpop.f32.mrf.mxu3  ;;  %v1879_v20 = vpop.f32.mrf.mxu2 }
 0x1c1   : > { %v1562_v39 = vadd.f32 %v1550_v57, %v1436_v8 }
 0x1c4   : > { %v1663_v55 = vpop.f32.mrf.mxu0 }
 0x1c5   : > { %v1687_v3 = vadd.f32 %v1663_v55, %v1554_v45 }
 0x1c8   : > { %v1881_v29 = vpop.f32.mrf.mxu2 }
 0x1cc   : > { %v1666_v56 = vpop.f32.mrf.mxu0 }
 0x1cd   : > { %v1688_v0 = vadd.f32 %v1666_v56, %v1555_v40  ;;  %v1753_v40 = vpop.f32.mrf.mxu1 }
 0x1ce   : > { %v1778_v7 = vadd.f32 %v1753_v40, %v1686_v38 }
 0x1cf   : > { %2875 = vmatmul.msk.bf16.gmra.mxu0 %vm1240_vm11, %v3612_v36  ;;  %v2013_v36 = vpop.f32.mrf.mxu3 }
 0x1d0   : > { %v1884_v21 = vpop.f32.mrf.mxu2 }
 0x1d4   : > { %v1668_v62 = vpop.f32.mrf.mxu0 }
 0x1d5   : > { %v1689_v16 = vadd.f32 %v1668_v62, %v1556_v46  ;;  %v1755_v46 = vpop.f32.mrf.mxu1 }
 0x1d6   : > { %v1779_v1 = vadd.f32 %v1755_v46, %v1687_v3 }
 0x1d7   : > { %v2015_v49 = vpop.f32.mrf.mxu3 }
 0x1d8   : > { %v1905_v8 = vadd.f32 %v1881_v29, %v1779_v1 }
 0x1da   : > { %v2039_v38 = vadd.f32 %v2015_v49, %v1905_v8 }
 0x1dc   : > { %v1671_v6 = vpop.f32.mrf.mxu0 }
 0x1dd   : > { %v3695_v13 = vadd.f32 %v1671_v6, %v1557_v51  ;;  %v1758_v14 = vpop.f32.mrf.mxu1 }
 0x1de   : > { %v1780_v56 = vadd.f32 %v1758_v14, %v1688_v0 }
 0x1df   : > { %v2018_v61 = vpop.f32.mrf.mxu3 }
 0x1e4   : > { %v1673_v34 = vpop.f32.mrf.mxu0 }
 0x1e5   : > { %v3700_v22 = vadd.f32 %v1673_v34, %v1558_v15  ;;  %v1760_v10 = vpop.f32.mrf.mxu1 }
 0x1e6   : > { %v1781_v0 = vadd.f32 %v1760_v10, %v1689_v16 }
 0x1e7   : > { %v2020_v57 = vpop.f32.mrf.mxu3 }
 0x1ec   : > { %v1676_v25 = vpop.f32.mrf.mxu0 }
 0x1ed   : > { %v3702_v45 = vadd.f32 %v1676_v25, %v1559_v2  ;;  %v1904_v2 = vadd.f32 %v1879_v20, %v1778_v7  ;;  %v1763_v34 = vpop.f32.mrf.mxu1  ;;  %v1906_v25 = vadd.f32 %v1884_v21, %v1780_v56 }
 0x1ef   : > { %v2038_v27 = vadd.f32 %v2013_v36, %v1904_v2  ;;  %v2023_v49 = vpop.f32.mrf.mxu3 }
 0x1f4   : > { %v1678_v11 = vpop.f32.mrf.mxu0 }
 0x1f5   : > { %v3704_v58 = vadd.f32 %v1678_v11, %v1560_v18  ;;  %v3713_v18 = vld [vmem:[%s3844_s5] ss:$0 sm:$0xff]  ;;  %v2040_v11 = vadd.f32 %v2018_v61, %v1906_v25  ;;  %v1765_v10 = vpop.f32.mrf.mxu1 }
 0x1fc   : > { %v1681_v51 = vpop.f32.mrf.mxu0 }
 0x1fd   : > { %v3706_v44 = vadd.f32 %v1681_v51, %v1561_v60  ;;  %v1886_v60 = vpop.f32.mrf.mxu2 }
 0x204   : > { %v1683_v47 = vpop.f32.mrf.mxu0 }
 0x205   : > { %v3708_v15 = vadd.f32 %v1683_v47, %v1562_v39  ;;  %v1889_v36 = vpop.f32.mrf.mxu2 }
 0x20c   : > { %v2105_v5 = vpop.f32.mrf.mxu0 }
 0x20d   : > { %v2130_v35 = vadd.f32 %v2105_v5, %v2038_v27  ;;  %v1907_v27 = vadd.f32 %v1886_v60, %v1781_v0  ;;  %v1768_v0 = vpop.f32.mrf.mxu1 }
 0x20f   : > { %v2144_v31 = vadd.f32 %v3713_v18, %v2130_v35  ;;  %v2041_v35 = vadd.f32 %v2020_v57, %v1907_v27 }
 0x211   : > { %v2154_v30 = vmax.f32 %v2144_v31, 0.0 }
 0x213   : > { %v2164_v39 = vadd.f32 %v2154_v30, %v3299_v26 }
 0x214   : > { %v2107_v55 = vpop.f32.mrf.mxu0 }
 0x215   : > { %v2174_v62 = vmul.f32 %v2164_v39, %v3292_v17  ;;  %v2131_v6 = vadd.f32 %v2107_v55, %v2039_v38  ;;  %v2407_v17 = vld [vmem:[%s3236_s16] sm:$0xf]  ;;  %v1782_v38 = vadd.f32 %v1763_v34, %v3695_v13  ;;  %v1891_v55 = vpop.f32.mrf.mxu2 }
 0x217   : > { %v2184_v19 = vpack.c.bf16 %v2174_v62, %v2174_v62  ;;  %v2145_v3 = vadd.f32 %v3713_v18, %v2131_v6  ;;  %v1908_v34 = vadd.f32 %v1889_v36, %v1782_v38 }
 0x219   : > { %v2305_v40 = vshrl.u32 %v2184_v19, 16  ;;  %v2155_v20 = vmax.f32 %v2145_v3, 0.0  ;;  %v2308_v51 = vshll.u32 %v2184_v19, 16  ;;  %v2212_v5 = vunpack.c.l.b16 %v2184_v19  ;;  %v2025_v19 = vpop.f32.mrf.mxu3 }
 0x21b   : > { %v2307_v46 = vrot.slane %v2305_v40, 7  ;;  %v2165_v26 = vadd.f32 %v2155_v20, %v3317_v48  ;;  %v2042_v20 = vadd.f32 %v2023_v49, %v1908_v34 }
 0x21c   : > { %v2110_v29 = vpop.f32.mrf.mxu0 }
 0x21d   : > { %v2310_v47 = vor.u32 %v2308_v51, %v2307_v46  ;;  %v2175_v14 = vmul.f32 %v2165_v26, %v3310_v37  ;;  %v2132_v7 = vadd.f32 %v2110_v29, %v2040_v11  ;;  %v2311_v56 = vrot.slane %v2307_v46, 4 }
 0x21e   : > { %v1783_v51 = vadd.f32 %v1765_v10, %v3700_v22  ;;  %v1784_v10 = vadd.f32 %v1768_v0, %v3702_v45 }
 0x21f   : > { %v2408_v21 = vsel %vm2406_vm2, %v2310_v47, %v2407_v17  ;;  %v2185_v2 = vpack.c.bf16 %v2175_v14, %v2175_v14  ;;  %v2146_v61 = vadd.f32 %v3713_v18, %v2132_v7  ;;  %v1894_v7 = vpop.f32.mrf.mxu2 }
 0x220   : > { %2409 = vst [vmem:[%s3236_s16] sm:$0xf] %v2408_v21 }
 0x221   : > { %v2213_v48 = vunpack.c.l.b16 %v2185_v2  ;;  %v2313_v16 = vshrl.u32 %v2185_v2, 16  ;;  %v2156_v1 = vmax.f32 %v2146_v61, 0.0  ;;  %v2316_v30 = vshll.u32 %v2185_v2, 16 }
 0x222   : > { %v1909_v2 = vadd.f32 %v1891_v55, %v1783_v51 }
 0x223   : > { %v2222_v31 = vpack.c.b16 %v2213_v48, %v2212_v5  ;;  %v2315_v8 = vrot.slane %v2313_v16, 7  ;;  %v2166_v37 = vadd.f32 %v2156_v1, %v3333_v9 }
 0x224   : > { %v2112_v39 = vpop.f32.mrf.mxu0  ;;  %v2043_v48 = vadd.f32 %v2025_v19, %v1909_v2 }
 0x225   : > { %v2318_v62 = vor.u32 %v2316_v30, %v2315_v8  ;;  %v2176_v57 = vmul.f32 %v2166_v37, %v3324_v54  ;;  %v2133_v6 = vadd.f32 %v2112_v39, %v2041_v35  ;;  %2884 = vmatmul.msk.bf16.vlgmr.msrb.gmra.mxu1 %vm1240_vm11, %v2222_v31  ;;  %v2320_v17 = vrot.slane %v2315_v8, 4  ;;  %v1770_v39 = vpop.f32.mrf.mxu1 }
 0x226   : > { %v1785_v34 = vadd.f32 %v1770_v39, %v3704_v58 }
 0x227   : > { %v2319_v9 = vsel %vm3728_vm6, %v2311_v56, %v2318_v62  ;;  %v2186_v3 = vpack.c.bf16 %v2176_v57, %v2176_v57  ;;  %v2147_v13 = vadd.f32 %v3713_v18, %v2133_v6  ;;  %v1896_v57 = vpop.f32.mrf.mxu2 }
 0x228   : > { %2410 = vst.msk [vmem:[%s3236_s16 + $0x4] sm:$0xf] %vm977_vm4, %v2319_v9  ;;  %v1911_v0 = vadd.f32 %v1896_v57, %v1785_v34 }
 0x229   : > { %v2322_v25 = vshrl.u32 %v2186_v3, 16  ;;  %v2157_v40 = vmax.f32 %v2147_v13, 0.0  ;;  %v2325_v46 = vshll.u32 %v2186_v3, 16  ;;  %v2214_v27 = vunpack.c.l.b16 %v2186_v3 }
 0x22b   : > { %v2324_v11 = vrot.slane %v2322_v25, 7  ;;  %v2167_v54 = vadd.f32 %v2157_v40, %v3348_v32  ;;  %v2028_v32 = vpop.f32.mrf.mxu3 }
 0x22c   : > { %v2115_v26 = vpop.f32.mrf.mxu0 }
 0x22d   : > { %v2327_v29 = vor.u32 %v2325_v46, %v2324_v11  ;;  %v2177_v47 = vmul.f32 %v2167_v54, %v3345_v23  ;;  %v2134_v14 = vadd.f32 %v2115_v26, %v2042_v20  ;;  %v2329_v8 = vrot.slane %v2324_v11, 4 }
 0x22f   : > { %v2328_v36 = vsel %vm3728_vm6, %v2320_v17, %v2327_v29  ;;  %v2187_v21 = vpack.c.bf16 %v2177_v47, %v2177_v47  ;;  %v2148_v49 = vadd.f32 %v3713_v18, %v2134_v14  ;;  %v1899_v14 = vpop.f32.mrf.mxu2 }
 0x230   : > { %2411 = vst.msk [vmem:[%s3236_s16 + $0x8] sm:$0xf] %vm977_vm4, %v2328_v36 }
 0x231   : > { %v2331_v61 = vshrl.u32 %v2187_v21, 16  ;;  %v2158_v22 = vmax.f32 %v2148_v49, 0.0  ;;  %v2215_v5 = vunpack.c.l.b16 %v2187_v21  ;;  %v2334_v23 = vshll.u32 %v2187_v21, 16 }
 0x233   : > { %v2333_v16 = vrot.slane %v2331_v61, 7  ;;  %v2168_v1 = vadd.f32 %v2158_v22, %v3363_v63  ;;  %v2223_v35 = vpack.c.b16 %v2215_v5, %v2214_v27  ;;  %v1910_v63 = vadd.f32 %v1894_v7, %v1784_v10  ;;  %v2030_v9 = vpop.f32.mrf.mxu3 }
 0x234   : > { %v2117_v31 = vpop.f32.mrf.mxu0 }
 0x235   : > { %v2336_v30 = vor.u32 %v2334_v23, %v2333_v16  ;;  %v2178_v37 = vmul.f32 %v2168_v1, %v3358_v42  ;;  %v2135_v38 = vadd.f32 %v2117_v31, %v2043_v48  ;;  %2885 = vmatmul.msk.bf16.gmra.mxu1 %vm1240_vm11, %v2223_v35  ;;  %v2044_v19 = vadd.f32 %v2028_v32, %v1910_v63 }
 0x236   : > { %v2338_v40 = vrot.slane %v2333_v16, 4 }
 0x237   : > { %v2337_v55 = vsel %vm3728_vm6, %v2329_v8, %v2336_v30  ;;  %v2188_v56 = vpack.c.bf16 %v2178_v37, %v2178_v37  ;;  %v2149_v62 = vadd.f32 %v3713_v18, %v2135_v38  ;;  %v1901_v38 = vpop.f32.mrf.mxu2 }
 0x238   : > { %2412 = vst.msk [vmem:[%s3236_s16 + $0xc] sm:$0xf] %vm977_vm4, %v2337_v55 }
 0x239   : > { %v2340_v45 = vshrl.u32 %v2188_v56, 16  ;;  %v2159_v6 = vmax.f32 %v2149_v62, 0.0  ;;  %v2343_v3 = vshll.u32 %v2188_v56, 16  ;;  %v2216_v29 = vunpack.c.l.b16 %v2188_v56 }
 0x23b   : > { %v2342_v42 = vrot.slane %v2340_v45, 7  ;;  %v2169_v13 = vadd.f32 %v2159_v6, %v3392_v41  ;;  %v1773_v41 = vpop.f32.mrf.mxu1  ;;  %v2033_v61 = vpop.f32.mrf.mxu3 }
 0x23c   : > { %v2120_v25 = vpop.f32.mrf.mxu0  ;;  %v1786_v2 = vadd.f32 %v1773_v41, %v3706_v44 }
 0x23d   : > { %v2345_v20 = vor.u32 %v2343_v3, %v2342_v42  ;;  %v2179_v11 = vmul.f32 %v2169_v13, %v3383_v28  ;;  %v2136_v46 = vadd.f32 %v2120_v25, %v2044_v19  ;;  %v2045_v28 = vadd.f32 %v2030_v9, %v1911_v0 }
 0x23e   : > { %v2347_v22 = vrot.slane %v2342_v42, 4 }
 0x23f   : > { %v2346_v54 = vsel %vm3728_vm6, %v2338_v40, %v2345_v20  ;;  %v2189_v51 = vpack.c.bf16 %v2179_v11, %v2179_v11  ;;  %v2150_v26 = vadd.f32 %v3713_v18, %v2136_v46 }
 0x240   : > { %2413 = vst.msk [vmem:[%s3236_s16 + $0x10] sm:$0xf] %vm977_vm4, %v2346_v54 }
 0x241   : > { %v2349_v17 = vshrl.u32 %v2189_v51, 16  ;;  %v2160_v58 = vmax.f32 %v2150_v26, 0.0  ;;  %v2217_v47 = vunpack.c.l.b16 %v2189_v51  ;;  %v2352_v36 = vshll.u32 %v2189_v51, 16 }
 0x243   : > { %v2351_v7 = vrot.slane %v2349_v17, 7  ;;  %v2170_v21 = vadd.f32 %v2160_v58, %v3418_v24  ;;  %v2224_v49 = vpack.c.b16 %v2217_v47, %v2216_v29  ;;  %v1912_v24 = vadd.f32 %v1899_v14, %v1786_v2  ;;  %v1775_v35 = vpop.f32.mrf.mxu1  ;;  %v2035_v63 = vpop.f32.mrf.mxu3 }
 0x244   : > { %v2122_v32 = vpop.f32.mrf.mxu0  ;;  %v1787_v30 = vadd.f32 %v1775_v35, %v3708_v15 }
 0x245   : > { %v2354_v27 = vor.u32 %v2352_v36, %v2351_v7  ;;  %v2180_v5 = vmul.f32 %v2170_v21, %v3411_v4  ;;  %v2137_v48 = vadd.f32 %v2122_v32, %v2045_v28  ;;  %2886 = vmatmul.msk.bf16.gmra.mxu1 %vm1240_vm11, %v2224_v49  ;;  %v2046_v10 = vadd.f32 %v2033_v61, %v1912_v24 }
 0x246   : > { %v2356_v39 = vrot.slane %v2351_v7, 4  ;;  %v1913_v19 = vadd.f32 %v1901_v38, %v1787_v30 }
 0x247   : > { %v2355_v33 = vsel %vm3728_vm6, %v2347_v22, %v2354_v27  ;;  %v2190_v16 = vpack.c.bf16 %v2180_v5, %v2180_v5  ;;  %v2151_v23 = vadd.f32 %v3713_v18, %v2137_v48  ;;  %v2981_v48 = vld [vmem:[%s3846_s7] ss:$0 sm:$0xff] }
 0x248   : > { %2414 = vst.msk [vmem:[%s3236_s16 + $0x14] sm:$0xf] %vm977_vm4, %v2355_v33  ;;  %v2047_v3 = vadd.f32 %v2035_v63, %v1913_v19 }
 0x249   : > { %v2358_v1 = vshrl.u32 %v2190_v16, 16  ;;  %v2161_v44 = vmax.f32 %v2151_v23, 0.0  ;;  %v2361_v8 = vshll.u32 %v2190_v16, 16  ;;  %v2218_v15 = vunpack.c.l.b16 %v2190_v16 }
 0x24b   : > { %v2360_v31 = vrot.slane %v2358_v1, 7  ;;  %v2171_v4 = vadd.f32 %v2161_v44, %v3457_v12 }
 0x24c   : > { %v2125_v37 = vpop.f32.mrf.mxu0 }
 0x24d   : > { %v2363_v55 = vor.u32 %v2361_v8, %v2360_v31  ;;  %v2181_v56 = vmul.f32 %v2171_v4, %v3447_v53  ;;  %v2138_v62 = vadd.f32 %v2125_v37, %v2046_v10  ;;  %v2365_v20 = vrot.slane %v2360_v31, 4 }
 0x24f   : > { %v2364_v57 = vsel %vm3728_vm6, %v2356_v39, %v2363_v55  ;;  %v2191_v45 = vpack.c.bf16 %v2181_v56, %v2181_v56  ;;  %v2152_v6 = vadd.f32 %v3713_v18, %v2138_v62 }
 0x250   : > { %2415 = vst.msk [vmem:[%s3236_s16 + $0x18] sm:$0xf] %vm977_vm4, %v2364_v57 }
 0x251   : > { %v2367_v12 = vshrl.u32 %v2191_v45, 16  ;;  %v2162_v9 = vmax.f32 %v2152_v6, 0.0  ;;  %v2219_v42 = vunpack.c.l.b16 %v2191_v45  ;;  %v2370_v34 = vshll.u32 %v2191_v45, 16 }
 0x253   : > { %v2369_v13 = vrot.slane %v2367_v12, 7  ;;  %v2172_v53 = vadd.f32 %v2162_v9, %v3496_v59  ;;  %v2225_v25 = vpack.c.b16 %v2219_v42, %v2218_v15 }
 0x254   : > { %v2127_v40 = vpop.f32.mrf.mxu0 }
 0x255   : > { %v2372_v11 = vor.u32 %v2370_v34, %v2369_v13  ;;  %v2182_v46 = vmul.f32 %v2172_v53, %v3489_v52  ;;  %v2139_v54 = vadd.f32 %v2127_v40, %v2047_v3  ;;  %2887 = vmatmul.msk.bf16.gmra.mxu1 %vm1240_vm11, %v2225_v25  ;;  %v2374_v52 = vrot.slane %v2369_v13, 4 }
 0x257   : > { %v2373_v51 = vsel %vm3728_vm6, %v2365_v20, %v2372_v11  ;;  %v2192_v26 = vpack.c.bf16 %v2182_v46, %v2182_v46  ;;  %v2153_v0 = vadd.f32 %v3713_v18, %v2139_v54 }
 0x258   : > { %2416 = vst.msk [vmem:[%s3236_s16 + $0x1c] sm:$0xf] %vm977_vm4, %v2373_v51 }
 0x259   : > { %v2376_v41 = vshrl.u32 %v2192_v26, 16  ;;  %v2163_v59 = vmax.f32 %v2153_v0, 0.0  ;;  %v2379_v58 = vshll.u32 %v2192_v26, 16  ;;  %v2220_v36 = vunpack.c.l.b16 %v2192_v26 }
 0x25b   : > { %v2378_v17 = vrot.slane %v2376_v41, 7  ;;  %v2173_v29 = vadd.f32 %v2163_v59, %v3524_v50  ;;  %v2421_v50 = vld [vmem:[%s3236_s16 + $0x28] sm:$0x1] }
 0x25d   : > { %v2381_v47 = vor.u32 %v2379_v58, %v2378_v17  ;;  %v2183_v28 = vmul.f32 %v2173_v29, %v3520_v43  ;;  %v2383_v43 = vrot.slane %v2378_v17, 4 }
 0x25f   : > { %v2382_v14 = vsel %vm3728_vm6, %v2374_v52, %v2381_v47  ;;  %v2193_v7 = vpack.c.bf16 %v2183_v28, %v2183_v28 }
 0x260   : > { %2417 = vst.msk [vmem:[%s3236_s16 + $0x20] sm:$0xf] %vm977_vm4, %v2382_v14 }
 0x261   : > { %v2385_v18 = vshrl.u32 %v2193_v7, 16  ;;  %v2221_v21 = vunpack.c.l.b16 %v2193_v7  ;;  %v2388_v2 = vshll.u32 %v2193_v7, 16 }
 0x263   : > { %v2387_v49 = vrot.slane %v2385_v18, 7  ;;  %v2226_v32 = vpack.c.b16 %v2221_v21, %v2220_v36 }
 0x265   : > { %v2390_v61 = vor.u32 %v2388_v2, %v2387_v49  ;;  %v2392_v22 = vrot.slane %v2387_v49, 4  ;;  %2888 = vmatmul.msk.bf16.gmra.mxu1 %vm1240_vm11, %v2226_v32 }
 0x267   : > { %v2391_v27 = vsel %vm3728_vm6, %v2383_v43, %v2390_v61  ;;  %v2422_v5 = vsel %vm2420_vm8, %v2392_v22, %v2421_v50 }
 0x268   : > { %2418 = vst.msk [vmem:[%s3236_s16 + $0x24] sm:$0xf] %vm977_vm4, %v2391_v27 }
 0x269   : > { %2423 = vst [vmem:[%s3236_s16 + $0x28] sm:$0x1] %v2422_v5 }
 0x2a2   : > { %v2263_v60 = vpop.f32.mrf.mxu1 }
 0x2a3   : > { %v2264_v33 = vadd.f32 %v2981_v48, %v2263_v60 }
 0x2a5   : > { %2425 = vst.msk [vmem:[%s3814_s29] sm:$0xff] %vm2424_vm9, %v2264_v33 }
 0x2aa   : > { %v2265_v16 = vpop.f32.mrf.mxu1 }
 0x2ab   : > { %v2266_v23 = vadd.f32 %v2981_v48, %v2265_v16 }
 0x2ad   : > { %2426 = vst.msk [vmem:[%s3814_s29 + $0x8] sm:$0xff] %vm2424_vm9, %v2266_v23 }
 0x2b2   : > { %v2268_v24 = vpop.f32.mrf.mxu1 }
 0x2b3   : > { %v2269_v1 = vadd.f32 %v2981_v48, %v2268_v24 }
 0x2b5   : > { %2427 = vst.msk [vmem:[%s3814_s29 + $0x10] sm:$0xff] %vm2424_vm9, %v2269_v1 }
 0x2ba   : > { %v2270_v44 = vpop.f32.mrf.mxu1 }
 0x2bb   : > { %v2271_v35 = vadd.f32 %v2981_v48, %v2270_v44 }
 0x2bd   : > { %2428 = vst.msk [vmem:[%s3814_s29 + $0x18] sm:$0xff] %vm2424_vm9, %v2271_v35 }
 0x2c2   : > { %v2273_v10 = vpop.f32.mrf.mxu1 }
 0x2c3   : > { %v2274_v31 = vadd.f32 %v2981_v48, %v2273_v10 }
 0x2c5   : > { %2429 = vst.msk [vmem:[%s3814_s29 + $0x20] sm:$0xff] %vm2424_vm9, %v2274_v31 }
 0x2ca   : > { %v2275_v8 = vpop.f32.mrf.mxu1 }
 0x2cb   : > { %v2276_v4 = vadd.f32 %v2981_v48, %v2275_v8 }
 0x2cd   : > { %2430 = vst.msk [vmem:[%s3814_s29 + $0x28] sm:$0xff] %vm2424_vm9, %v2276_v4 }
 0x2d2   : > { %v2278_v30 = vpop.f32.mrf.mxu1 }
 0x2d3   : > { %v2279_v37 = vadd.f32 %v2981_v48, %v2278_v30 }
 0x2d5   : > { %2431 = vst.msk [vmem:[%s3814_s29 + $0x30] sm:$0xff] %vm2424_vm9, %v2279_v37 }
 0x2da   : > { %v2280_v38 = vpop.f32.mrf.mxu1 }
 0x2db   : > { %v2281_v39 = vadd.f32 %v2981_v48, %v2280_v38 }
 0x2dd   : > { %2432 = vst.msk [vmem:[%s3814_s29 + $0x38] sm:$0xff] %vm2424_vm9, %v2281_v39 }
 0x2e2   : > { %v2283_v55 = vpop.f32.mrf.mxu1 }
 0x2e3   : > { %v2284_v56 = vadd.f32 %v2981_v48, %v2283_v55 }
 0x2e5   : > { %2433 = vst.msk [vmem:[%s3814_s29 + $0x40] sm:$0xff] %vm2424_vm9, %v2284_v56 }
 0x2ea   : > { %v2285_v62 = vpop.f32.mrf.mxu1 }
 0x2eb   : > { %v2286_v63 = vadd.f32 %v2981_v48, %v2285_v62 }
 0x2ed   : > { %2434 = vst.msk [vmem:[%s3814_s29 + $0x48] sm:$0xff] %vm2424_vm9, %v2286_v63 }
 0x2ee PF: > { %s20_s30 = sadd.s32 1, %s2988_s30  }
 0x2ef   : > { %p17_p4 = scmp.ge.s32.totalorder %s20_s30, 4  }
 0x2f1   :  { %19 = sbr.rel (!%p17_p4) target bundleno = 1 (0x1), region = 105 }

// kernel: model_forward.5
= control target key start
LH: loop header
LB: loop body
LE: loop exit
PB: predicated region body
PF: predicated region fallthrough
CT: control target
= control target key end

     0   :  { %s2682_s16 = smov [#allocation5]   ;;  %s3297_s0 = inlined_call_operand.vmem [shape: s32[3,3], index: 0, kind: input, shape index: {}]   ;;  %s3298_s1 = inlined_call_operand.vmem [shape: bf16[2,90,32], index: 1, kind: input, shape index: {}]   ;;  %s3299_s2 = inlined_call_operand.vmem [shape: bf16[9,32,32], index: 2, kind: input, shape index: {}]   ;;  %s3300_s3 = inlined_call_operand.vmem [shape: f32[1,32], index: 3, kind: input, shape index: {}]   ;;  %s3301_s4 = inlined_call_operand.vmem [shape: bf16[3,32,32], index: 4, kind: input, shape index: {}]   ;;  %s3302_s5 = inlined_call_operand.vmem [shape: f32[1,32], index: 5, kind: input, shape index: {}]   ;;  %s3303_s6 = inlined_call_operand.vmem [shape: bf16[3,32,32], index: 6, kind: input, shape index: {}]   ;;  %s3304_s7 = inlined_call_operand.vmem [shape: f32[1,32], index: 7, kind: input, shape index: {}]   ;;  %s3305_s8 = inlined_call_operand.vmem [shape: bf16[32,256], index: 8, kind: input, shape index: {}]   ;;  %s3306_s9 = inlined_call_operand.vmem [shape: f32[1,256], index: 9, kind: input, shape index: {}]   ;;  %s3307_s10 = inlined_call_operand.hbm [shape: f32[3,8,256], index: 10, kind: output, shape index: {}]  }
   0x1   :  { %s16_s15 = sshll.u32 %s3297_s0, 4  ;;  %s17_s15 = int_to_ptr.vmem [resolvable:$true] %s16_s15 }
   0x2   :  { %19 = dma.vmem_to_smem %s17_s15, 64, %s2682_s16, [#allocation4] }
   0x3   :  { %2660 = dma.done.wait [#allocation4], 64 }
   0x4   :  { %2661 = vsyncadd [#allocation4], 4294967232 }
   0x5   :  { %22 = sfence }
   0x6   :  { %23 = vsyncpa [#allocation7], 0 }
   0x7   :  { %25 = vsyncpa [#allocation7 + $0x1], 0  ;;  %s2744_s17 = smov 0   ;;  %s2746_s18 = smov 0  }
   0x8   :  { %s2748_s19 = smov 0   ;;  %s2750_s20 = smov 0  }
   0x9 LB: > { %s2765_s0 = sadd.s32 4294967295, %s2680_s20   ;;  %s2155_s21 = sadd.s32 4294967294, %s2680_s20   ;;  %s2680_s20 = sphi %s2750_s20, %s3319_s20   ;;  %s2676_s19 = sphi %s2748_s19, %s3318_s19   ;;  %s2672_s18 = sphi %s2746_s18, %s3317_s18   ;;  %s2668_s17 = sphi %s2744_s17, %s3316_s17  }
   0xa   : > { %s2769_s22 = sadd.s32 1, %s2680_s20   ;;  %s244_s23 = sadd.s32 1, %s2676_s19 }
   0xb   : > { %s241_s24 = ssub.s32 %s2680_s20, %s2769_s22  ;;  %p254_p0 = scmp.ne.s32.totalorder %s2676_s19, %s2672_s18 }
   0xc   : > { %p242_p1 = scmp.eq.s32.totalorder %s241_s24, 0  ;;  %p255_p2 = scmp.eq.s32.totalorder %s2765_s0, 2 }
   0xd   : > { %p260_p3 = scmp.ne.s32.totalorder %s2672_s18, %s2668_s17  ;;  %p261_p4 = scmp.eq.s32.totalorder %s2155_s21, 2 }
   0xe   : > { %s2780_s25 = scalar_select %p242_p1, %s2676_s19, %s244_s23  }
   0xf   : > { %p2782_p5 = por %p255_p2, %p254_p0  ;;  %p2786_p6 = por %p261_p4, %p260_p3 }
  0x10   : > { %p2170_p7 = scmp.ge.s32.totalorder %s2680_s20, 1  ;;  %p323_p8 = scmp.lt.s32.totalorder %s2680_s20, 4 }
  0x12   : > { %p324_p9 = pnand %p2170_p7, %p323_p8 }
  0x13   : > { %s2172_s30 = sshll.u32 (!%p324_p9), %s2765_s0, 7  ;;  %s362_s14 = sand.u32 (!%p324_p9), 1, %s2672_s18  }
  0x14   : > { %327 = sbr.rel (%p324_p9) target bundleno = 876 (0x36c), region = 56  ;;  %s366_s11 = sld [smem:[#allocation5 + %s2172_s30]] (!%p324_p9) }
  0x15   : > { %s2171_s16 = sshll.u32 (!%p324_p9), %s362_s14, 4  ;;  %s2547_s21 = sshll.u32 (!%p324_p9), %s2765_s0, 4 }
  0x16   : > { %s2091_s28 = scalar_lea.hbm (!%p324_p9), %s3307_s10, %s2547_s21  ;;  %s364_s29 = scalar_lea.vmem (!%p324_p9), [#allocation6], %s2171_s16 }
  0x17   : > { %s2093_s30 = sshll.u32 (!%p324_p9), %s364_s29, 4  ;;  %s2095_s12 = sshll.u32 (!%p324_p9), %s2091_s28, 4  ;;  %s2094_s30 = int_to_ptr.vmem [resolvable:$true] %s2093_s30  ;;  %s2096_s12 = int_to_ptr.hbm [resolvable:$true] %s2095_s12 }
  0x18   : > { %s2080_s13 = scalar_lea.sflag (!%p324_p9), [#allocation7], %s362_s14  ;;  %s2630_s0 = sshra.s32 (!%p324_p9), %s2096_s12, 4  ;;  %s2631_s0 = int_to_ptr.hbm [resolvable:$true] %s2630_s0 }
  0x19   : > { %v2504_v0 = vld [vmem:[%s3299_s2 + $0x8] sm:$0xff]  ;;  %vm504_vm0 = vcmask 257024   ;;  %v2683_v1 = vmov 0   ;;  %v2503_v2 = vld [vmem:[%s3299_s2] sm:$0xff]  ;;  %v2506_v4 = vld [vmem:[%s3299_s2 + $0x18] sm:$0xff]  ;;  %vm2684_vm1 = vmmov 1   ;;  %p2637_p2 = scmp.lt.s32.totalorder %s2631_s0, %s3307_s10 }
  0x1a   : > { %505 = vst.msk [vmem:[#allocation2] sm:$0xf] %vm504_vm0, %v2683_v1  ;;  %778 = vmatpush.bf16.msra.mxu1 %v2504_v0  ;;  %v2508_v3 = vld [vmem:[%s3299_s2 + $0x28] sm:$0xff]  ;;  %722 = vmatpush.bf16.msra.mxu0 %v2506_v4  ;;  %v2507_v5 = vld [vmem:[%s3299_s2 + $0x20] sm:$0xff]  ;;  %v2505_v6 = vld [vmem:[%s3299_s2 + $0x10] sm:$0xff]  ;;  %p367_p10 = scmp.gt.s32.totalorder %s366_s11, 0 }
  0x1b   : > { %506 = vst.msk [vmem:[#allocation2 + $0x4] sm:$0xf] %vm504_vm0, %v2683_v1  ;;  %860 = vmatpush.bf16.msra.mxu2 %v2508_v3  ;;  %2555 = vmatpush.bf16.msra.mxu3 %v2506_v4  ;;  %p2173_p11 = scmp.lt.s32.totalorder %s366_s11, 1  ;;  %v2516_v7 = vld [vmem:[%s3299_s2 + $0x48] sm:$0xff]  ;;  %v2514_v8 = vld [vmem:[%s3299_s2 + $0x38] sm:$0xff]  ;;  %vm2845_vm2 = vmpackc.low %vm2684_vm1, %vm2684_vm1  ;;  %vm532_vm3 = vcmask 1040384  }
  0x1c   : > { %507 = vst.msk [vmem:[#allocation2 + $0x8] sm:$0xf] %vm504_vm0, %v2683_v1  ;;  %s3321_s11 = smov (!%p367_p10, %s366_s11), 0  ;;  %vm533_vm4 = vcmask 1044484   ;;  %vm581_vm5 = vcmask 257025   ;;  %v2513_v41 = vld [vmem:[%s3299_s2 + $0x30] sm:$0xff] }
  0x1d   : > { %508 = vst.msk [vmem:[#allocation2 + $0xc] sm:$0xf] %vm504_vm0, %v2683_v1  ;;  %s3323_s11 = smov (!%p2173_p11, %s3321_s11), 1  ;;  %vm2868_vm6 = vmor %vm532_vm3, %vm533_vm4  ;;  %vm700_vm7 = vcmask 261120   ;;  %vm815_vm8 = vcmask 1046528   ;;  %vm2685_vm10 = vmmov 0  }
  0x1e   : > { %779 = vmatpush.bf16.msra.mxu1 %v2503_v2  ;;  %509 = vst.msk [vmem:[#allocation2 + $0x10] sm:$0xf] %vm504_vm0, %v2683_v1  ;;  %723 = vmatpush.bf16.msra.mxu0 %v2505_v6  ;;  %p371_p12 = scmp.lt.s32.totalorder %s3323_s11, 1  ;;  %vm643_vm9 = vsmask.f32 7424  ;;  %vm2978_vm11 = vmpackc.low %vm2685_vm10, %vm2685_vm10  ;;  %vm1167_vm13 = vcmask 1045504  }
  0x1f   : > { %510 = vst.msk [vmem:[#allocation2 + $0x14] sm:$0xf] %vm504_vm0, %v2683_v1  ;;  %861 = vmatpush.bf16.msra.mxu2 %v2507_v5  ;;  %2556 = vmatpush.bf16.msra.mxu3 %v2505_v6  ;;  %vm1033_vm12 = vsmask.f32 6400  ;;  %vm1385_vm14 = vsmask.f32 5376 }
  0x20   : > { %511 = vst.msk [vmem:[#allocation2 + $0x18] sm:$0xf] %vm504_vm0, %v2683_v1  ;;  %s3325_s11 = smov (!%p371_p12, %s3323_s11), 1  ;;  %vm593_vm15 = vcmask 254976   ;;  %vm1663_vm1 = vcmask 1043456   ;;  %vm1752_vm3 = vcmask 257026  }
  0x21   : > { %512 = vst.msk [vmem:[#allocation2 + $0x1c] sm:$0xf] %vm504_vm0, %v2683_v1  ;;  %s2557_s15 = smul.u32 48, %s3325_s11  ;;  %v2553_v49 = vld [vmem:[#allocation2] sm:$0xe]  ;;  %s2636_s21 = scalar_lea.hbm %s3307_s10, 48 }
  0x22   : > { %513 = vst.msk [vmem:[#allocation2 + $0x20] sm:$0xf] %vm504_vm0, %v2683_v1  ;;  %1120 = vmatpush.bf16.msrb.mxu0 %v2516_v7 }
  0x23   : > { %514 = vst.msk [vmem:[#allocation2 + $0x24] sm:$0xf] %vm504_vm0, %v2683_v1  ;;  %986 = vmatpush.bf16.msrb.mxu3 %v2514_v8  ;;  %s2852_s23 = scalar_lea.vmem %s3298_s1, %s2557_s15  ;;  %s2632_s15 = scalar_lea.hbm %s2631_s0, 16 }
  0x24   : > { %515 = vst.msk [vmem:[#allocation2 + $0x28] sm:$0xf] %vm504_vm0, %v2683_v1  ;;  %v390_v10 = vld [vmem:[%s2852_s23] sm:$0xf]  ;;  %v391_v11 = vld [vmem:[%s2852_s23 + $0x4] sm:$0xf]  ;;  %p2633_p13 = scmp.ne.s32.totalorder %s2631_s0, %s2632_s15  ;;  %p2638_p3 = scmp.lt.s32.totalorder %s2636_s21, %s2632_s15 }
  0x25   : > { %516 = vst.msk [vmem:[#allocation2 + $0x2c] sm:$0xf] %vm504_vm0, %v2683_v1  ;;  %v392_v12 = vld [vmem:[%s2852_s23 + $0x8] sm:$0xf]  ;;  %v492_v13 = vsel %vm2845_vm2, %v390_v10, 0  ;;  %v493_v14 = vsel %vm2845_vm2, %v391_v11, 0 }
  0x26   : > { %517 = vst.msk [vmem:[#allocation2 + $0x30] sm:$0xf] %vm504_vm0, %v2683_v1  ;;  %v494_v15 = vsel %vm2845_vm2, %v392_v12, 0  ;;  %v396_v16 = vld [vmem:[%s2852_s23 + $0x18] sm:$0xf]  ;;  %v535_v17 = vrot.slane %v492_v13, 7  ;;  %p2634_p0 = pnand %p2633_p13, %p2782_p5  ;;  %p2639_p4 = por %p2638_p3, %p2637_p2 }
  0x27   : > { %1744 = vst.msk [vmem:[#allocation3] sm:$0xf] %vm504_vm0, %v2683_v1  ;;  %v537_v18 = vrot.slane %v493_v14, 7  ;;  %v540_v19 = vrot.slane %v494_v15, 7  ;;  %v397_v20 = vld [vmem:[%s2852_s23 + $0x1c] sm:$0xf]  ;;  %987 = vmatpush.bf16.msrb.mxu3 %v2513_v41 }
  0x28   : > { %v498_v21 = vsel %vm2845_vm2, %v396_v16, 0  ;;  %v398_v23 = vld [vmem:[%s2852_s23 + $0x20] sm:$0xf]  ;;  %v399_v24 = vld [vmem:[%s2852_s23 + $0x24] sm:$0xf]  ;;  %v499_v25 = vsel %vm2845_vm2, %v397_v20, 0  ;;  %p2635_p1 = pneg %p2634_p0 }
  0x29   : > { %v552_v26 = vrot.slane %v498_v21, 7  ;;  %v536_v27 = vrot.slane %v535_v17, 4  ;;  %v539_v28 = vrot.slane %v537_v18, 4  ;;  %582 = vst.msk [vmem:[#allocation2 + $0x4] sm:$0xe] %vm581_vm5, %v535_v17  ;;  %v500_v29 = vsel %vm2845_vm2, %v398_v23, 0 }
  0x2a   : > { %v501_v30 = vsel %vm2845_vm2, %v399_v24, 0  ;;  %v555_v32 = vrot.slane %v499_v25, 7  ;;  %v558_v33 = vrot.slane %v500_v29, 7  ;;  %v393_v35 = vld [vmem:[%s2852_s23 + $0xc] sm:$0xf]  ;;  %v542_v40 = vrot.slane %v540_v19, 4  ;;  %p2640_p7 = pnand %p2639_p4, %p2635_p1 }
  0x2b   : > { %v554_v31 = vrot.slane %v552_v26, 4  ;;  %v2880_v34 = vrot.slane %v501_v30, 7  ;;  %v538_v36 = vsel %vm2868_vm6, %v536_v27, %v537_v18  ;;  %v541_v37 = vsel %vm2868_vm6, %v539_v28, %v540_v19  ;;  %v394_v38 = vld [vmem:[%s2852_s23 + $0x10] sm:$0xf]  ;;  %v395_v48 = vld [vmem:[%s2852_s23 + $0x14] sm:$0xf] }
  0x2c   : > { %v495_v39 = vsel %vm2845_vm2, %v393_v35, 0  ;;  %583 = vst.msk [vmem:[#allocation2 + $0x8] sm:$0xf] %vm504_vm0, %v538_v36  ;;  %v557_v43 = vrot.slane %v555_v32, 4  ;;  %v560_v44 = vrot.slane %v558_v33, 4  ;;  %v496_v45 = vsel %vm2845_vm2, %v394_v38, 0 }
  0x2d   : > { %v556_v42 = vsel %vm2868_vm6, %v554_v31, %v555_v32  ;;  %584 = vst.msk [vmem:[#allocation2 + $0xc] sm:$0xf] %vm504_vm0, %v541_v37  ;;  %v543_v46 = vrot.slane %v495_v39, 7  ;;  %v546_v47 = vrot.slane %v496_v45, 7  ;;  %v497_v52 = vsel %vm2845_vm2, %v395_v48, 0  ;;  %v2515_v19 = vld [vmem:[%s3299_s2 + $0x40] sm:$0xff] }
  0x2e   : > { %v559_v50 = vsel %vm2868_vm6, %v557_v43, %v558_v33  ;;  %v562_v51 = vsel %vm2868_vm6, %v560_v44, %v2880_v34  ;;  %589 = vst.msk [vmem:[#allocation2 + $0x20] sm:$0xf] %vm504_vm0, %v556_v42  ;;  %v549_v56 = vrot.slane %v497_v52, 7  ;;  %1121 = vmatpush.bf16.msrb.mxu0 %v2515_v19  ;;  %v2518_v48 = vld [vmem:[%s3299_s2 + $0x58] sm:$0xff]  ;;  %vm1680_vm2 = vcmask 1041408  }
  0x2f   : > { %590 = vst.msk [vmem:[#allocation2 + $0x24] sm:$0xf] %vm504_vm0, %v559_v50  ;;  %v544_v53 = vsel %vm2868_vm6, %v542_v40, %v543_v46  ;;  %v545_v54 = vrot.slane %v543_v46, 4  ;;  %v548_v55 = vrot.slane %v546_v47, 4  ;;  %v2524_v46 = vld [vmem:[%s3299_s2 + $0x68] sm:$0xff]  ;;  %1212 = vmatpush.bf16.msrb.mxu1 %v2518_v48 }
  0x30   : > { %v2549_v57 = vld [vmem:[#allocation2] sm:$0xff]   ;;  %591 = vst.msk [vmem:[#allocation2 + $0x28] sm:$0xf] %vm504_vm0, %v562_v51  ;;  %v551_v0 = vrot.slane %v549_v56, 4  ;;  %1338 = vmatpush.bf16.msrb.mxu2 %v2524_v46 }
  0x31   : > { %v2552_v58 = vld [vmem:[#allocation2] sm:$0xf0]  ;;  %v647_v59 = vshll.u32 %v2549_v57, 16  ;;  %2226 = vmatmul.msk.bf16.vlgmr.msra.gmra.mxu1 %vm700_vm7, %v2549_v57  ;;  %v547_v61 = vsel %vm2868_vm6, %v545_v54, %v546_v47  ;;  %585 = vst.msk [vmem:[#allocation2 + $0x10] sm:$0xf] %vm504_vm0, %v544_v53  ;;  %v645_v62 = vshrl.u32 %v2549_v57, 16  ;;  %v550_v63 = vsel %vm2868_vm6, %v548_v55, %v549_v56 }
  0x32   : > { %v2554_v60 = vor.u32 %v2553_v49, %v2552_v58  ;;  %586 = vst.msk [vmem:[#allocation2 + $0x14] sm:$0xf] %vm504_vm0, %v547_v61  ;;  %v553_v5 = vsel %vm2868_vm6, %v551_v0, %v552_v26  ;;  %v898_v25 = vld [vmem:[#allocation2 + $0x4] sm:$0xe]  ;;  %v2526_v47 = vld [vmem:[%s3299_s2 + $0x78] sm:$0xff]  ;;  %v2528_v56 = vld [vmem:[%s3299_s2 + $0x88] sm:$0xff] }
  0x33   : > { %v649_v2 = vrot.slane %v647_v59, 1  ;;  %587 = vst.msk [vmem:[#allocation2 + $0x18] sm:$0xf] %vm504_vm0, %v550_v63  ;;  %v925_v31 = vunpack.c.l.b16 %v898_v25  ;;  %v400_v57 = vld [vmem:[%s2852_s23 + $0x28] sm:$0xf]  ;;  %v563_v61 = vrot.slane %v2880_v34, 4 }
  0x34   : > { %v2499_v3 = vld [vmem:[#allocation2 + $0x8] sm:$0xff]  ;;  %v816_v4 = vrot.slane %v2554_v60, 1  ;;  %588 = vst.msk [vmem:[#allocation2 + $0x1c] sm:$0xf] %vm504_vm0, %v553_v5  ;;  %v502_v60 = vsel %vm2978_vm11, %v400_v57, 0  ;;  %v2517_v0 = vld [vmem:[%s3299_s2 + $0x50] sm:$0xff] }
  0x35   : > { %v650_v6 = vor.u32 %v649_v2, %v645_v62  ;;  %v817_v7 = vrot.slane %v2499_v3, 1  ;;  %v652_v8 = vshll.u32 %v2499_v3, 16  ;;  %v2940_v26 = vld [vmem:[#allocation2 + $0x8] sm:$0xff]   ;;  %v656_v28 = vshrl.u32 %v2499_v3, 16  ;;  %v2523_v2 = vld [vmem:[%s3299_s2 + $0x60] sm:$0xff]  ;;  %1213 = vmatpush.bf16.msrb.mxu1 %v2517_v0 }
  0x36   : > { %v2923_v9 = vld [vmem:[#allocation2 + $0x20] sm:$0xff]  ;;  %v926_v32 = vunpack.c.l.b16 %v2940_v26  ;;  %v2986_v62 = vrot.slane %v502_v60, 7  ;;  %1339 = vmatpush.bf16.msrb.mxu2 %v2523_v2  ;;  %1745 = vst.msk [vmem:[#allocation3 + $0x4] sm:$0x3] %vm593_vm15, %v2683_v1 }
  0x37   : > { %v609_v10 = vld [vmem:[#allocation2 + $0x28] sm:$0x1]  ;;  %v818_v11 = vsel %vm815_vm8, %v816_v4, %v817_v7  ;;  %v654_v12 = vrot.slane %v652_v8, 1  ;;  %v676_v14 = vshll.u32 %v2923_v9, 16  ;;  %v680_v15 = vshrl.u32 %v2923_v9, 16  ;;  %v2527_v46 = vld [vmem:[%s3299_s2 + $0x80] sm:$0xff] }
  0x38   : > { %v636_v13 = vunpack.c.l.b16 %v609_v10  ;;  %2243 = vmatmul.msk.bf16.vlgmr.msra.gmra.mxu2 %vm700_vm7, %v818_v11  ;;  %v2947_v37 = vld [vmem:[#allocation2 + $0xc] sm:$0xff]  ;;  %v936_v38 = vpack.c.b16 %v926_v32, %v925_v31  ;;  %v823_v34 = vrot.slane %v2923_v9, 1 }
  0x39   : > { %v655_v16 = vsel %vm643_vm9, %v650_v6, %v654_v12  ;;  %v2932_v18 = vrot.slane %v676_v14, 1  ;;  %v2500_v23 = vld [vmem:[#allocation2 + $0x10] sm:$0xff]  ;;  %v658_v33 = vor.u32 %v656_v28, %v654_v12  ;;  %v943_v41 = vrot.slane %v2947_v37, 1 }
  0x3a   : > { %v2930_v17 = vpack.c.b16 %v636_v13, %v636_v13  ;;  %2213 = vmatmul.msk.bf16.vlgmr.msra.gmra.mxu0 %vm700_vm7, %v655_v16  ;;  %v660_v29 = vshll.u32 %v2500_v23, 16  ;;  %v819_v30 = vrot.slane %v2500_v23, 1  ;;  %v942_v40 = vrot.slane %v936_v38, 1  ;;  %v2968_v53 = vld [vmem:[#allocation2 + $0x14] sm:$0xff] }
  0x3b   : > { %v682_v20 = vor.u32 %v680_v15, %v2932_v18  ;;  %v2501_v42 = vld [vmem:[#allocation2 + $0x18] sm:$0xff]  ;;  %v664_v44 = vshrl.u32 %v2500_v23, 16  ;;  %v945_v55 = vrot.slane %v2968_v53, 1  ;;  %1564 = vmatpush.bf16.msra.mxu0 %v2528_v56  ;;  %v1035_v10 = vshrl.u32 %v936_v38, 16  ;;  %v1158_v15 = vld [vmem:[#allocation2 + $0x4] sm:$0xc] }
  0x3c   : > { %v684_v21 = vshll.u32 %v2930_v17, 16  ;;  %v662_v35 = vrot.slane %v660_v29, 1  ;;  %v820_v36 = vsel %vm815_vm8, %v817_v7, %v819_v30  ;;  %v944_v43 = vsel %vm815_vm8, %v942_v40, %v943_v41  ;;  %v3002_v6 = vld [vmem:[#allocation2 + $0x1c] sm:$0xff] }
  0x3d   : > { %v668_v45 = vshll.u32 %v2501_v42, 16  ;;  %v821_v49 = vrot.slane %v2501_v42, 1  ;;  %v946_v59 = vsel %vm815_vm8, %v943_v41, %v945_v55  ;;  %v672_v63 = vshrl.u32 %v2501_v42, 16 }
  0x3e   : > { %v686_v24 = vrot.slane %v684_v21, 1  ;;  %v663_v39 = vsel %vm643_vm9, %v658_v33, %v662_v35  ;;  %v666_v50 = vor.u32 %v664_v44, %v662_v35  ;;  %v947_v8 = vrot.slane %v3002_v6, 1 }
  0x3f   : > { %v670_v51 = vrot.slane %v668_v45, 1  ;;  %v822_v52 = vsel %vm815_vm8, %v819_v30, %v821_v49  ;;  %v824_v5 = vsel %vm815_vm8, %v821_v49, %v823_v34  ;;  %v1038_v11 = vshll.u32 %v936_v38, 16  ;;  %v1250_v30 = vld [vmem:[#allocation2 + $0x8] sm:$0xc]  ;;  %1565 = vmatpush.bf16.msra.mxu0 %v2527_v46 }
  0x40   : > { %v687_v27 = vsel %vm643_vm9, %v682_v20, %v686_v24  ;;  %v1043_v12 = vshrl.u32 %v2947_v37, 16  ;;  %v1046_v13 = vshll.u32 %v2947_v37, 16  ;;  %v948_v14 = vsel %vm815_vm8, %v945_v55, %v947_v8 }
  0x41   : > { %2217 = vmatmul.msk.bf16.vlgmr.msra.gmra.mxu3 %vm700_vm7, %v687_v27  ;;  %2227 = vmatmul.msk.bf16.gmra.mxu1 %vm700_vm7, %v2499_v3  ;;  %v671_v54 = vsel %vm643_vm9, %v666_v50, %v670_v51  ;;  %v565_v3 = vsel %vm2868_vm6, %v563_v61, %v2986_v62  ;;  %v674_v4 = vor.u32 %v672_v63, %v670_v51  ;;  %v1037_v16 = vrot.slane %v1035_v10, 1  ;;  %v3016_v27 = vld [vmem:[#allocation2 + $0x24] sm:$0xff]  ;;  %v3053_v63 = vld [vmem:[#allocation2 + $0x18] sm:$0xff] }
  0x42   : > { %1472 = vmatpush.bf16.msra.mxu3 %v2526_v47  ;;  %592 = vst.msk [vmem:[#allocation2 + $0x2c] sm:$0xf] %vm504_vm0, %v565_v3  ;;  %v1040_v19 = vrot.slane %v1038_v11, 2  ;;  %v1045_v20 = vrot.slane %v1043_v12, 1  ;;  %v1048_v21 = vrot.slane %v1046_v13, 2  ;;  %v1169_v35 = vrot.slane %v2947_v37, 2 }
  0x43   : > { %v679_v7 = vsel %vm643_vm9, %v674_v4, %v2932_v18  ;;  %v825_v18 = vrot.slane %v2930_v17, 1  ;;  %v2525_v17 = vld [vmem:[%s3299_s2 + $0x70] sm:$0xff]  ;;  %v1278_v38 = vunpack.c.h.b16 %v2940_v26  ;;  %v1171_v56 = vrot.slane %v2968_v53, 2 }
  0x44   : > { %v1041_v24 = vor.u32 %v1040_v19, %v1037_v16  ;;  %v1049_v25 = vor.u32 %v1048_v21, %v1045_v20  ;;  %v1061_v57 = vshrl.u32 %v3002_v6, 16  ;;  %v1173_v21 = vrot.slane %v3002_v6, 2 }
  0x45   : > { %v826_v28 = vsel %vm815_vm8, %v823_v34, %v825_v18  ;;  %v1172_v61 = vsel %vm1167_vm13, %v1169_v35, %v1171_v56  ;;  %v1297_v34 = vrot.slane %v3053_v63, 2  ;;  %v566_v18 = vrot.slane %v2986_v62, 4 }
  0x46   : > { %v1050_v31 = vsel %vm1033_vm12, %v1041_v24, %v1049_v25  ;;  %1473 = vmatpush.bf16.msra.mxu3 %v2525_v17  ;;  %v1063_v0 = vrot.slane %v1061_v57, 1  ;;  %v1070_v24 = vshrl.u32 %v3016_v27, 16  ;;  %v1407_v17 = vshll.u32 %v3053_v63, 16 }
  0x47   : > { %vm1519_vm0 = vcmask 1044480  }
  0x48   : > { %2244 = vmatmul.msk.bf16.gmra.mxu2 %vm700_vm7, %v820_v36  ;;  %v1277_v36 = vunpack.c.l.b16 %v1250_v30  ;;  %v1072_v62 = vrot.slane %v1070_v24, 1 }
  0x49   : > { %v1024_v22 = vld [vmem:[#allocation2 + $0x2c] sm:$0x3] }
  0x4a   : > { %2214 = vmatmul.msk.bf16.gmra.mxu0 %vm700_vm7, %v663_v39  ;;  %v1055_v39 = vshll.u32 %v2968_v53, 16  ;;  %v1288_v37 = vpack.c.b16 %v1278_v38, %v1277_v36 }
  0x4c   : > { %v1057_v45 = vrot.slane %v1055_v39, 2  ;;  %v1294_v47 = vrot.slane %v1288_v37, 2  ;;  %v1390_v3 = vshll.u32 %v1288_v37, 16  ;;  %v1409_v39 = vrot.slane %v1407_v17, 3 }
  0x4e   : > { %v1392_v10 = vrot.slane %v1390_v3, 3 }
  0x51   : > { %2276 = vmatmul.msk.bf16.vlgmr.msrb.gmra.mxu3 %vm700_vm7, %v944_v43  ;;  %2228 = vmatmul.msk.bf16.gmra.mxu1 %vm700_vm7, %v2500_v23  ;;  %v1165_v23 = vunpack.c.l.b16 %v1158_v15  ;;  %v908_v43 = vld [vmem:[#allocation2 + $0x2c] sm:$0x1] }
  0x52   : > { %v935_v49 = vunpack.c.l.b16 %v908_v43  ;;  %v401_v15 = vld [vmem:[%s2852_s23 + $0x2c] sm:$0x1] }
  0x53   : > { %v1166_v29 = vpack.c.b16 %v926_v32, %v1165_v23  ;;  %v1052_v32 = vshrl.u32 %v2968_v53, 16  ;;  %v1387_v53 = vshrl.u32 %v1288_v37, 16  ;;  %v503_v19 = vsel %vm2978_vm11, %v401_v15, 0 }
  0x54   : > { %v567_v23 = vrot.slane %v503_v19, 7  ;;  %v1175_v37 = vrot.slane %v3016_v27, 2 }
  0x55   : > { %v1168_v33 = vrot.slane %v1166_v29, 2  ;;  %v1054_v44 = vrot.slane %v1052_v32, 1  ;;  %v3076_v29 = vld [vmem:[#allocation2 + $0x20] sm:$0xff] }
  0x57   : > { %v1170_v41 = vsel %vm1167_vm13, %v1168_v33, %v1169_v35  ;;  %v1058_v50 = vor.u32 %v1057_v45, %v1054_v44  ;;  %v1031_v35 = vunpack.c.l.b16 %v1024_v22 }
  0x58   : > { %2245 = vmatmul.msk.bf16.gmra.mxu2 %vm700_vm7, %v822_v52  ;;  %v941_v52 = vpack.c.b16 %v935_v49, %v935_v49 }
  0x5a   : > { %2215 = vmatmul.msk.bf16.gmra.mxu0 %vm700_vm7, %v671_v54  ;;  %v1059_v54 = vsel %vm1033_vm12, %v1049_v25, %v1058_v50  ;;  %v951_v55 = vrot.slane %v941_v52, 1  ;;  %v1073_v25 = vshll.u32 %v3016_v27, 16  ;;  %v1416_v52 = vshll.u32 %v3076_v29, 16 }
  0x5c   : > { %v1075_v30 = vrot.slane %v1073_v25, 2 }
  0x5e   : > { %v1076_v33 = vor.u32 %v1075_v30, %v1072_v62 }
  0x61   : > { %2277 = vmatmul.msk.bf16.gmra.mxu3 %vm700_vm7, %v946_v59  ;;  %2229 = vmatmul.msk.bf16.gmra.mxu1 %vm700_vm7, %v2501_v42  ;;  %v3034_v42 = vld [vmem:[#allocation2 + $0x10] sm:$0xff]  ;;  %v1064_v59 = vshll.u32 %v3002_v6, 16  ;;  %v1174_v6 = vsel %vm1167_vm13, %v1171_v56, %v1173_v21 }
  0x62   : > { %v1295_v48 = vrot.slane %v3034_v42, 2  ;;  %v1395_v4 = vshrl.u32 %v3034_v42, 16  ;;  %v1521_v24 = vrot.slane %v3034_v42, 3 }
  0x63   : > { %v1066_v2 = vrot.slane %v1064_v59, 2  ;;  %v1418_v59 = vrot.slane %v1416_v52, 3 }
  0x64   : > { %v1296_v51 = vsel %vm1167_vm13, %v1294_v47, %v1295_v48  ;;  %v1298_v11 = vsel %vm1167_vm13, %v1295_v48, %v1297_v34  ;;  %v1397_v12 = vrot.slane %v1395_v4, 2  ;;  %v1176_v47 = vsel %vm1167_vm13, %v1173_v21, %v1175_v37  ;;  %v3092_v48 = vld [vmem:[#allocation2 + $0x28] sm:$0xff] }
  0x65   : > { %v1422_v19 = vshrl.u32 %v3092_v48, 16 }
  0x68   : > { %2246 = vmatmul.msk.bf16.gmra.mxu2 %vm700_vm7, %v824_v5  ;;  %v1398_v5 = vshll.u32 %v3034_v42, 16 }
  0x6a   : > { %2216 = vmatmul.msk.bf16.gmra.mxu0 %vm700_vm7, %v679_v7  ;;  %v1067_v7 = vor.u32 %v1066_v2, %v1063_v0  ;;  %v1400_v13 = vrot.slane %v1398_v5, 3 }
  0x6c   : > { %v1401_v20 = vor.u32 %v1400_v13, %v1397_v12  ;;  %v1077_v1 = vsel %vm1033_vm12, %v1067_v7, %v1076_v33 }
  0x71   : > { %2278 = vmatmul.msk.bf16.gmra.mxu3 %vm700_vm7, %v948_v14  ;;  %2230 = vmatmul.msk.bf16.gmra.mxu1 %vm700_vm7, %v2923_v9  ;;  %v949_v9 = vrot.slane %v3016_v27, 1  ;;  %v1068_v14 = vsel %vm1033_vm12, %v1058_v50, %v1067_v7  ;;  %v1413_v27 = vshrl.u32 %v3076_v29, 16 }
  0x73   : > { %v950_v40 = vsel %vm815_vm8, %v947_v8, %v949_v9  ;;  %v952_v60 = vsel %vm815_vm8, %v949_v9, %v951_v55  ;;  %v1389_v8 = vrot.slane %v1387_v53, 2  ;;  %v1404_v9 = vshrl.u32 %v3053_v63, 16  ;;  %v1510_v53 = vld [vmem:[#allocation2 + $0x8] sm:$0x8] }
  0x74   : > { %v1415_v57 = vrot.slane %v1413_v27, 2  ;;  %v1517_v7 = vunpack.c.l.b16 %v1510_v53 }
  0x75   : > { %v1393_v16 = vor.u32 %v1392_v10, %v1389_v8  ;;  %v1406_v32 = vrot.slane %v1404_v9, 2 }
  0x76   : > { %v1419_v3 = vor.u32 %v1418_v59, %v1415_v57  ;;  %v1518_v15 = vpack.c.b16 %v1278_v38, %v1517_v7  ;;  %v1424_v38 = vrot.slane %v1422_v19, 2 }
  0x77   : > { %v1402_v58 = vsel %vm1385_vm14, %v1393_v16, %v1401_v20 }
  0x78   : > { %2247 = vmatmul.msk.bf16.gmra.mxu2 %vm700_vm7, %v826_v28  ;;  %v568_v28 = vsel %vm2868_vm6, %v566_v18, %v567_v23  ;;  %v1520_v23 = vrot.slane %v1518_v15, 3 }
  0x79   : > { %594 = vst.msk [vmem:[#allocation2 + $0x30] sm:$0x3] %vm593_vm15, %v568_v28 }
  0x7a   : > { %2293 = vmatmul.msk.bf16.vlgmr.msrb.gmra.mxu0 %vm700_vm7, %v1050_v31  ;;  %v1299_v31 = vrot.slane %v3076_v29, 2  ;;  %v1522_v62 = vsel %vm1519_vm0, %v1520_v23, %v1521_v24 }
  0x7c   : > { %v1300_v36 = vsel %vm1167_vm13, %v1297_v34, %v1299_v31 }
  0x81   : > { %2279 = vmatmul.msk.bf16.gmra.mxu3 %vm700_vm7, %v950_v40  ;;  %2310 = vmatmul.msk.bf16.vlgmr.msrb.gmra.mxu1 %vm700_vm7, %v1170_v41  ;;  %v1032_v40 = vpack.c.b16 %v1031_v35, %v1031_v35  ;;  %v1410_v41 = vor.u32 %v1409_v39, %v1406_v32 }
  0x83   : > { %v1079_v43 = vshrl.u32 %v1032_v40, 16  ;;  %v1082_v44 = vshll.u32 %v1032_v40, 16  ;;  %v1411_v45 = vsel %vm1385_vm14, %v1401_v20, %v1410_v41  ;;  %v1177_v34 = vrot.slane %v1032_v40, 2 }
  0x84   : > { %v1420_v10 = vsel %vm1385_vm14, %v1410_v41, %v1419_v3  ;;  %v1425_v20 = vshll.u32 %v3092_v48, 16 }
  0x85   : > { %v1081_v49 = vrot.slane %v1079_v43, 1  ;;  %v1084_v50 = vrot.slane %v1082_v44, 2  ;;  %v1178_v12 = vsel %vm1167_vm13, %v1175_v37, %v1177_v34  ;;  %v1523_v43 = vrot.slane %v3053_v63, 3 }
  0x86   : > { %v1427_v28 = vrot.slane %v1425_v20, 3 }
  0x88   : > { %2343 = vmatmul.msk.bf16.vlgmr.msrb.gmra.mxu2 %vm700_vm7, %v1296_v51  ;;  %v1301_v51 = vrot.slane %v3092_v48, 2  ;;  %v1428_v22 = vor.u32 %v1427_v28, %v1424_v38 }
  0x8a   : > { %2294 = vmatmul.msk.bf16.gmra.mxu0 %vm700_vm7, %v1059_v54  ;;  %v1085_v54 = vor.u32 %v1084_v50, %v1081_v49  ;;  %v1302_v56 = vsel %vm1167_vm13, %v1299_v31, %v1301_v51 }
  0x8c   : > { %v1086_v0 = vsel %vm1033_vm12, %v1076_v33, %v1085_v54  ;;  %v1429_v33 = vsel %vm1385_vm14, %v1419_v3, %v1428_v22 }
  0x91   : > { %2280 = vmatmul.msk.bf16.gmra.mxu3 %vm700_vm7, %v952_v60  ;;  %2311 = vmatmul.msk.bf16.gmra.mxu1 %vm700_vm7, %v1172_v61  ;;  %v1260_v60 = vld [vmem:[#allocation2 + $0x30] sm:$0x3] }
  0x92   : > { %v1287_v4 = vunpack.c.l.b16 %v1260_v60 }
  0x94   : > { %v1293_v13 = vpack.c.b16 %v1287_v4, %v1287_v4 }
  0x96   : > { %v1303_v16 = vrot.slane %v1293_v13, 2 }
  0x98   : > { %2344 = vmatmul.msk.bf16.gmra.mxu2 %vm700_vm7, %v1298_v11  ;;  %v1304_v26 = vsel %vm1167_vm13, %v1301_v51, %v1303_v16  ;;  %v1524_v51 = vsel %vm1519_vm0, %v1521_v24, %v1523_v43  ;;  %v1527_v24 = vrot.slane %v3092_v48, 3 }
  0x9a   : > { %2295 = vmatmul.msk.bf16.gmra.mxu0 %vm700_vm7, %v1068_v14 }
  0xa1   : > { %2360 = vmatmul.msk.bf16.vlgmr.msra.gmra.mxu3 %vm700_vm7, %v1402_v58  ;;  %2312 = vmatmul.msk.bf16.gmra.mxu1 %vm700_vm7, %v1174_v6  ;;  %v1376_v58 = vld [vmem:[#allocation2 + $0x30] sm:$0x7] }
  0xa2   : > { %v1383_v31 = vunpack.c.l.b16 %v1376_v58 }
  0xa8   : > { %2345 = vmatmul.msk.bf16.gmra.mxu2 %vm700_vm7, %v1300_v36  ;;  %v3123_v36 = vpack.c.b16 %v1383_v31, %v1383_v31 }
  0xaa   : > { %2296 = vmatmul.msk.bf16.gmra.mxu0 %vm700_vm7, %v1077_v1  ;;  %v1431_v1 = vshrl.u32 %v3123_v36, 16  ;;  %v1434_v40 = vshll.u32 %v3123_v36, 16  ;;  %v1529_v48 = vrot.slane %v3123_v36, 3 }
  0xac   : > { %v1436_v49 = vrot.slane %v1434_v40, 3  ;;  %v1530_v40 = vsel %vm1519_vm0, %v1527_v24, %v1529_v48 }
  0xae   : > { %v781_v46 = vpop.f32.mrf.mxu1 }
  0xb1   : > { %2361 = vmatmul.msk.bf16.gmra.mxu3 %vm700_vm7, %v1411_v45  ;;  %2313 = vmatmul.msk.bf16.gmra.mxu1 %vm700_vm7, %v1176_v47  ;;  %v1433_v47 = vrot.slane %v1431_v1, 2 }
  0xb3   : > { %v1437_v54 = vor.u32 %v1436_v49, %v1433_v47 }
  0xb5   : > { %v1438_v63 = vsel %vm1385_vm14, %v1428_v22, %v1437_v54 }
  0xb6   : > { %v3099_v55 = vpop.f32.mrf.mxu1 }
  0xb7   : > { %v725_v61 = vpop.f32.mrf.mxu0 }
  0xb8   : > { %v782_v2 = vadd.f32 %v781_v46, %v725_v61  ;;  %2346 = vmatmul.msk.bf16.gmra.mxu2 %vm700_vm7, %v1302_v56 }
  0xba   : > { %2297 = vmatmul.msk.bf16.gmra.mxu0 %vm700_vm7, %v1086_v0 }
  0xbb   : > { %v863_v5 = vpop.f32.mrf.mxu2 }
  0xbc   : > { %v888_v8 = vadd.f32 %v863_v5, %v782_v2 }
  0xbe   : > { %v786_v11 = vpop.f32.mrf.mxu1 }
  0xbf   : > { %v727_v14 = vpop.f32.mrf.mxu0 }
  0xc0   : > { %v784_v27 = vadd.f32 %v3099_v55, %v727_v14  ;;  %v1525_v55 = vrot.slane %v3076_v29, 3 }
  0xc1   : > { %2362 = vmatmul.msk.bf16.gmra.mxu3 %vm700_vm7, %v1420_v10  ;;  %2314 = vmatmul.msk.bf16.gmra.mxu1 %vm700_vm7, %v1178_v12 }
  0xc2   : > { %v1526_v10 = vsel %vm1519_vm0, %v1523_v43, %v1525_v55  ;;  %v1528_v28 = vsel %vm1519_vm0, %v1525_v55, %v1527_v24 }
  0xc3   : > { %v865_v18 = vpop.f32.mrf.mxu2 }
  0xc4   : > { %v3113_v21 = vpop.f32.mrf.mxu3  ;;  %v889_v56 = vadd.f32 %v865_v18, %v784_v27 }
  0xc6   : > { %v788_v25 = vpop.f32.mrf.mxu1 }
  0xc7   : > { %v730_v6 = vpop.f32.mrf.mxu0 }
  0xc8   : > { %v787_v30 = vadd.f32 %v786_v11, %v730_v6  ;;  %2347 = vmatmul.msk.bf16.gmra.mxu2 %vm700_vm7, %v1304_v26 }
  0xca   : > { %2377 = vmatmul.msk.bf16.vlgmr.msra.gmra.mxu0 %vm700_vm7, %v1522_v62 }
  0xcb   : > { %v868_v42 = vpop.f32.mrf.mxu2 }
  0xcc   : > { %v3120_v9 = vpop.f32.mrf.mxu3  ;;  %v890_v17 = vadd.f32 %v868_v42, %v787_v30 }
  0xce   : > { %v791_v35 = vpop.f32.mrf.mxu1 }
  0xcf   : > { %v732_v32 = vpop.f32.mrf.mxu0 }
  0xd0   : > { %v789_v39 = vadd.f32 %v788_v25, %v732_v32 }
  0xd1   : > { %2363 = vmatmul.msk.bf16.gmra.mxu3 %vm700_vm7, %v1429_v33 }
  0xd3   : > { %v870_v37 = vpop.f32.mrf.mxu2 }
  0xd4   : > { %v989_v41 = vpop.f32.mrf.mxu3  ;;  %v891_v45 = vadd.f32 %v870_v37, %v789_v39 }
  0xd5   : > { %v1014_v44 = vadd.f32 %v989_v41, %v888_v8 }
  0xd6   : > { %v793_v46 = vpop.f32.mrf.mxu1 }
  0xd7   : > { %v735_v50 = vpop.f32.mrf.mxu0 }
  0xd8   : > { %v792_v52 = vadd.f32 %v791_v35, %v735_v50 }
  0xda   : > { %2378 = vmatmul.msk.bf16.gmra.mxu0 %vm700_vm7, %v1524_v51 }
  0xdb   : > { %v873_v59 = vpop.f32.mrf.mxu2 }
  0xdc   : > { %v991_v57 = vpop.f32.mrf.mxu3  ;;  %v892_v61 = vadd.f32 %v873_v59, %v792_v52 }
  0xdd   : > { %v1015_v60 = vadd.f32 %v991_v57, %v889_v56 }
  0xde   : > { %v796_v0 = vpop.f32.mrf.mxu1 }
  0xdf   : > { %v737_v2 = vpop.f32.mrf.mxu0 }
  0xe0   : > { %v794_v53 = vadd.f32 %v793_v46, %v737_v2 }
  0xe1   : > { %2364 = vmatmul.msk.bf16.gmra.mxu3 %vm700_vm7, %v1438_v63 }
  0xe3   : > { %v875_v34 = vpop.f32.mrf.mxu2 }
  0xe4   : > { %v994_v3 = vpop.f32.mrf.mxu3  ;;  %v893_v5 = vadd.f32 %v875_v34, %v794_v53 }
  0xe5   : > { %v1016_v4 = vadd.f32 %v994_v3, %v890_v17 }
  0xe6   : > { %v798_v7 = vpop.f32.mrf.mxu1 }
  0xe7   : > { %v740_v8 = vpop.f32.mrf.mxu0 }
  0xe8   : > { %v797_v11 = vadd.f32 %v796_v0, %v740_v8 }
  0xea   : > { %2379 = vmatmul.msk.bf16.gmra.mxu0 %vm700_vm7, %v1526_v10  ;;  %v2530_v10 = vld [vmem:[%s3301_s4 + $0x8] sm:$0xff] }
  0xeb   : > { %v878_v13 = vpop.f32.mrf.mxu2  ;;  %1833 = vmatpush.bf16.msra.mxu2 %v2530_v10 }
  0xec   : > { %v996_v12 = vpop.f32.mrf.mxu3  ;;  %v894_v15 = vadd.f32 %v878_v13, %v797_v11  ;;  %v2534_v11 = vld [vmem:[%s3301_s4 + $0x28] sm:$0xff] }
  0xed   : > { %v1017_v14 = vadd.f32 %v996_v12, %v891_v45  ;;  %1871 = vmatpush.bf16.msrb.mxu3 %v2534_v11 }
  0xee   : > { %v801_v16 = vpop.f32.mrf.mxu1 }
  0xef   : > { %v802_v19 = vadd.f32 %v801_v16, %v3113_v21  ;;  %v742_v20 = vpop.f32.mrf.mxu0  ;;  %v2532_v16 = vld [vmem:[%s3301_s4 + $0x18] sm:$0xff] }
  0xf0   : > { %v799_v18 = vadd.f32 %v798_v7, %v742_v20  ;;  %1801 = vmatpush.bf16.msra.mxu1 %v2532_v16 }
  0xf3   : > { %v880_v29 = vpop.f32.mrf.mxu2 }
  0xf4   : > { %v999_v23 = vpop.f32.mrf.mxu3  ;;  %v895_v26 = vadd.f32 %v880_v29, %v799_v18 }
  0xf5   : > { %v1018_v25 = vadd.f32 %v999_v23, %v892_v61 }
  0xf6   : > { %v803_v31 = vpop.f32.mrf.mxu1 }
  0xf7   : > { %v1123_v38 = vpop.f32.mrf.mxu0  ;;  %v804_v17 = vadd.f32 %v803_v31, %v3120_v9 }
  0xf8   : > { %v1148_v58 = vadd.f32 %v1123_v38, %v1014_v44  ;;  %v3169_v38 = vld [vmem:[%s3300_s3] ss:$0 sm:$0xff] }
  0xfa   : > { %2380 = vmatmul.msk.bf16.gmra.mxu0 %vm700_vm7, %v1528_v28 }
  0xfb   : > { %v883_v62 = vpop.f32.mrf.mxu2 }
  0xfc   : > { %v1001_v6 = vpop.f32.mrf.mxu3  ;;  %v896_v22 = vadd.f32 %v883_v62, %v802_v19 }
  0xfd   : > { %v1019_v30 = vadd.f32 %v1001_v6, %v893_v5 }
  0xfe   : > { %v1215_v56 = vpop.f32.mrf.mxu1 }
  0xff   : > { %v1125_v21 = vpop.f32.mrf.mxu0  ;;  %v1240_v23 = vadd.f32 %v1215_v56, %v1148_v58 }
 0x100   : > { %v1149_v42 = vadd.f32 %v1125_v21, %v1015_v60 }
 0x103   : > { %v885_v35 = vpop.f32.mrf.mxu2 }
 0x104   : > { %v1004_v33 = vpop.f32.mrf.mxu3  ;;  %v897_v39 = vadd.f32 %v885_v35, %v804_v17 }
 0x105   : > { %v1020_v32 = vadd.f32 %v1004_v33, %v894_v15 }
 0x106   : > { %v1217_v63 = vpop.f32.mrf.mxu1 }
 0x107   : > { %v1128_v1 = vpop.f32.mrf.mxu0  ;;  %v1241_v13 = vadd.f32 %v1217_v63, %v1149_v42 }
 0x108   : > { %v1150_v41 = vadd.f32 %v1128_v1, %v1016_v4 }
 0x10a   : > { %2381 = vmatmul.msk.bf16.gmra.mxu0 %vm700_vm7, %v1530_v40 }
 0x10b   : > { %v1341_v57 = vpop.f32.mrf.mxu2 }
 0x10c   : > { %v1006_v37 = vpop.f32.mrf.mxu3 }
 0x10d   : > { %v1021_v43 = vadd.f32 %v1006_v37, %v895_v26 }
 0x10e   : > { %v1220_v4 = vpop.f32.mrf.mxu1 }
 0x10f   : > { %v1130_v44 = vpop.f32.mrf.mxu0  ;;  %v1242_v29 = vadd.f32 %v1220_v4, %v1150_v41 }
 0x110   : > { %v1151_v45 = vadd.f32 %v1130_v44, %v1017_v14 }
 0x113   : > { %v1343_v53 = vpop.f32.mrf.mxu2 }
 0x114   : > { %v1009_v46 = vpop.f32.mrf.mxu3  ;;  %v1367_v15 = vadd.f32 %v1343_v53, %v1241_v13 }
 0x115   : > { %v1022_v47 = vadd.f32 %v1009_v46, %v896_v22 }
 0x116   : > { %v1222_v12 = vpop.f32.mrf.mxu1 }
 0x117   : > { %v1133_v49 = vpop.f32.mrf.mxu0  ;;  %v1243_v58 = vadd.f32 %v1222_v12, %v1151_v45 }
 0x118   : > { %v3145_v9 = vadd.f32 %v1133_v49, %v1018_v25  ;;  %v1366_v25 = vadd.f32 %v1341_v57, %v1240_v23 }
 0x11b   : > { %v1346_v5 = vpop.f32.mrf.mxu2 }
 0x11c   : > { %v1011_v50 = vpop.f32.mrf.mxu3  ;;  %v1368_v26 = vadd.f32 %v1346_v5, %v1242_v29 }
 0x11d   : > { %v1023_v51 = vadd.f32 %v1011_v50, %v897_v39 }
 0x11e   : > { %v1225_v28 = vpop.f32.mrf.mxu1 }
 0x11f   : > { %v1135_v36 = vpop.f32.mrf.mxu0  ;;  %v1244_v45 = vadd.f32 %v1225_v28, %v3145_v9 }
 0x120   : > { %v3147_v27 = vadd.f32 %v1135_v36, %v1019_v30 }
 0x123   : > { %v1348_v14 = vpop.f32.mrf.mxu2 }
 0x124   : > { %v1475_v61 = vpop.f32.mrf.mxu3 }
 0x125   : > { %v1500_v6 = vadd.f32 %v1475_v61, %v1366_v25 }
 0x126   : > { %v1227_v37 = vpop.f32.mrf.mxu1 }
 0x127   : > { %v1138_v52 = vpop.f32.mrf.mxu0  ;;  %v1245_v4 = vadd.f32 %v1227_v37, %v3147_v27  ;;  %v2533_v27 = vld [vmem:[%s3301_s4 + $0x20] sm:$0xff] }
 0x128   : > { %v3149_v54 = vadd.f32 %v1138_v52, %v1020_v32  ;;  %v1369_v32 = vadd.f32 %v1348_v14, %v1243_v58  ;;  %1872 = vmatpush.bf16.msrb.mxu3 %v2533_v27 }
 0x12b   : > { %v1351_v22 = vpop.f32.mrf.mxu2 }
 0x12c   : > { %v1477_v3 = vpop.f32.mrf.mxu3  ;;  %v1370_v52 = vadd.f32 %v1351_v22, %v1244_v45 }
 0x12d   : > { %v1501_v18 = vadd.f32 %v1477_v3, %v1367_v15 }
 0x12e   : > { %v1230_v3 = vpop.f32.mrf.mxu1 }
 0x12f   : > { %v1140_v59 = vpop.f32.mrf.mxu0  ;;  %v1246_v29 = vadd.f32 %v1230_v3, %v3149_v54 }
 0x130   : > { %v3151_v60 = vadd.f32 %v1140_v59, %v1021_v43 }
 0x133   : > { %v1353_v49 = vpop.f32.mrf.mxu2 }
 0x134   : > { %v1480_v7 = vpop.f32.mrf.mxu3 }
 0x135   : > { %v1502_v62 = vadd.f32 %v1480_v7, %v1368_v26  ;;  %v1371_v7 = vadd.f32 %v1353_v49, %v1245_v4 }
 0x136   : > { %v1232_v23 = vpop.f32.mrf.mxu1 }
 0x137   : > { %v1143_v0 = vpop.f32.mrf.mxu0  ;;  %v1247_v22 = vadd.f32 %v1232_v23, %v3151_v60 }
 0x138   : > { %v3153_v2 = vadd.f32 %v1143_v0, %v1022_v47 }
 0x13b   : > { %v1356_v9 = vpop.f32.mrf.mxu2 }
 0x13c   : > { %v1482_v19 = vpop.f32.mrf.mxu3  ;;  %v1372_v26 = vadd.f32 %v1356_v9, %v1246_v29 }
 0x13d   : > { %v1503_v1 = vadd.f32 %v1482_v19, %v1369_v32 }
 0x13f   : > { %v1145_v34 = vpop.f32.mrf.mxu0 }
 0x140   : > { %v3155_v55 = vadd.f32 %v1145_v34, %v1023_v51 }
 0x143   : > { %v1358_v25 = vpop.f32.mrf.mxu2 }
 0x144   : > { %v1485_v17 = vpop.f32.mrf.mxu3 }
 0x145   : > { %v1504_v57 = vadd.f32 %v1485_v17, %v1370_v52 }
 0x147   : > { %v1567_v8 = vpop.f32.mrf.mxu0 }
 0x148   : > { %v1592_v31 = vadd.f32 %v1567_v8, %v1500_v6 }
 0x14a   : > { %v1606_v48 = vadd.f32 %v3169_v38, %v1592_v31 }
 0x14c   : > { %v1616_v43 = vmax.f32 %v1606_v48, 0.0  ;;  %v1487_v36 = vpop.f32.mrf.mxu3 }
 0x14d   : > { %v1505_v11 = vadd.f32 %v1487_v36, %v1371_v7 }
 0x14f   : > { %v1569_v20 = vpop.f32.mrf.mxu0 }
 0x150   : > { %v1593_v24 = vadd.f32 %v1569_v20, %v1501_v18  ;;  %v2529_v20 = vld [vmem:[%s3301_s4] sm:$0xff] }
 0x151   : > { %1834 = vmatpush.bf16.msra.mxu2 %v2529_v20 }
 0x152   : > { %v1607_v30 = vadd.f32 %v3169_v38, %v1593_v24 }
 0x154   : > { %v1617_v33 = vmax.f32 %v1607_v30, 0.0  ;;  %v1490_v10 = vpop.f32.mrf.mxu3 }
 0x155   : > { %v1506_v30 = vadd.f32 %v1490_v10, %v1372_v26 }
 0x156   : > { %v1647_v40 = vrot.slane %v1617_v33, 2  ;;  %v1361_v33 = vpop.f32.mrf.mxu2 }
 0x157   : > { %v1572_v21 = vpop.f32.mrf.mxu0 }
 0x158   : > { %v1594_v42 = vadd.f32 %v1572_v21, %v1502_v62  ;;  %v1373_v21 = vadd.f32 %v1358_v25, %v1247_v22 }
 0x15a   : > { %v1608_v35 = vadd.f32 %v3169_v38, %v1594_v42  ;;  %v1235_v42 = vpop.f32.mrf.mxu1 }
 0x15b   : > { %v1248_v54 = vadd.f32 %v1235_v42, %v3153_v2  ;;  %v2539_v42 = vld [vmem:[%s3303_s6 + $0x18] sm:$0xff] }
 0x15c   : > { %v1618_v39 = vmax.f32 %v1608_v35, 0.0  ;;  %v1492_v6 = vpop.f32.mrf.mxu3 }
 0x15d   : > { %v1507_v17 = vadd.f32 %v1492_v6, %v1373_v21  ;;  %v1374_v60 = vadd.f32 %v1361_v33, %v1248_v54  ;;  %v2542_v21 = vld [vmem:[%s3303_s6 + $0x28] sm:$0xff]  ;;  %v2538_v33 = vld [vmem:[%s3303_s6 + $0x10] sm:$0xff] }
 0x15e   : > { %v1648_v41 = vrot.slane %v1618_v39, 2  ;;  %v1664_v59 = vrot.slane %v1618_v39, 4  ;;  %v1363_v45 = vpop.f32.mrf.mxu2  ;;  %2002 = vmatpush.bf16.msra.mxu3 %v2542_v21 }
 0x15f   : > { %v1574_v44 = vpop.f32.mrf.mxu0 }
 0x160   : > { %v1649_v46 = vsel %vm1167_vm13, %v1647_v40, %v1648_v41  ;;  %v1595_v47 = vadd.f32 %v1574_v44, %v1503_v1  ;;  %v2531_v40 = vld [vmem:[%s3301_s4 + $0x10] sm:$0xff] }
 0x161   : > { %v1651_v50 = vadd.f32 %v1649_v46, %v1616_v43  ;;  %1802 = vmatpush.bf16.msra.mxu1 %v2531_v40 }
 0x162   : > { %v1609_v51 = vadd.f32 %v3169_v38, %v1595_v47  ;;  %v1237_v46 = vpop.f32.mrf.mxu1 }
 0x164   : > { %v1619_v56 = vmax.f32 %v1609_v51, 0.0  ;;  %v1495_v32 = vpop.f32.mrf.mxu3  ;;  %v1249_v51 = vadd.f32 %v1237_v46, %v3155_v55 }
 0x165   : > { %v1508_v37 = vadd.f32 %v1495_v32, %v1374_v60  ;;  %1933 = vmatpush.bf16.msrb.mxu1 %v2539_v42 }
 0x166   : > { %v1665_v61 = vrot.slane %v1619_v56, 4  ;;  %v1681_v12 = vrot.slane %v1619_v56, 6  ;;  %v1375_v56 = vadd.f32 %v1363_v45, %v1249_v51 }
 0x167   : > { %v1577_v63 = vpop.f32.mrf.mxu0 }
 0x168   : > { %v1666_v0 = vsel %vm1663_vm1, %v1664_v59, %v1665_v61  ;;  %v1596_v53 = vadd.f32 %v1577_v63, %v1504_v57 }
 0x169   : > { %v1668_v34 = vadd.f32 %v1666_v0, %v1651_v50  ;;  %1934 = vmatpush.bf16.msrb.mxu1 %v2538_v33 }
 0x16a   : > { %v1610_v5 = vadd.f32 %v3169_v38, %v1596_v53 }
 0x16c   : > { %v1620_v8 = vmax.f32 %v1610_v5, 0.0  ;;  %v1497_v52 = vpop.f32.mrf.mxu3 }
 0x16d   : > { %v1509_v59 = vadd.f32 %v1497_v52, %v1375_v56 }
 0x16e   : > { %v1682_v13 = vrot.slane %v1620_v8, 6 }
 0x16f   : > { %v1579_v14 = vpop.f32.mrf.mxu0 }
 0x170   : > { %v1597_v15 = vadd.f32 %v1579_v14, %v1505_v11  ;;  %v1683_v16 = vsel %vm1680_vm2, %v1681_v12, %v1682_v13 }
 0x171   : > { %v1685_v19 = vadd.f32 %v1683_v16, %v1668_v34 }
 0x172   : > { %v1611_v18 = vadd.f32 %v3169_v38, %v1597_v15 }
 0x174   : > { %v1621_v24 = vmax.f32 %v1611_v18, 0.0 }
 0x176   : > { %v1694_v28 = vadd.f32 %v1685_v19, %v1621_v24 }
 0x177   : > { %v1582_v62 = vpop.f32.mrf.mxu0 }
 0x178   : > { %v1598_v31 = vadd.f32 %v1582_v62, %v1506_v30 }
 0x17a   : > { %v1612_v58 = vadd.f32 %v3169_v38, %v1598_v31  ;;  %v2536_v31 = vld [vmem:[%s3303_s6 + $0x8] sm:$0xff] }
 0x17b   : > { %1961 = vmatpush.bf16.msrb.mxu2 %v2536_v31 }
 0x17c   : > { %v1622_v39 = vmax.f32 %v1612_v58, 0.0  ;;  %v2541_v58 = vld [vmem:[%s3303_s6 + $0x20] sm:$0xff] }
 0x17d   : > { %2003 = vmatpush.bf16.msra.mxu3 %v2541_v58 }
 0x17e   : > { %v1706_v43 = vrot.slane %v1622_v39, 2  ;;  %v2602_v39 = vld [vmem:[%s3302_s5] ss:$0 sm:$0xff] }
 0x17f   : > { %v1584_v35 = vpop.f32.mrf.mxu0 }
 0x180   : > { %v1599_v48 = vadd.f32 %v1584_v35, %v1507_v17  ;;  %v2535_v17 = vld [vmem:[%s3303_s6] sm:$0xff] }
 0x181   : > { %1962 = vmatpush.bf16.msrb.mxu2 %v2535_v17 }
 0x182   : > { %v1613_v1 = vadd.f32 %v3169_v38, %v1599_v48 }
 0x184   : > { %v1623_v41 = vmax.f32 %v1613_v1, 0.0 }
 0x186   : > { %v1707_v44 = vrot.slane %v1623_v41, 2  ;;  %v1722_v61 = vrot.slane %v1623_v41, 4 }
 0x187   : > { %v1587_v47 = vpop.f32.mrf.mxu0 }
 0x188   : > { %v1708_v49 = vsel %vm1167_vm13, %v1706_v43, %v1707_v44  ;;  %v1600_v50 = vadd.f32 %v1587_v47, %v1508_v37 }
 0x189   : > { %v1710_v2 = vadd.f32 %v1708_v49, %v1694_v28 }
 0x18a   : > { %v1614_v36 = vadd.f32 %v3169_v38, %v1600_v50 }
 0x18c   : > { %v1624_v57 = vmax.f32 %v1614_v36, 0.0 }
 0x18e   : > { %v1723_v63 = vrot.slane %v1624_v57, 4  ;;  %v1738_v9 = vrot.slane %v1624_v57, 6 }
 0x18f   : > { %v1589_v0 = vpop.f32.mrf.mxu0 }
 0x190   : > { %v1724_v53 = vsel %vm1663_vm1, %v1722_v61, %v1723_v63  ;;  %v1601_v3 = vadd.f32 %v1589_v0, %v1509_v59  ;;  %v2545_v61 = vld [vmem:[%s3305_s8 + $0x14] sm:$0xf]  ;;  %v2480_v63 = vld [vmem:[%s3305_s8 + $0x18] sm:$0xf0] }
 0x191   : > { %v1726_v34 = vadd.f32 %v1724_v53, %v1710_v2  ;;  %v2483_v0 = vor.u32 %v2545_v61, %v2480_v63  ;;  %v2478_v53 = vld [vmem:[%s3305_s8 + $0x10] sm:$0xf] }
 0x192   : > { %v1615_v4 = vadd.f32 %v3169_v38, %v1601_v3  ;;  %v2546_v3 = vld [vmem:[%s3305_s8 + $0x14] sm:$0xf0] }
 0x194   : > { %v1625_v5 = vmax.f32 %v1615_v4, 0.0  ;;  %v2543_v4 = vld [vmem:[%s3305_s8 + $0x4] sm:$0xf] }
 0x196   : > { %v1739_v7 = vrot.slane %v1625_v5, 6  ;;  %v2472_v5 = vld [vmem:[%s3305_s8 + $0x8] sm:$0xf0] }
 0x198   : > { %v1740_v55 = vsel %vm1680_vm2, %v1738_v9, %v1739_v7  ;;  %v2470_v9 = vld [vmem:[%s3305_s8] sm:$0xf]  ;;  %v2475_v7 = vor.u32 %v2543_v4, %v2472_v5 }
 0x199   : > { %v1742_v8 = vadd.f32 %v1740_v55, %v1726_v34  ;;  %v2479_v34 = vor.u32 %v2546_v3, %v2478_v53  ;;  %v2544_v55 = vld [vmem:[%s3305_s8 + $0x4] sm:$0xf0] }
 0x19b   : > { %v1743_v10 = vmul.f32 0.125, %v1742_v8  ;;  %v2471_v8 = vor.u32 %v2544_v55, %v2470_v9 }
 0x19d   : > { %v1746_v11 = vpack.c.bf16 %v1743_v10, %v1743_v10 }
 0x19f   : > { %v1748_v12 = vrot.slane %v1746_v11, 6 }
 0x1a1   : > { %v1749_v13 = vrot.slane %v1748_v12, 4  ;;  %1753 = vst.msk [vmem:[#allocation3] sm:$0xc] %vm1752_vm3, %v1748_v12 }
 0x1a3   : > { %1754 = vst.msk [vmem:[#allocation3 + $0x4] sm:$0x3] %vm593_vm15, %v1749_v13  ;;  %v2603_v13 = vld [vmem:[%s3304_s7] ss:$0 sm:$0xff] }
 0x1a8   : > { %v1755_v14 = vld [vmem:[#allocation3] sm:$0xe] }
 0x1a9   : > { %v1840_v15 = vld [vmem:[#allocation3] sm:$0xc]  ;;  %v1769_v38 = vunpack.c.l.b16 %v1755_v14 }
 0x1aa   : > { %v1756_v16 = vld [vmem:[#allocation3 + $0x4] sm:$0x1]  ;;  %v1847_v18 = vunpack.c.l.b16 %v1840_v15 }
 0x1ab   : > { %v1761_v19 = vld [vmem:[#allocation3 + $0x4] sm:$0x3]  ;;  %v1809_v20 = vunpack.c.l.b16 %v1756_v16 }
 0x1ac   : > { %v1770_v27 = vunpack.c.l.b16 %v1761_v19 }
 0x1ad   : > { %v1810_v23 = vpack.c.b16 %v1809_v20, %v1769_v38 }
 0x1ae   : > { %v1848_v29 = vpack.c.b16 %v1770_v27, %v1847_v18  ;;  %v1771_v24 = vpack.c.b16 %v1770_v27, %v1769_v38 }
 0x1af   : > { %v1811_v25 = vrot.slane %v1810_v23, 1 }
 0x1b0   : > { %v1849_v26 = vrot.slane %v1848_v29, 2  ;;  %v1773_v28 = vshrl.u32 %v1771_v24, 16  ;;  %v1776_v6 = vshll.u32 %v1771_v24, 16  ;;  %v2022_v29 = vld [vmem:[%s3306_s9] sm:$0x3] }
 0x1b1   : > { %2411 = vmatmul.msk.bf16.vlgmr.msra.gmra.mxu2 %vm700_vm7, %v1811_v25  ;;  %v2024_v24 = vperm.slane %v2022_v29, 0 }
 0x1b2   : > { %2424 = vmatmul.msk.bf16.vlgmr.msrb.gmra.mxu3 %vm700_vm7, %v1849_v26  ;;  %v1775_v62 = vrot.slane %v1773_v28, 1  ;;  %v1778_v30 = vrot.slane %v1776_v6, 2  ;;  %2070 = vmatpush.bf16.msra.mxu2 %v2483_v0  ;;  %v2025_v28 = vperm.slane %v2022_v29, 1 }
 0x1b4   : > { %v1779_v22 = vor.u32 %v1778_v30, %v1775_v62 }
 0x1b6   : > { %2402 = vmatmul.msk.bf16.vlgmr.msra.gmra.mxu1 %vm700_vm7, %v1779_v22  ;;  %2071 = vmatpush.bf16.msra.mxu2 %v2475_v7 }
 0x1b7   : > { %2057 = vmatpush.bf16.msra.mxu1 %v2479_v34 }
 0x1bb   : > { %2058 = vmatpush.bf16.msra.mxu1 %v2471_v8 }
 0x233   : > { %v1804_v35 = vpop.f32.mrf.mxu1 }
 0x234   : > { %v1836_v48 = vpop.f32.mrf.mxu2 }
 0x235   : > { %v1874_v32 = vpop.f32.mrf.mxu3  ;;  %v1837_v54 = vadd.f32 %v1836_v48, %v1804_v35 }
 0x237   : > { %v1878_v1 = vadd.f32 %v1874_v32, %v1837_v54 }
 0x239   : > { %v1883_v40 = vadd.f32 %v2602_v39, %v1878_v1 }
 0x23b   : > { %v1806_v60 = vpop.f32.mrf.mxu1  ;;  %v1884_v41 = vmax.f32 %v1883_v40, 0.0 }
 0x23c   : > { %v1838_v37 = vpop.f32.mrf.mxu2 }
 0x23d   : > { %v1876_v43 = vpop.f32.mrf.mxu3  ;;  %v1885_v44 = vadd.f32 %v1884_v41, %v1743_v10 }
 0x23f   : > { %v1886_v46 = vpack.c.bf16 %v1885_v44, %v1885_v44 }
 0x241   : > { %v1888_v47 = vrot.slane %v1886_v46, 6 }
 0x243   : > { %v1889_v49 = vrot.slane %v1888_v47, 4  ;;  %1892 = vst.msk [vmem:[#allocation3] sm:$0xc] %vm1752_vm3, %v1888_v47 }
 0x245   : > { %1893 = vst.msk [vmem:[#allocation3 + $0x4] sm:$0x3] %vm593_vm15, %v1889_v49 }
 0x24a   : > { %v1894_v50 = vld [vmem:[#allocation3] sm:$0xf] }
 0x24b   : > { %2450 = vmatmul.msk.bf16.vlgmr.msrb.gmra.mxu2 %vm700_vm7, %v1894_v50  ;;  %v2431_v45 = vld [vmem:[#allocation3] sm:$0xe] }
 0x24c   : > { %v2537_v2 = vld [vmem:[#allocation3] sm:$0x10]  ;;  %v2457_v51 = vld [vmem:[#allocation3] sm:$0xc] }
 0x24d   : > { %v2540_v36 = vld [vmem:[#allocation3] sm:$0x30]  ;;  %v2432_v52 = vor.u32 %v2537_v2, %v2431_v45 }
 0x24e   : > { %v2458_v56 = vor.u32 %v2540_v36, %v2457_v51 }
 0x24f   : > { %v1911_v57 = vrot.slane %v2432_v52, 1 }
 0x250   : > { %v1980_v59 = vrot.slane %v2458_v56, 2 }
 0x251   : > { %2441 = vmatmul.msk.bf16.vlgmr.msrb.gmra.mxu1 %vm700_vm7, %v1911_v57 }
 0x252   : > { %2467 = vmatmul.msk.bf16.vlgmr.msra.gmra.mxu3 %vm700_vm7, %v1980_v59 }
 0x2ce   : > { %v1936_v10 = vpop.f32.mrf.mxu1  ;;  %v1964_v11 = vpop.f32.mrf.mxu2 }
 0x2cf   : > { %v1965_v12 = vadd.f32 %v1964_v11, %v1936_v10 }
 0x2d5   : > { %v2005_v14 = vpop.f32.mrf.mxu3 }
 0x2d6   : > { %v2009_v15 = vadd.f32 %v2005_v14, %v1965_v12  ;;  %v1938_v16 = vpop.f32.mrf.mxu1  ;;  %v1966_v19 = vpop.f32.mrf.mxu2 }
 0x2d8   : > { %v2014_v38 = vadd.f32 %v2603_v13, %v2009_v15 }
 0x2da   : > { %v2015_v20 = vmax.f32 %v2014_v38, 0.0 }
 0x2dc   : > { %v2016_v27 = vadd.f32 %v2015_v20, %v1885_v44 }
 0x2dd   : > { %v2007_v18 = vpop.f32.mrf.mxu3 }
 0x2de   : > { %v2017_v23 = vpack.c.bf16 %v2016_v27, %v2016_v27 }
 0x2e0   : > { %2484 = vmatmul.msk.bf16.vlgmr.msra.gmra.mxu1 %vm700_vm7, %v2017_v23  ;;  %2485 = vmatmul.msk.bf16.vlgmr.msra.gmra.mxu2 %vm700_vm7, %v2017_v23 }
 0x35d   : > { %v2060_v25 = vpop.f32.mrf.mxu1 }
 0x35e   : > { %v2061_v26 = vadd.f32 %v2060_v25, %v2024_v24 }
 0x360   : > { %2077 = vst [vmem:[%s364_s29] sm:$0xff] %v2061_v26 }
 0x363   : > { %v2073_v6 = vpop.f32.mrf.mxu2 }
 0x364   : > { %v2074_v62 = vadd.f32 %v2073_v6, %v2025_v28 }
 0x365   : > { %v2062_v30 = vpop.f32.mrf.mxu1 }
 0x366   : > { %2078 = vst [vmem:[%s364_s29 + $0x8] sm:$0xff] %v2074_v62 }
 0x367   : > { %2643 = shalt.err (!%p2640_p7)
}
 0x368   : > { %2558 = dma.vmem_to_hbm [thread:$0]  (%p2782_p5), %s2094_s30, 256, %s2096_s12, %s2080_s13  }
 0x36b   : > { %v2075_v22 = vpop.f32.mrf.mxu2 }
 0x36c PF: > { %p2564_p8 = scmp.ge.s32.totalorder %s2680_s20, 2  ;;  %s2107_s14 = sand.u32 1, %s2668_s17  }
 0x36d   : > { %s2108_s28 = scalar_lea.sflag [#allocation7], %s2107_s14 }
 0x36e   : > { %p2561_p9 = pnand %p2564_p8, %p2786_p6 }
 0x370   : > { %p2562_p10 = pneg %p2561_p9 }
 0x372   : > { %2663 = dma.done.wait (%p2562_p10), %s2108_s28, 256  }
 0x373   : > { %2665 = vsyncadd (%p2562_p10), %s2108_s28, 4294967040  ;;  %p28_p11 = scmp.ge.s32.totalorder %s2769_s22, 5   ;;  %s3316_s17 = smov %s2672_s18 }
 0x374   : > { %s3317_s18 = smov %s2676_s19  ;;  %s3318_s19 = smov %s2780_s25 }
 0x375   : > { %s3319_s20 = smov %s2769_s22  ;;  %30 = sbr.rel (!%p28_p11) target bundleno = 9 (0x9), region = 103 }
 0x37a   :  { %2114 = vsyncpa [#allocation7], 1 }
 0x37b   :  { %2116 = vsyncpa [#allocation7 + $0x1], 1 }

</bundles_post_ra>
